<compile_context>
chip_gen: v7x
topology: tpu7x:2x2x1
jax: 0.10.0
libtpu: 0.0.40
codegen_flags: <defaults>
</compile_context>

<pallas_src>
import functools

import jax
import jax.numpy as jnp
from jax.experimental import pallas as pl
from jax.experimental.pallas import tpu as pltpu


# Kernel-index -> (input-row parity, slice start inside the zero-bordered phase plane)
# for a 3x3 / stride-2 / pad-1 conv: tap offset d-1 touches input row 2*i + d - 1,
# i.e. phase (d+1)%2 at plane-row i-1 (d==0) or i (d==1,2).
_TAP = ((1, 0), (0, 1), (1, 1))


# ----------------------------------------------------------------------------
# Fused Pallas kernel: conv1..conv5 (+folded BN + ReLU) + avgpool + 1x1 conv head
# ----------------------------------------------------------------------------
def _encoder_kernel(c1_ref, w1_ref, b1_ref, w2_ref, b2_ref, w3_ref, b3_ref,
                    w4_ref, b4_ref, w5_ref, b5_ref, wh_ref, bh_ref,
                    o_ref, p2_ref, c2_ref, p3_ref, c3_ref):
    f32 = jnp.float32
    bf16 = jnp.bfloat16

    # ---- conv1 + BN + ReLU: one matmul on the precomputed (phase-ordered) im2col ----
    a1 = jnp.dot(c1_ref[0], w1_ref[...], preferred_element_type=f32)
    a1 = jnp.maximum(a1 + b1_ref[...], 0.0)                    # [64, 128] f32

    # ---- scatter conv1 output into conv2's zero-bordered phase planes (in VMEM) ----
    p2_ref[...] = jnp.zeros(p2_ref.shape, f32)
    for t in range(4):                                          # phase (p, q) = (t//2, t%2)
        for a in range(4):                                      # plane row
            r = 16 * t + 4 * a
            p2_ref[t, 1 + a, 1:5, :] = a1[r:r + 4, :]

    # ---- conv2 + BN + ReLU: im2col from contiguous phase-plane slices, one matmul ----
    for d_i in range(3):
        p, r0 = _TAP[d_i]
        for d_j in range(3):
            q, c0 = _TAP[d_j]
            t, tap = 2 * p + q, 3 * d_i + d_j
            for a in range(4):                                  # output row i = a
                c2_ref[4 * a:4 * a + 4, tap * 128:(tap + 1) * 128] = (
                    p2_ref[t, r0 + a, c0:c0 + 4, :])
    a2 = jnp.dot(c2_ref[...].astype(bf16), w2_ref[...], preferred_element_type=f32)
    a2 = jnp.maximum(a2 + b2_ref[...], 0.0)                     # [16, 128] f32, 4x4 row-major

    # ---- conv3 + BN + ReLU ----
    p3_ref[...] = jnp.zeros(p3_ref.shape, f32)
    for i in range(4):
        for j in range(4):
            t = 2 * (i % 2) + (j % 2)
            p3_ref[t, 1 + i // 2, 1 + j // 2, :] = a2[4 * i + j, :]
    for d_i in range(3):
        p, r0 = _TAP[d_i]
        for d_j in range(3):
            q, c0 = _TAP[d_j]
            t, tap = 2 * p + q, 3 * d_i + d_j
            for a in range(2):
                c3_ref[2 * a:2 * a + 2, tap * 128:(tap + 1) * 128] = (
                    p3_ref[t, r0 + a, c0:c0 + 2, :])
    a3 = jnp.dot(c3_ref[...].astype(bf16), w3_ref[...], preferred_element_type=f32)
    a3 = jnp.maximum(a3 + b3_ref[...], 0.0)                     # [4, 256] f32, 2x2 row-major

    # ---- conv4 + BN + ReLU: 2x2 input, only the 4 in-bounds taps contribute ----
    x4 = jnp.concatenate([a3[0:1], a3[1:2], a3[2:3], a3[3:4]], axis=-1)   # [1, 1024]
    a4 = jnp.dot(x4.astype(bf16), w4_ref[...], preferred_element_type=f32)
    a4 = jnp.maximum(a4 + b4_ref[...], 0.0)                     # [1, 256]

    # ---- conv5 + BN + ReLU: 1x1 input, only the centre tap contributes ----
    a5 = jnp.dot(a4.astype(bf16), w5_ref[...], preferred_element_type=f32)
    a5 = jnp.maximum(a5 + b5_ref[...], 0.0)                     # [1, 256]

    # ---- head: AdaptiveAvgPool2d((1,1)) over a 1x1 map is identity; 1x1 conv + bias ----
    code = jnp.dot(a5.astype(bf16), wh_ref[...], preferred_element_type=f32)
    o_ref[0] = code + bh_ref[...]                               # [1, 128] f32 (code padded)


# ----------------------------------------------------------------------------
# JAX-level glue
# ----------------------------------------------------------------------------
def _conv1_im2col(x_nhwc, kpad):
    """im2col of the 7x7/stride-2/pad-3 conv, rows grouped by output-pixel parity.

    Returns [N, OH*OW, kpad] bf16.  Row group t = 2*(h%2) + (w%2) holds output pixels
    (h, w) of that parity in row-major order -- the layout the fused kernel's conv2
    phase planes expect.  Tap/channel column order matches w1 packed as [K*K*Cin, 64].
    """
    N, H, W, C = x_nhwc.shape
    K, pad = 7, 3
    OH = (H + 2 * pad - K) // 2 + 1
    OW = (W + 2 * pad - K) // 2 + 1
    xp = jnp.pad(x_nhwc, ((0, 0), (pad, pad), (pad, pad), (0, 0)))
    taps = []
    for di in range(K):
        for dj in range(K):
            taps.append(jax.lax.slice(
                xp, (0, di, dj, 0),
                (N, di + 2 * (OH - 1) + 1, dj + 2 * (OW - 1) + 1, C),
                (1, 2, 2, 1)))                                   # [N, OH, OW, C]
    col = jnp.concatenate(taps, axis=-1).reshape(N, OH * OW, K * K * C)
    order = [(2 * a + p) * OW + (2 * b + q)
             for p in range(2) for q in range(2)
             for a in range(OH // 2) for b in range(OW // 2)]
    col = col[:, jnp.asarray(order), :]
    col = jnp.pad(col, ((0, 0), (0, 0), (0, kpad - K * K * C)))
    return col.astype(jnp.bfloat16)


def _const_spec(a):
    idx = (0,) * a.ndim
    return pl.BlockSpec(a.shape, lambda n, _i=idx: _i)


def private_encoder_forward(params, x_nchw):
    # TODO(synk): the fused kernel hard-codes the 16x16 input spatial pyramid
    # (16 -> 8 -> 4 -> 2 -> 1 -> 1); other input sizes need a re-derived tap schedule.
    N, _, H, W = x_nchw.shape
    assert (H, W) == (16, 16), (H, W)
    x = jnp.transpose(x_nchw, (0, 2, 3, 1)).astype(jnp.bfloat16)        # NCHW -> NHWC
    col1 = _conv1_im2col(x, kpad=params["w1"].shape[0])                  # [N, 64, 256] bf16

    weight_args = (params["w1"], params["b1"], params["w2"], params["b2"],
                   params["w3"], params["b3"], params["w4"], params["b4"],
                   params["w5"], params["b5"], params["wh"], params["bh"])
    out = pl.pallas_call(
        _encoder_kernel,
        out_shape=jax.ShapeDtypeStruct((N, 1, 128), jnp.float32),
        grid=(N,),
        in_specs=[pl.BlockSpec((1,) + col1.shape[1:], lambda n: (n, 0, 0))]
                 + [_const_spec(a) for a in weight_args],
        out_specs=pl.BlockSpec((1, 1, 128), lambda n: (n, 0, 0)),
        scratch_shapes=[
            pltpu.VMEM((4, 5, 5, 128), jnp.float32),    # conv2 input phase planes (+border)
            pltpu.VMEM((16, 9 * 128), jnp.float32),     # conv2 packed im2col
            pltpu.VMEM((4, 3, 3, 128), jnp.float32),    # conv3 input phase planes (+border)
            pltpu.VMEM((4, 9 * 128), jnp.float32),      # conv3 packed im2col
        ],
        compiler_params=pltpu.CompilerParams(dimension_semantics=("parallel",)),
    )(col1, *weight_args)
    return out[:, 0, :params["code_size"]]                               # [bs, code_size]


# ----------------------------------------------------------------------------
# Deterministic synthetic parameters (BN folded, taps packed, lane padding)
# ----------------------------------------------------------------------------
class ParamGen:
    def __init__(self, seed=0):
        self._key = jax.random.PRNGKey(seed)

    def _sub(self):
        self._key, sub = jax.random.split(self._key)
        return sub

    def normal(self, shape, scale=1.0):
        return scale * jax.random.normal(self._sub(), shape, dtype=jnp.float32)


def _fold_conv_bn(pg, k, cin, cout):
    """Conv2d(k, stride=2) + BatchNorm2d (running stats) folded into (weight, shift)."""
    fan_in = k * k * cin
    w = pg.normal((k, k, cin, cout), scale=(2.0 / fan_in) ** 0.5)        # HWIO
    bias = 0.01 * pg.normal((cout,))
    gamma = 1.0 + 0.1 * pg.normal((cout,))
    beta = 0.1 * pg.normal((cout,))
    mean = 0.1 * pg.normal((cout,))
    var = 1.0 + 0.1 * jnp.abs(pg.normal((cout,)))
    scale = gamma * jax.lax.rsqrt(var + 1e-5)
    wf = (w * scale).astype(jnp.bfloat16)        # same quantization point as the kernel
    shift = (beta + (bias - mean) * scale).astype(jnp.float32)
    return wf, shift


def make_private_encoder_params(in_ch, code_size, seed=0):
    pg = ParamGen(seed)
    w1, s1 = _fold_conv_bn(pg, 7, in_ch, 64)
    w2, s2 = _fold_conv_bn(pg, 3, 64, 128)
    w3, s3 = _fold_conv_bn(pg, 3, 128, 256)
    w4, s4 = _fold_conv_bn(pg, 3, 256, 256)
    w5, s5 = _fold_conv_bn(pg, 3, 256, 256)
    head_w = pg.normal((256, code_size), scale=(1.0 / 256) ** 0.5).astype(jnp.bfloat16)
    head_b = (0.01 * pg.normal((code_size,))).astype(jnp.float32)

    k1 = 7 * 7 * in_ch
    k1p = ((k1 + 127) // 128) * 128
    # conv1: taps packed into K (196 -> 256), Cout 64 -> 128 lanes (zeros).
    w1p = jnp.pad(w1.reshape(k1, 64), ((0, k1p - k1), (0, 64)))
    b1p = jnp.pad(s1, (0, 64)).reshape(1, 128)
    # conv2: Cin 64 -> 128 (zeros), taps packed: [3,3,128,128] -> [1152,128].
    w2p = jnp.pad(w2, ((0, 0), (0, 0), (0, 64), (0, 0))).reshape(9 * 128, 128)
    # conv3: [3,3,128,256] -> [1152,256].
    w3p = w3.reshape(9 * 128, 256)
    # conv4: 2x2 input => only taps (1,1),(1,2),(2,1),(2,2) are ever in-bounds.
    w4p = w4[1:3, 1:3].reshape(4 * 256, 256)
    # conv5: 1x1 input => only the centre tap.
    w5p = w5[1, 1]
    # head: pad code_size to 128 lanes.
    whp = jnp.pad(head_w, ((0, 0), (0, 128 - code_size)))
    bhp = jnp.pad(head_b, (0, 128 - code_size)).reshape(1, 128)

    return {
        "code_size": code_size,
        "w1": w1p.astype(jnp.bfloat16), "b1": b1p,
        "w2": w2p.astype(jnp.bfloat16), "b2": s2.reshape(1, 128),
        "w3": w3p.astype(jnp.bfloat16), "b3": s3.reshape(1, 256),
        "w4": w4p.astype(jnp.bfloat16), "b4": s4.reshape(1, 256),
        "w5": w5p.astype(jnp.bfloat16), "b5": s5.reshape(1, 256),
        "wh": whp.astype(jnp.bfloat16), "bh": bhp,
        # unpacked folded weights for the pure-JAX reference
        "ref": {"convs": [(w1, s1, 3), (w2, s2, 1), (w3, s3, 1), (w4, s4, 1), (w5, s5, 1)],
                "head_w": head_w, "head_b": head_b},
    }


# ----------------------------------------------------------------------------
# Pure-JAX reference (same bf16 quantization points) for a numeric sanity check
# ----------------------------------------------------------------------------
def _reference_forward(params, x_nchw):
    x = jnp.transpose(x_nchw, (0, 2, 3, 1)).astype(jnp.bfloat16)
    for w, shift, pad in params["ref"]["convs"]:
        y = jax.lax.conv_general_dilated(
            x.astype(jnp.float32), w.astype(jnp.float32),
            window_strides=(2, 2), padding=[(pad, pad), (pad, pad)],
            dimension_numbers=("NHWC", "HWIO", "NHWC"),
            precision=jax.lax.Precision.HIGHEST)
        x = jnp.maximum(y + shift.reshape(1, 1, 1, -1), 0.0).astype(jnp.bfloat16)
    pooled = jnp.mean(x.astype(jnp.float32), axis=(1, 2))
    code = jnp.dot(pooled.astype(jnp.bfloat16).astype(jnp.float32),
                   params["ref"]["head_w"].astype(jnp.float32),
                   precision=jax.lax.Precision.HIGHEST) + params["ref"]["head_b"]
    return code


# ----------------------------------------------------------------------------
if __name__ == "__main__":
    IN_CH, CODE_SIZE = 4, 32
    params = make_private_encoder_params(IN_CH, CODE_SIZE, seed=0)

    x = jax.random.normal(jax.random.PRNGKey(0), (2, IN_CH, 16, 16), dtype=jnp.float32)

    fwd = jax.jit(functools.partial(private_encoder_forward, params))
    out = fwd(x)
    jax.block_until_ready(out)

    assert out.shape == (2, CODE_SIZE), out.shape
    assert bool(jnp.all(jnp.isfinite(out)))

    ref = _reference_forward(params, x)
    assert bool(jnp.allclose(out, ref, rtol=2e-2, atol=2e-2)), (
        float(jnp.max(jnp.abs(out - ref))))

    print("KERNEL_OK")
</pallas_src>

<mosaic_0001>
module attributes {stable_mosaic.version = 11 : i64} {
  func.func @_encoder_kernel(%arg0: i32, %arg1: memref<1x64x256xbf16, #tpu.memory_space<vmem>>, %arg2: memref<256x128xbf16, #tpu.memory_space<vmem>>, %arg3: memref<1x128xf32, #tpu.memory_space<vmem>>, %arg4: memref<1152x128xbf16, #tpu.memory_space<vmem>>, %arg5: memref<1x128xf32, #tpu.memory_space<vmem>>, %arg6: memref<1152x256xbf16, #tpu.memory_space<vmem>>, %arg7: memref<1x256xf32, #tpu.memory_space<vmem>>, %arg8: memref<1024x256xbf16, #tpu.memory_space<vmem>>, %arg9: memref<1x256xf32, #tpu.memory_space<vmem>>, %arg10: memref<256x256xbf16, #tpu.memory_space<vmem>>, %arg11: memref<1x256xf32, #tpu.memory_space<vmem>>, %arg12: memref<256x128xbf16, #tpu.memory_space<vmem>>, %arg13: memref<1x128xf32, #tpu.memory_space<vmem>>, %arg14: memref<1x1x128xf32, #tpu.memory_space<vmem>>, %arg15: memref<4x5x5x128xf32, #tpu.memory_space<vmem>>, %arg16: memref<16x1152xf32, #tpu.memory_space<vmem>>, %arg17: memref<4x3x3x128xf32, #tpu.memory_space<vmem>>, %arg18: memref<4x1152xf32, #tpu.memory_space<vmem>>) attributes {dimension_semantics = [#tpu.dimension_semantics<parallel>], iteration_bounds = array<i64: 2>, scalar_prefetch = 0 : i64, scratch_operands = 4 : i64, tpu.core_type = #tpu.core_type<tc>, window_params = [{transform_indices = @transform_0, window_bounds = array<i64: 1, 64, 256>}, {pipeline_mode = #tpu.pipeline_mode<synchronous>, transform_indices = @transform_1, window_bounds = array<i64: 256, 128>}, {pipeline_mode = #tpu.pipeline_mode<synchronous>, transform_indices = @transform_2, window_bounds = array<i64: 1, 128>}, {pipeline_mode = #tpu.pipeline_mode<synchronous>, transform_indices = @transform_3, window_bounds = array<i64: 1152, 128>}, {pipeline_mode = #tpu.pipeline_mode<synchronous>, transform_indices = @transform_4, window_bounds = array<i64: 1, 128>}, {pipeline_mode = #tpu.pipeline_mode<synchronous>, transform_indices = @transform_5, window_bounds = array<i64: 1152, 256>}, {pipeline_mode = #tpu.pipeline_mode<synchronous>, transform_indices = @transform_6, window_bounds = array<i64: 1, 256>}, {pipeline_mode = #tpu.pipeline_mode<synchronous>, transform_indices = @transform_7, window_bounds = array<i64: 1024, 256>}, {pipeline_mode = #tpu.pipeline_mode<synchronous>, transform_indices = @transform_8, window_bounds = array<i64: 1, 256>}, {pipeline_mode = #tpu.pipeline_mode<synchronous>, transform_indices = @transform_9, window_bounds = array<i64: 256, 256>}, {pipeline_mode = #tpu.pipeline_mode<synchronous>, transform_indices = @transform_10, window_bounds = array<i64: 1, 256>}, {pipeline_mode = #tpu.pipeline_mode<synchronous>, transform_indices = @transform_11, window_bounds = array<i64: 256, 128>}, {pipeline_mode = #tpu.pipeline_mode<synchronous>, transform_indices = @transform_12, window_bounds = array<i64: 1, 128>}, {transform_indices = @transform_13, window_bounds = array<i64: 1, 1, 128>}]} {
    %c0 = arith.constant 0 : index
    %c0_0 = arith.constant 0 : index
    %c0_1 = arith.constant 0 : index
    %0 = vector.load %arg1[%c0, %c0_0, %c0_1] : memref<1x64x256xbf16, #tpu.memory_space<vmem>>, vector<1x64x256xbf16>
    %1 = vector.shape_cast %0 : vector<1x64x256xbf16> to vector<64x256xbf16>
    %c0_2 = arith.constant 0 : index
    %c0_3 = arith.constant 0 : index
    %2 = vector.load %arg2[%c0_2, %c0_3] : memref<256x128xbf16, #tpu.memory_space<vmem>>, vector<256x128xbf16>
    %cst = arith.constant dense<0.000000e+00> : vector<64x128xf32>
    %3 = tpu.matmul %1, %2, %cst {dimension_numbers = #tpu.dot_dimension_numbers<[1], [0], [0], [1], [0, 0, 1, 1], [], []>} : vector<64x256xbf16>, vector<256x128xbf16>, vector<64x128xf32> -> vector<64x128xf32>
    %c0_4 = arith.constant 0 : index
    %c0_5 = arith.constant 0 : index
    %4 = vector.load %arg3[%c0_4, %c0_5] : memref<1x128xf32, #tpu.memory_space<vmem>>, vector<1x128xf32>
    %5 = vector.broadcast %4 : vector<1x128xf32> to vector<64x128xf32>
    %6 = arith.addf %3, %5 : vector<64x128xf32>
    %cst_6 = arith.constant 0.000000e+00 : f32
    %7 = vector.broadcast %cst_6 : f32 to vector<64x128xf32>
    %8 = arith.maximumf %6, %7 : vector<64x128xf32>
    %cst_7 = arith.constant 0.000000e+00 : f32
    %9 = vector.broadcast %cst_7 : f32 to vector<4x5x5x128xf32>
    %c0_8 = arith.constant 0 : index
    %c0_9 = arith.constant 0 : index
    %c0_10 = arith.constant 0 : index
    %c0_11 = arith.constant 0 : index
    %10 = vector.load %arg15[%c0_8, %c0_9, %c0_10, %c0_11] : memref<4x5x5x128xf32, #tpu.memory_space<vmem>>, vector<4x5x5x128xf32>
    tpu.vector_store %arg15[%c0_8, %c0_9, %c0_10, %c0_11], %9 {strides = array<i32>} : memref<4x5x5x128xf32, #tpu.memory_space<vmem>>, vector<4x5x5x128xf32>,
    %11 = vector.extract_strided_slice %8 {offsets = [0, 0], sizes = [4, 128], strides = [1, 1]} : vector<64x128xf32> to vector<4x128xf32>
    %c0_12 = arith.constant 0 : index
    %c1 = arith.constant 1 : index
    %c1_13 = arith.constant 1 : index
    %c0_14 = arith.constant 0 : index
    %12 = vector.load %arg15[%c0_12, %c1, %c1_13, %c0_14] : memref<4x5x5x128xf32, #tpu.memory_space<vmem>>, vector<1x1x4x128xf32>
    %13 = vector.shape_cast %12 : vector<1x1x4x128xf32> to vector<4x128xf32>
    %14 = vector.shape_cast %11 : vector<4x128xf32> to vector<1x1x4x128xf32>
    tpu.vector_store %arg15[%c0_12, %c1, %c1_13, %c0_14], %14 {strides = array<i32>} : memref<4x5x5x128xf32, #tpu.memory_space<vmem>>, vector<1x1x4x128xf32>,
    %15 = vector.extract_strided_slice %8 {offsets = [4, 0], sizes = [4, 128], strides = [1, 1]} : vector<64x128xf32> to vector<4x128xf32>
    %c0_15 = arith.constant 0 : index
    %c2 = arith.constant 2 : index
    %c1_16 = arith.constant 1 : index
    %c0_17 = arith.constant 0 : index
    %16 = vector.load %arg15[%c0_15, %c2, %c1_16, %c0_17] : memref<4x5x5x128xf32, #tpu.memory_space<vmem>>, vector<1x1x4x128xf32>
    %17 = vector.shape_cast %16 : vector<1x1x4x128xf32> to vector<4x128xf32>
    %18 = vector.shape_cast %15 : vector<4x128xf32> to vector<1x1x4x128xf32>
    tpu.vector_store %arg15[%c0_15, %c2, %c1_16, %c0_17], %18 {strides = array<i32>} : memref<4x5x5x128xf32, #tpu.memory_space<vmem>>, vector<1x1x4x128xf32>,
    %19 = vector.extract_strided_slice %8 {offsets = [8, 0], sizes = [4, 128], strides = [1, 1]} : vector<64x128xf32> to vector<4x128xf32>
    %c0_18 = arith.constant 0 : index
    %c3 = arith.constant 3 : index
    %c1_19 = arith.constant 1 : index
    %c0_20 = arith.constant 0 : index
    %20 = vector.load %arg15[%c0_18, %c3, %c1_19, %c0_20] : memref<4x5x5x128xf32, #tpu.memory_space<vmem>>, vector<1x1x4x128xf32>
    %21 = vector.shape_cast %20 : vector<1x1x4x128xf32> to vector<4x128xf32>
    %22 = vector.shape_cast %19 : vector<4x128xf32> to vector<1x1x4x128xf32>
    tpu.vector_store %arg15[%c0_18, %c3, %c1_19, %c0_20], %22 {strides = array<i32>} : memref<4x5x5x128xf32, #tpu.memory_space<vmem>>, vector<1x1x4x128xf32>,
    %23 = vector.extract_strided_slice %8 {offsets = [12, 0], sizes = [4, 128], strides = [1, 1]} : vector<64x128xf32> to vector<4x128xf32>
    %c0_21 = arith.constant 0 : index
    %c4 = arith.constant 4 : index
    %c1_22 = arith.constant 1 : index
    %c0_23 = arith.constant 0 : index
    %24 = vector.load %arg15[%c0_21, %c4, %c1_22, %c0_23] : memref<4x5x5x128xf32, #tpu.memory_space<vmem>>, vector<1x1x4x128xf32>
    %25 = vector.shape_cast %24 : vector<1x1x4x128xf32> to vector<4x128xf32>
    %26 = vector.shape_cast %23 : vector<4x128xf32> to vector<1x1x4x128xf32>
    tpu.vector_store %arg15[%c0_21, %c4, %c1_22, %c0_23], %26 {strides = array<i32>} : memref<4x5x5x128xf32, #tpu.memory_space<vmem>>, vector<1x1x4x128xf32>,
    %27 = vector.extract_strided_slice %8 {offsets = [16, 0], sizes = [4, 128], strides = [1, 1]} : vector<64x128xf32> to vector<4x128xf32>
    %c1_24 = arith.constant 1 : index
    %c1_25 = arith.constant 1 : index
    %c1_26 = arith.constant 1 : index
    %c0_27 = arith.constant 0 : index
    %28 = vector.load %arg15[%c1_24, %c1_25, %c1_26, %c0_27] : memref<4x5x5x128xf32, #tpu.memory_space<vmem>>, vector<1x1x4x128xf32>
    %29 = vector.shape_cast %28 : vector<1x1x4x128xf32> to vector<4x128xf32>
    %30 = vector.shape_cast %27 : vector<4x128xf32> to vector<1x1x4x128xf32>
    tpu.vector_store %arg15[%c1_24, %c1_25, %c1_26, %c0_27], %30 {strides = array<i32>} : memref<4x5x5x128xf32, #tpu.memory_space<vmem>>, vector<1x1x4x128xf32>,
    %31 = vector.extract_strided_slice %8 {offsets = [20, 0], sizes = [4, 128], strides = [1, 1]} : vector<64x128xf32> to vector<4x128xf32>
    %c1_28 = arith.constant 1 : index
    %c2_29 = arith.constant 2 : index
    %c1_30 = arith.constant 1 : index
    %c0_31 = arith.constant 0 : index
    %32 = vector.load %arg15[%c1_28, %c2_29, %c1_30, %c0_31] : memref<4x5x5x128xf32, #tpu.memory_space<vmem>>, vector<1x1x4x128xf32>
    %33 = vector.shape_cast %32 : vector<1x1x4x128xf32> to vector<4x128xf32>
    %34 = vector.shape_cast %31 : vector<4x128xf32> to vector<1x1x4x128xf32>
    tpu.vector_store %arg15[%c1_28, %c2_29, %c1_30, %c0_31], %34 {strides = array<i32>} : memref<4x5x5x128xf32, #tpu.memory_space<vmem>>, vector<1x1x4x128xf32>,
    %35 = vector.extract_strided_slice %8 {offsets = [24, 0], sizes = [4, 128], strides = [1, 1]} : vector<64x128xf32> to vector<4x128xf32>
    %c1_32 = arith.constant 1 : index
    %c3_33 = arith.constant 3 : index
    %c1_34 = arith.constant 1 : index
    %c0_35 = arith.constant 0 : index
    %36 = vector.load %arg15[%c1_32, %c3_33, %c1_34, %c0_35] : memref<4x5x5x128xf32, #tpu.memory_space<vmem>>, vector<1x1x4x128xf32>
    %37 = vector.shape_cast %36 : vector<1x1x4x128xf32> to vector<4x128xf32>
    %38 = vector.shape_cast %35 : vector<4x128xf32> to vector<1x1x4x128xf32>
    tpu.vector_store %arg15[%c1_32, %c3_33, %c1_34, %c0_35], %38 {strides = array<i32>} : memref<4x5x5x128xf32, #tpu.memory_space<vmem>>, vector<1x1x4x128xf32>,
    %39 = vector.extract_strided_slice %8 {offsets = [28, 0], sizes = [4, 128], strides = [1, 1]} : vector<64x128xf32> to vector<4x128xf32>
    %c1_36 = arith.constant 1 : index
    %c4_37 = arith.constant 4 : index
    %c1_38 = arith.constant 1 : index
    %c0_39 = arith.constant 0 : index
    %40 = vector.load %arg15[%c1_36, %c4_37, %c1_38, %c0_39] : memref<4x5x5x128xf32, #tpu.memory_space<vmem>>, vector<1x1x4x128xf32>
    %41 = vector.shape_cast %40 : vector<1x1x4x128xf32> to vector<4x128xf32>
    %42 = vector.shape_cast %39 : vector<4x128xf32> to vector<1x1x4x128xf32>
    tpu.vector_store %arg15[%c1_36, %c4_37, %c1_38, %c0_39], %42 {strides = array<i32>} : memref<4x5x5x128xf32, #tpu.memory_space<vmem>>, vector<1x1x4x128xf32>,
    %43 = vector.extract_strided_slice %8 {offsets = [32, 0], sizes = [4, 128], strides = [1, 1]} : vector<64x128xf32> to vector<4x128xf32>
    %c2_40 = arith.constant 2 : index
    %c1_41 = arith.constant 1 : index
    %c1_42 = arith.constant 1 : index
    %c0_43 = arith.constant 0 : index
    %44 = vector.load %arg15[%c2_40, %c1_41, %c1_42, %c0_43] : memref<4x5x5x128xf32, #tpu.memory_space<vmem>>, vector<1x1x4x128xf32>
    %45 = vector.shape_cast %44 : vector<1x1x4x128xf32> to vector<4x128xf32>
    %46 = vector.shape_cast %43 : vector<4x128xf32> to vector<1x1x4x128xf32>
    tpu.vector_store %arg15[%c2_40, %c1_41, %c1_42, %c0_43], %46 {strides = array<i32>} : memref<4x5x5x128xf32, #tpu.memory_space<vmem>>, vector<1x1x4x128xf32>,
    %47 = vector.extract_strided_slice %8 {offsets = [36, 0], sizes = [4, 128], strides = [1, 1]} : vector<64x128xf32> to vector<4x128xf32>
    %c2_44 = arith.constant 2 : index
    %c2_45 = arith.constant 2 : index
    %c1_46 = arith.constant 1 : index
    %c0_47 = arith.constant 0 : index
    %48 = vector.load %arg15[%c2_44, %c2_45, %c1_46, %c0_47] : memref<4x5x5x128xf32, #tpu.memory_space<vmem>>, vector<1x1x4x128xf32>
    %49 = vector.shape_cast %48 : vector<1x1x4x128xf32> to vector<4x128xf32>
    %50 = vector.shape_cast %47 : vector<4x128xf32> to vector<1x1x4x128xf32>
    tpu.vector_store %arg15[%c2_44, %c2_45, %c1_46, %c0_47], %50 {strides = array<i32>} : memref<4x5x5x128xf32, #tpu.memory_space<vmem>>, vector<1x1x4x128xf32>,
    %51 = vector.extract_strided_slice %8 {offsets = [40, 0], sizes = [4, 128], strides = [1, 1]} : vector<64x128xf32> to vector<4x128xf32>
    %c2_48 = arith.constant 2 : index
    %c3_49 = arith.constant 3 : index
    %c1_50 = arith.constant 1 : index
    %c0_51 = arith.constant 0 : index
    %52 = vector.load %arg15[%c2_48, %c3_49, %c1_50, %c0_51] : memref<4x5x5x128xf32, #tpu.memory_space<vmem>>, vector<1x1x4x128xf32>
    %53 = vector.shape_cast %52 : vector<1x1x4x128xf32> to vector<4x128xf32>
    %54 = vector.shape_cast %51 : vector<4x128xf32> to vector<1x1x4x128xf32>
    tpu.vector_store %arg15[%c2_48, %c3_49, %c1_50, %c0_51], %54 {strides = array<i32>} : memref<4x5x5x128xf32, #tpu.memory_space<vmem>>, vector<1x1x4x128xf32>,
    %55 = vector.extract_strided_slice %8 {offsets = [44, 0], sizes = [4, 128], strides = [1, 1]} : vector<64x128xf32> to vector<4x128xf32>
    %c2_52 = arith.constant 2 : index
    %c4_53 = arith.constant 4 : index
    %c1_54 = arith.constant 1 : index
    %c0_55 = arith.constant 0 : index
    %56 = vector.load %arg15[%c2_52, %c4_53, %c1_54, %c0_55] : memref<4x5x5x128xf32, #tpu.memory_space<vmem>>, vector<1x1x4x128xf32>
    %57 = vector.shape_cast %56 : vector<1x1x4x128xf32> to vector<4x128xf32>
    %58 = vector.shape_cast %55 : vector<4x128xf32> to vector<1x1x4x128xf32>
    tpu.vector_store %arg15[%c2_52, %c4_53, %c1_54, %c0_55], %58 {strides = array<i32>} : memref<4x5x5x128xf32, #tpu.memory_space<vmem>>, vector<1x1x4x128xf32>,
    %59 = vector.extract_strided_slice %8 {offsets = [48, 0], sizes = [4, 128], strides = [1, 1]} : vector<64x128xf32> to vector<4x128xf32>
    %c3_56 = arith.constant 3 : index
    %c1_57 = arith.constant 1 : index
    %c1_58 = arith.constant 1 : index
    %c0_59 = arith.constant 0 : index
    %60 = vector.load %arg15[%c3_56, %c1_57, %c1_58, %c0_59] : memref<4x5x5x128xf32, #tpu.memory_space<vmem>>, vector<1x1x4x128xf32>
    %61 = vector.shape_cast %60 : vector<1x1x4x128xf32> to vector<4x128xf32>
    %62 = vector.shape_cast %59 : vector<4x128xf32> to vector<1x1x4x128xf32>
    tpu.vector_store %arg15[%c3_56, %c1_57, %c1_58, %c0_59], %62 {strides = array<i32>} : memref<4x5x5x128xf32, #tpu.memory_space<vmem>>, vector<1x1x4x128xf32>,
    %63 = vector.extract_strided_slice %8 {offsets = [52, 0], sizes = [4, 128], strides = [1, 1]} : vector<64x128xf32> to vector<4x128xf32>
    %c3_60 = arith.constant 3 : index
    %c2_61 = arith.constant 2 : index
    %c1_62 = arith.constant 1 : index
    %c0_63 = arith.constant 0 : index
    %64 = vector.load %arg15[%c3_60, %c2_61, %c1_62, %c0_63] : memref<4x5x5x128xf32, #tpu.memory_space<vmem>>, vector<1x1x4x128xf32>
    %65 = vector.shape_cast %64 : vector<1x1x4x128xf32> to vector<4x128xf32>
    %66 = vector.shape_cast %63 : vector<4x128xf32> to vector<1x1x4x128xf32>
    tpu.vector_store %arg15[%c3_60, %c2_61, %c1_62, %c0_63], %66 {strides = array<i32>} : memref<4x5x5x128xf32, #tpu.memory_space<vmem>>, vector<1x1x4x128xf32>,
    %67 = vector.extract_strided_slice %8 {offsets = [56, 0], sizes = [4, 128], strides = [1, 1]} : vector<64x128xf32> to vector<4x128xf32>
    %c3_64 = arith.constant 3 : index
    %c3_65 = arith.constant 3 : index
    %c1_66 = arith.constant 1 : index
    %c0_67 = arith.constant 0 : index
    %68 = vector.load %arg15[%c3_64, %c3_65, %c1_66, %c0_67] : memref<4x5x5x128xf32, #tpu.memory_space<vmem>>, vector<1x1x4x128xf32>
    %69 = vector.shape_cast %68 : vector<1x1x4x128xf32> to vector<4x128xf32>
    %70 = vector.shape_cast %67 : vector<4x128xf32> to vector<1x1x4x128xf32>
    tpu.vector_store %arg15[%c3_64, %c3_65, %c1_66, %c0_67], %70 {strides = array<i32>} : memref<4x5x5x128xf32, #tpu.memory_space<vmem>>, vector<1x1x4x128xf32>,
    %71 = vector.extract_strided_slice %8 {offsets = [60, 0], sizes = [4, 128], strides = [1, 1]} : vector<64x128xf32> to vector<4x128xf32>
    %c3_68 = arith.constant 3 : index
    %c4_69 = arith.constant 4 : index
    %c1_70 = arith.constant 1 : index
    %c0_71 = arith.constant 0 : index
    %72 = vector.load %arg15[%c3_68, %c4_69, %c1_70, %c0_71] : memref<4x5x5x128xf32, #tpu.memory_space<vmem>>, vector<1x1x4x128xf32>
    %73 = vector.shape_cast %72 : vector<1x1x4x128xf32> to vector<4x128xf32>
    %74 = vector.shape_cast %71 : vector<4x128xf32> to vector<1x1x4x128xf32>
    tpu.vector_store %arg15[%c3_68, %c4_69, %c1_70, %c0_71], %74 {strides = array<i32>} : memref<4x5x5x128xf32, #tpu.memory_space<vmem>>, vector<1x1x4x128xf32>,
    %c3_72 = arith.constant 3 : index
    %c0_73 = arith.constant 0 : index
    %c0_74 = arith.constant 0 : index
    %c0_75 = arith.constant 0 : index
    %75 = vector.load %arg15[%c3_72, %c0_73, %c0_74, %c0_75] : memref<4x5x5x128xf32, #tpu.memory_space<vmem>>, vector<1x1x4x128xf32>
    %76 = vector.shape_cast %75 : vector<1x1x4x128xf32> to vector<4x128xf32>
    %c0_76 = arith.constant 0 : index
    %c0_77 = arith.constant 0 : index
    %77 = vector.load %arg16[%c0_76, %c0_77] : memref<16x1152xf32, #tpu.memory_space<vmem>>, vector<4x128xf32>
    tpu.vector_store %arg16[%c0_76, %c0_77], %76 {strides = array<i32>} : memref<16x1152xf32, #tpu.memory_space<vmem>>, vector<4x128xf32>,
    %c3_78 = arith.constant 3 : index
    %c1_79 = arith.constant 1 : index
    %c0_80 = arith.constant 0 : index
    %c0_81 = arith.constant 0 : index
    %78 = vector.load %arg15[%c3_78, %c1_79, %c0_80, %c0_81] : memref<4x5x5x128xf32, #tpu.memory_space<vmem>>, vector<1x1x4x128xf32>
    %79 = vector.shape_cast %78 : vector<1x1x4x128xf32> to vector<4x128xf32>
    %c4_82 = arith.constant 4 : index
    %c0_83 = arith.constant 0 : index
    %80 = vector.load %arg16[%c4_82, %c0_83] : memref<16x1152xf32, #tpu.memory_space<vmem>>, vector<4x128xf32>
    tpu.vector_store %arg16[%c4_82, %c0_83], %79 {strides = array<i32>} : memref<16x1152xf32, #tpu.memory_space<vmem>>, vector<4x128xf32>,
    %c3_84 = arith.constant 3 : index
    %c2_85 = arith.constant 2 : index
    %c0_86 = arith.constant 0 : index
    %c0_87 = arith.constant 0 : index
    %81 = vector.load %arg15[%c3_84, %c2_85, %c0_86, %c0_87] : memref<4x5x5x128xf32, #tpu.memory_space<vmem>>, vector<1x1x4x128xf32>
    %82 = vector.shape_cast %81 : vector<1x1x4x128xf32> to vector<4x128xf32>
    %c8 = arith.constant 8 : index
    %c0_88 = arith.constant 0 : index
    %83 = vector.load %arg16[%c8, %c0_88] : memref<16x1152xf32, #tpu.memory_space<vmem>>, vector<4x128xf32>
    tpu.vector_store %arg16[%c8, %c0_88], %82 {strides = array<i32>} : memref<16x1152xf32, #tpu.memory_space<vmem>>, vector<4x128xf32>,
    %c3_89 = arith.constant 3 : index
    %c3_90 = arith.constant 3 : index
    %c0_91 = arith.constant 0 : index
    %c0_92 = arith.constant 0 : index
    %84 = vector.load %arg15[%c3_89, %c3_90, %c0_91, %c0_92] : memref<4x5x5x128xf32, #tpu.memory_space<vmem>>, vector<1x1x4x128xf32>
    %85 = vector.shape_cast %84 : vector<1x1x4x128xf32> to vector<4x128xf32>
    %c12 = arith.constant 12 : index
    %c0_93 = arith.constant 0 : index
    %86 = vector.load %arg16[%c12, %c0_93] : memref<16x1152xf32, #tpu.memory_space<vmem>>, vector<4x128xf32>
    tpu.vector_store %arg16[%c12, %c0_93], %85 {strides = array<i32>} : memref<16x1152xf32, #tpu.memory_space<vmem>>, vector<4x128xf32>,
    %c2_94 = arith.constant 2 : index
    %c0_95 = arith.constant 0 : index
    %c1_96 = arith.constant 1 : index
    %c0_97 = arith.constant 0 : index
    %87 = vector.load %arg15[%c2_94, %c0_95, %c1_96, %c0_97] : memref<4x5x5x128xf32, #tpu.memory_space<vmem>>, vector<1x1x4x128xf32>
    %88 = vector.shape_cast %87 : vector<1x1x4x128xf32> to vector<4x128xf32>
    %c0_98 = arith.constant 0 : index
    %c128 = arith.constant 128 : index
    %89 = vector.load %arg16[%c0_98, %c128] : memref<16x1152xf32, #tpu.memory_space<vmem>>, vector<4x128xf32>
    tpu.vector_store %arg16[%c0_98, %c128], %88 {strides = array<i32>} : memref<16x1152xf32, #tpu.memory_space<vmem>>, vector<4x128xf32>,
    %c2_99 = arith.constant 2 : index
    %c1_100 = arith.constant 1 : index
    %c1_101 = arith.constant 1 : index
    %c0_102 = arith.constant 0 : index
    %90 = vector.load %arg15[%c2_99, %c1_100, %c1_101, %c0_102] : memref<4x5x5x128xf32, #tpu.memory_space<vmem>>, vector<1x1x4x128xf32>
    %91 = vector.shape_cast %90 : vector<1x1x4x128xf32> to vector<4x128xf32>
    %c4_103 = arith.constant 4 : index
    %c128_104 = arith.constant 128 : index
    %92 = vector.load %arg16[%c4_103, %c128_104] : memref<16x1152xf32, #tpu.memory_space<vmem>>, vector<4x128xf32>
    tpu.vector_store %arg16[%c4_103, %c128_104], %91 {strides = array<i32>} : memref<16x1152xf32, #tpu.memory_space<vmem>>, vector<4x128xf32>,
    %c2_105 = arith.constant 2 : index
    %c2_106 = arith.constant 2 : index
    %c1_107 = arith.constant 1 : index
    %c0_108 = arith.constant 0 : index
    %93 = vector.load %arg15[%c2_105, %c2_106, %c1_107, %c0_108] : memref<4x5x5x128xf32, #tpu.memory_space<vmem>>, vector<1x1x4x128xf32>
    %94 = vector.shape_cast %93 : vector<1x1x4x128xf32> to vector<4x128xf32>
    %c8_109 = arith.constant 8 : index
    %c128_110 = arith.constant 128 : index
    %95 = vector.load %arg16[%c8_109, %c128_110] : memref<16x1152xf32, #tpu.memory_space<vmem>>, vector<4x128xf32>
    tpu.vector_store %arg16[%c8_109, %c128_110], %94 {strides = array<i32>} : memref<16x1152xf32, #tpu.memory_space<vmem>>, vector<4x128xf32>,
    %c2_111 = arith.constant 2 : index
    %c3_112 = arith.constant 3 : index
    %c1_113 = arith.constant 1 : index
    %c0_114 = arith.constant 0 : index
    %96 = vector.load %arg15[%c2_111, %c3_112, %c1_113, %c0_114] : memref<4x5x5x128xf32, #tpu.memory_space<vmem>>, vector<1x1x4x128xf32>
    %97 = vector.shape_cast %96 : vector<1x1x4x128xf32> to vector<4x128xf32>
    %c12_115 = arith.constant 12 : index
    %c128_116 = arith.constant 128 : index
    %98 = vector.load %arg16[%c12_115, %c128_116] : memref<16x1152xf32, #tpu.memory_space<vmem>>, vector<4x128xf32>
    tpu.vector_store %arg16[%c12_115, %c128_116], %97 {strides = array<i32>} : memref<16x1152xf32, #tpu.memory_space<vmem>>, vector<4x128xf32>,
    %c3_117 = arith.constant 3 : index
    %c0_118 = arith.constant 0 : index
    %c1_119 = arith.constant 1 : index
    %c0_120 = arith.constant 0 : index
    %99 = vector.load %arg15[%c3_117, %c0_118, %c1_119, %c0_120] : memref<4x5x5x128xf32, #tpu.memory_space<vmem>>, vector<1x1x4x128xf32>
    %100 = vector.shape_cast %99 : vector<1x1x4x128xf32> to vector<4x128xf32>
    %c0_121 = arith.constant 0 : index
    %c256 = arith.constant 256 : index
    %101 = vector.load %arg16[%c0_121, %c256] : memref<16x1152xf32, #tpu.memory_space<vmem>>, vector<4x128xf32>
    tpu.vector_store %arg16[%c0_121, %c256], %100 {strides = array<i32>} : memref<16x1152xf32, #tpu.memory_space<vmem>>, vector<4x128xf32>,
    %c3_122 = arith.constant 3 : index
    %c1_123 = arith.constant 1 : index
    %c1_124 = arith.constant 1 : index
    %c0_125 = arith.constant 0 : index
    %102 = vector.load %arg15[%c3_122, %c1_123, %c1_124, %c0_125] : memref<4x5x5x128xf32, #tpu.memory_space<vmem>>, vector<1x1x4x128xf32>
    %103 = vector.shape_cast %102 : vector<1x1x4x128xf32> to vector<4x128xf32>
    %c4_126 = arith.constant 4 : index
    %c256_127 = arith.constant 256 : index
    %104 = vector.load %arg16[%c4_126, %c256_127] : memref<16x1152xf32, #tpu.memory_space<vmem>>, vector<4x128xf32>
    tpu.vector_store %arg16[%c4_126, %c256_127], %103 {strides = array<i32>} : memref<16x1152xf32, #tpu.memory_space<vmem>>, vector<4x128xf32>,
    %c3_128 = arith.constant 3 : index
    %c2_129 = arith.constant 2 : index
    %c1_130 = arith.constant 1 : index
    %c0_131 = arith.constant 0 : index
    %105 = vector.load %arg15[%c3_128, %c2_129, %c1_130, %c0_131] : memref<4x5x5x128xf32, #tpu.memory_space<vmem>>, vector<1x1x4x128xf32>
    %106 = vector.shape_cast %105 : vector<1x1x4x128xf32> to vector<4x128xf32>
    %c8_132 = arith.constant 8 : index
    %c256_133 = arith.constant 256 : index
    %107 = vector.load %arg16[%c8_132, %c256_133] : memref<16x1152xf32, #tpu.memory_space<vmem>>, vector<4x128xf32>
    tpu.vector_store %arg16[%c8_132, %c256_133], %106 {strides = array<i32>} : memref<16x1152xf32, #tpu.memory_space<vmem>>, vector<4x128xf32>,
    %c3_134 = arith.constant 3 : index
    %c3_135 = arith.constant 3 : index
    %c1_136 = arith.constant 1 : index
    %c0_137 = arith.constant 0 : index
    %108 = vector.load %arg15[%c3_134, %c3_135, %c1_136, %c0_137] : memref<4x5x5x128xf32, #tpu.memory_space<vmem>>, vector<1x1x4x128xf32>
    %109 = vector.shape_cast %108 : vector<1x1x4x128xf32> to vector<4x128xf32>
    %c12_138 = arith.constant 12 : index
    %c256_139 = arith.constant 256 : index
    %110 = vector.load %arg16[%c12_138, %c256_139] : memref<16x1152xf32, #tpu.memory_space<vmem>>, vector<4x128xf32>
    tpu.vector_store %arg16[%c12_138, %c256_139], %109 {strides = array<i32>} : memref<16x1152xf32, #tpu.memory_space<vmem>>, vector<4x128xf32>,
    %c1_140 = arith.constant 1 : index
    %c1_141 = arith.constant 1 : index
    %c0_142 = arith.constant 0 : index
    %c0_143 = arith.constant 0 : index
    %111 = vector.load %arg15[%c1_140, %c1_141, %c0_142, %c0_143] : memref<4x5x5x128xf32, #tpu.memory_space<vmem>>, vector<1x1x4x128xf32>
    %112 = vector.shape_cast %111 : vector<1x1x4x128xf32> to vector<4x128xf32>
    %c0_144 = arith.constant 0 : index
    %c384 = arith.constant 384 : index
    %113 = vector.load %arg16[%c0_144, %c384] : memref<16x1152xf32, #tpu.memory_space<vmem>>, vector<4x128xf32>
    tpu.vector_store %arg16[%c0_144, %c384], %112 {strides = array<i32>} : memref<16x1152xf32, #tpu.memory_space<vmem>>, vector<4x128xf32>,
    %c1_145 = arith.constant 1 : index
    %c2_146 = arith.constant 2 : index
    %c0_147 = arith.constant 0 : index
    %c0_148 = arith.constant 0 : index
    %114 = vector.load %arg15[%c1_145, %c2_146, %c0_147, %c0_148] : memref<4x5x5x128xf32, #tpu.memory_space<vmem>>, vector<1x1x4x128xf32>
    %115 = vector.shape_cast %114 : vector<1x1x4x128xf32> to vector<4x128xf32>
    %c4_149 = arith.constant 4 : index
    %c384_150 = arith.constant 384 : index
    %116 = vector.load %arg16[%c4_149, %c384_150] : memref<16x1152xf32, #tpu.memory_space<vmem>>, vector<4x128xf32>
    tpu.vector_store %arg16[%c4_149, %c384_150], %115 {strides = array<i32>} : memref<16x1152xf32, #tpu.memory_space<vmem>>, vector<4x128xf32>,
    %c1_151 = arith.constant 1 : index
    %c3_152 = arith.constant 3 : index
    %c0_153 = arith.constant 0 : index
    %c0_154 = arith.constant 0 : index
    %117 = vector.load %arg15[%c1_151, %c3_152, %c0_153, %c0_154] : memref<4x5x5x128xf32, #tpu.memory_space<vmem>>, vector<1x1x4x128xf32>
    %118 = vector.shape_cast %117 : vector<1x1x4x128xf32> to vector<4x128xf32>
    %c8_155 = arith.constant 8 : index
    %c384_156 = arith.constant 384 : index
    %119 = vector.load %arg16[%c8_155, %c384_156] : memref<16x1152xf32, #tpu.memory_space<vmem>>, vector<4x128xf32>
    tpu.vector_store %arg16[%c8_155, %c384_156], %118 {strides = array<i32>} : memref<16x1152xf32, #tpu.memory_space<vmem>>, vector<4x128xf32>,
    %c1_157 = arith.constant 1 : index
    %c4_158 = arith.constant 4 : index
    %c0_159 = arith.constant 0 : index
    %c0_160 = arith.constant 0 : index
    %120 = vector.load %arg15[%c1_157, %c4_158, %c0_159, %c0_160] : memref<4x5x5x128xf32, #tpu.memory_space<vmem>>, vector<1x1x4x128xf32>
    %121 = vector.shape_cast %120 : vector<1x1x4x128xf32> to vector<4x128xf32>
    %c12_161 = arith.constant 12 : index
    %c384_162 = arith.constant 384 : index
    %122 = vector.load %arg16[%c12_161, %c384_162] : memref<16x1152xf32, #tpu.memory_space<vmem>>, vector<4x128xf32>
    tpu.vector_store %arg16[%c12_161, %c384_162], %121 {strides = array<i32>} : memref<16x1152xf32, #tpu.memory_space<vmem>>, vector<4x128xf32>,
    %c0_163 = arith.constant 0 : index
    %c1_164 = arith.constant 1 : index
    %c1_165 = arith.constant 1 : index
    %c0_166 = arith.constant 0 : index
    %123 = vector.load %arg15[%c0_163, %c1_164, %c1_165, %c0_166] : memref<4x5x5x128xf32, #tpu.memory_space<vmem>>, vector<1x1x4x128xf32>
    %124 = vector.shape_cast %123 : vector<1x1x4x128xf32> to vector<4x128xf32>
    %c0_167 = arith.constant 0 : index
    %c512 = arith.constant 512 : index
    %125 = vector.load %arg16[%c0_167, %c512] : memref<16x1152xf32, #tpu.memory_space<vmem>>, vector<4x128xf32>
    tpu.vector_store %arg16[%c0_167, %c512], %124 {strides = array<i32>} : memref<16x1152xf32, #tpu.memory_space<vmem>>, vector<4x128xf32>,
    %c0_168 = arith.constant 0 : index
    %c2_169 = arith.constant 2 : index
    %c1_170 = arith.constant 1 : index
    %c0_171 = arith.constant 0 : index
    %126 = vector.load %arg15[%c0_168, %c2_169, %c1_170, %c0_171] : memref<4x5x5x128xf32, #tpu.memory_space<vmem>>, vector<1x1x4x128xf32>
    %127 = vector.shape_cast %126 : vector<1x1x4x128xf32> to vector<4x128xf32>
    %c4_172 = arith.constant 4 : index
    %c512_173 = arith.constant 512 : index
    %128 = vector.load %arg16[%c4_172, %c512_173] : memref<16x1152xf32, #tpu.memory_space<vmem>>, vector<4x128xf32>
    tpu.vector_store %arg16[%c4_172, %c512_173], %127 {strides = array<i32>} : memref<16x1152xf32, #tpu.memory_space<vmem>>, vector<4x128xf32>,
    %c0_174 = arith.constant 0 : index
    %c3_175 = arith.constant 3 : index
    %c1_176 = arith.constant 1 : index
    %c0_177 = arith.constant 0 : index
    %129 = vector.load %arg15[%c0_174, %c3_175, %c1_176, %c0_177] : memref<4x5x5x128xf32, #tpu.memory_space<vmem>>, vector<1x1x4x128xf32>
    %130 = vector.shape_cast %129 : vector<1x1x4x128xf32> to vector<4x128xf32>
    %c8_178 = arith.constant 8 : index
    %c512_179 = arith.constant 512 : index
    %131 = vector.load %arg16[%c8_178, %c512_179] : memref<16x1152xf32, #tpu.memory_space<vmem>>, vector<4x128xf32>
    tpu.vector_store %arg16[%c8_178, %c512_179], %130 {strides = array<i32>} : memref<16x1152xf32, #tpu.memory_space<vmem>>, vector<4x128xf32>,
    %c0_180 = arith.constant 0 : index
    %c4_181 = arith.constant 4 : index
    %c1_182 = arith.constant 1 : index
    %c0_183 = arith.constant 0 : index
    %132 = vector.load %arg15[%c0_180, %c4_181, %c1_182, %c0_183] : memref<4x5x5x128xf32, #tpu.memory_space<vmem>>, vector<1x1x4x128xf32>
    %133 = vector.shape_cast %132 : vector<1x1x4x128xf32> to vector<4x128xf32>
    %c12_184 = arith.constant 12 : index
    %c512_185 = arith.constant 512 : index
    %134 = vector.load %arg16[%c12_184, %c512_185] : memref<16x1152xf32, #tpu.memory_space<vmem>>, vector<4x128xf32>
    tpu.vector_store %arg16[%c12_184, %c512_185], %133 {strides = array<i32>} : memref<16x1152xf32, #tpu.memory_space<vmem>>, vector<4x128xf32>,
    %c1_186 = arith.constant 1 : index
    %c1_187 = arith.constant 1 : index
    %c1_188 = arith.constant 1 : index
    %c0_189 = arith.constant 0 : index
    %135 = vector.load %arg15[%c1_186, %c1_187, %c1_188, %c0_189] : memref<4x5x5x128xf32, #tpu.memory_space<vmem>>, vector<1x1x4x128xf32>
    %136 = vector.shape_cast %135 : vector<1x1x4x128xf32> to vector<4x128xf32>
    %c0_190 = arith.constant 0 : index
    %c640 = arith.constant 640 : index
    %137 = vector.load %arg16[%c0_190, %c640] : memref<16x1152xf32, #tpu.memory_space<vmem>>, vector<4x128xf32>
    tpu.vector_store %arg16[%c0_190, %c640], %136 {strides = array<i32>} : memref<16x1152xf32, #tpu.memory_space<vmem>>, vector<4x128xf32>,
    %c1_191 = arith.constant 1 : index
    %c2_192 = arith.constant 2 : index
    %c1_193 = arith.constant 1 : index
    %c0_194 = arith.constant 0 : index
    %138 = vector.load %arg15[%c1_191, %c2_192, %c1_193, %c0_194] : memref<4x5x5x128xf32, #tpu.memory_space<vmem>>, vector<1x1x4x128xf32>
    %139 = vector.shape_cast %138 : vector<1x1x4x128xf32> to vector<4x128xf32>
    %c4_195 = arith.constant 4 : index
    %c640_196 = arith.constant 640 : index
    %140 = vector.load %arg16[%c4_195, %c640_196] : memref<16x1152xf32, #tpu.memory_space<vmem>>, vector<4x128xf32>
    tpu.vector_store %arg16[%c4_195, %c640_196], %139 {strides = array<i32>} : memref<16x1152xf32, #tpu.memory_space<vmem>>, vector<4x128xf32>,
    %c1_197 = arith.constant 1 : index
    %c3_198 = arith.constant 3 : index
    %c1_199 = arith.constant 1 : index
    %c0_200 = arith.constant 0 : index
    %141 = vector.load %arg15[%c1_197, %c3_198, %c1_199, %c0_200] : memref<4x5x5x128xf32, #tpu.memory_space<vmem>>, vector<1x1x4x128xf32>
    %142 = vector.shape_cast %141 : vector<1x1x4x128xf32> to vector<4x128xf32>
    %c8_201 = arith.constant 8 : index
    %c640_202 = arith.constant 640 : index
    %143 = vector.load %arg16[%c8_201, %c640_202] : memref<16x1152xf32, #tpu.memory_space<vmem>>, vector<4x128xf32>
    tpu.vector_store %arg16[%c8_201, %c640_202], %142 {strides = array<i32>} : memref<16x1152xf32, #tpu.memory_space<vmem>>, vector<4x128xf32>,
    %c1_203 = arith.constant 1 : index
    %c4_204 = arith.constant 4 : index
    %c1_205 = arith.constant 1 : index
    %c0_206 = arith.constant 0 : index
    %144 = vector.load %arg15[%c1_203, %c4_204, %c1_205, %c0_206] : memref<4x5x5x128xf32, #tpu.memory_space<vmem>>, vector<1x1x4x128xf32>
    %145 = vector.shape_cast %144 : vector<1x1x4x128xf32> to vector<4x128xf32>
    %c12_207 = arith.constant 12 : index
    %c640_208 = arith.constant 640 : index
    %146 = vector.load %arg16[%c12_207, %c640_208] : memref<16x1152xf32, #tpu.memory_space<vmem>>, vector<4x128xf32>
    tpu.vector_store %arg16[%c12_207, %c640_208], %145 {strides = array<i32>} : memref<16x1152xf32, #tpu.memory_space<vmem>>, vector<4x128xf32>,
    %c3_209 = arith.constant 3 : index
    %c1_210 = arith.constant 1 : index
    %c0_211 = arith.constant 0 : index
    %c0_212 = arith.constant 0 : index
    %147 = vector.load %arg15[%c3_209, %c1_210, %c0_211, %c0_212] : memref<4x5x5x128xf32, #tpu.memory_space<vmem>>, vector<1x1x4x128xf32>
    %148 = vector.shape_cast %147 : vector<1x1x4x128xf32> to vector<4x128xf32>
    %c0_213 = arith.constant 0 : index
    %c768 = arith.constant 768 : index
    %149 = vector.load %arg16[%c0_213, %c768] : memref<16x1152xf32, #tpu.memory_space<vmem>>, vector<4x128xf32>
    tpu.vector_store %arg16[%c0_213, %c768], %148 {strides = array<i32>} : memref<16x1152xf32, #tpu.memory_space<vmem>>, vector<4x128xf32>,
    %c3_214 = arith.constant 3 : index
    %c2_215 = arith.constant 2 : index
    %c0_216 = arith.constant 0 : index
    %c0_217 = arith.constant 0 : index
    %150 = vector.load %arg15[%c3_214, %c2_215, %c0_216, %c0_217] : memref<4x5x5x128xf32, #tpu.memory_space<vmem>>, vector<1x1x4x128xf32>
    %151 = vector.shape_cast %150 : vector<1x1x4x128xf32> to vector<4x128xf32>
    %c4_218 = arith.constant 4 : index
    %c768_219 = arith.constant 768 : index
    %152 = vector.load %arg16[%c4_218, %c768_219] : memref<16x1152xf32, #tpu.memory_space<vmem>>, vector<4x128xf32>
    tpu.vector_store %arg16[%c4_218, %c768_219], %151 {strides = array<i32>} : memref<16x1152xf32, #tpu.memory_space<vmem>>, vector<4x128xf32>,
    %c3_220 = arith.constant 3 : index
    %c3_221 = arith.constant 3 : index
    %c0_222 = arith.constant 0 : index
    %c0_223 = arith.constant 0 : index
    %153 = vector.load %arg15[%c3_220, %c3_221, %c0_222, %c0_223] : memref<4x5x5x128xf32, #tpu.memory_space<vmem>>, vector<1x1x4x128xf32>
    %154 = vector.shape_cast %153 : vector<1x1x4x128xf32> to vector<4x128xf32>
    %c8_224 = arith.constant 8 : index
    %c768_225 = arith.constant 768 : index
    %155 = vector.load %arg16[%c8_224, %c768_225] : memref<16x1152xf32, #tpu.memory_space<vmem>>, vector<4x128xf32>
    tpu.vector_store %arg16[%c8_224, %c768_225], %154 {strides = array<i32>} : memref<16x1152xf32, #tpu.memory_space<vmem>>, vector<4x128xf32>,
    %c3_226 = arith.constant 3 : index
    %c4_227 = arith.constant 4 : index
    %c0_228 = arith.constant 0 : index
    %c0_229 = arith.constant 0 : index
    %156 = vector.load %arg15[%c3_226, %c4_227, %c0_228, %c0_229] : memref<4x5x5x128xf32, #tpu.memory_space<vmem>>, vector<1x1x4x128xf32>
    %157 = vector.shape_cast %156 : vector<1x1x4x128xf32> to vector<4x128xf32>
    %c12_230 = arith.constant 12 : index
    %c768_231 = arith.constant 768 : index
    %158 = vector.load %arg16[%c12_230, %c768_231] : memref<16x1152xf32, #tpu.memory_space<vmem>>, vector<4x128xf32>
    tpu.vector_store %arg16[%c12_230, %c768_231], %157 {strides = array<i32>} : memref<16x1152xf32, #tpu.memory_space<vmem>>, vector<4x128xf32>,
    %c2_232 = arith.constant 2 : index
    %c1_233 = arith.constant 1 : index
    %c1_234 = arith.constant 1 : index
    %c0_235 = arith.constant 0 : index
    %159 = vector.load %arg15[%c2_232, %c1_233, %c1_234, %c0_235] : memref<4x5x5x128xf32, #tpu.memory_space<vmem>>, vector<1x1x4x128xf32>
    %160 = vector.shape_cast %159 : vector<1x1x4x128xf32> to vector<4x128xf32>
    %c0_236 = arith.constant 0 : index
    %c896 = arith.constant 896 : index
    %161 = vector.load %arg16[%c0_236, %c896] : memref<16x1152xf32, #tpu.memory_space<vmem>>, vector<4x128xf32>
    tpu.vector_store %arg16[%c0_236, %c896], %160 {strides = array<i32>} : memref<16x1152xf32, #tpu.memory_space<vmem>>, vector<4x128xf32>,
    %c2_237 = arith.constant 2 : index
    %c2_238 = arith.constant 2 : index
    %c1_239 = arith.constant 1 : index
    %c0_240 = arith.constant 0 : index
    %162 = vector.load %arg15[%c2_237, %c2_238, %c1_239, %c0_240] : memref<4x5x5x128xf32, #tpu.memory_space<vmem>>, vector<1x1x4x128xf32>
    %163 = vector.shape_cast %162 : vector<1x1x4x128xf32> to vector<4x128xf32>
    %c4_241 = arith.constant 4 : index
    %c896_242 = arith.constant 896 : index
    %164 = vector.load %arg16[%c4_241, %c896_242] : memref<16x1152xf32, #tpu.memory_space<vmem>>, vector<4x128xf32>
    tpu.vector_store %arg16[%c4_241, %c896_242], %163 {strides = array<i32>} : memref<16x1152xf32, #tpu.memory_space<vmem>>, vector<4x128xf32>,
    %c2_243 = arith.constant 2 : index
    %c3_244 = arith.constant 3 : index
    %c1_245 = arith.constant 1 : index
    %c0_246 = arith.constant 0 : index
    %165 = vector.load %arg15[%c2_243, %c3_244, %c1_245, %c0_246] : memref<4x5x5x128xf32, #tpu.memory_space<vmem>>, vector<1x1x4x128xf32>
    %166 = vector.shape_cast %165 : vector<1x1x4x128xf32> to vector<4x128xf32>
    %c8_247 = arith.constant 8 : index
    %c896_248 = arith.constant 896 : index
    %167 = vector.load %arg16[%c8_247, %c896_248] : memref<16x1152xf32, #tpu.memory_space<vmem>>, vector<4x128xf32>
    tpu.vector_store %arg16[%c8_247, %c896_248], %166 {strides = array<i32>} : memref<16x1152xf32, #tpu.memory_space<vmem>>, vector<4x128xf32>,
    %c2_249 = arith.constant 2 : index
    %c4_250 = arith.constant 4 : index
    %c1_251 = arith.constant 1 : index
    %c0_252 = arith.constant 0 : index
    %168 = vector.load %arg15[%c2_249, %c4_250, %c1_251, %c0_252] : memref<4x5x5x128xf32, #tpu.memory_space<vmem>>, vector<1x1x4x128xf32>
    %169 = vector.shape_cast %168 : vector<1x1x4x128xf32> to vector<4x128xf32>
    %c12_253 = arith.constant 12 : index
    %c896_254 = arith.constant 896 : index
    %170 = vector.load %arg16[%c12_253, %c896_254] : memref<16x1152xf32, #tpu.memory_space<vmem>>, vector<4x128xf32>
    tpu.vector_store %arg16[%c12_253, %c896_254], %169 {strides = array<i32>} : memref<16x1152xf32, #tpu.memory_space<vmem>>, vector<4x128xf32>,
    %c3_255 = arith.constant 3 : index
    %c1_256 = arith.constant 1 : index
    %c1_257 = arith.constant 1 : index
    %c0_258 = arith.constant 0 : index
    %171 = vector.load %arg15[%c3_255, %c1_256, %c1_257, %c0_258] : memref<4x5x5x128xf32, #tpu.memory_space<vmem>>, vector<1x1x4x128xf32>
    %172 = vector.shape_cast %171 : vector<1x1x4x128xf32> to vector<4x128xf32>
    %c0_259 = arith.constant 0 : index
    %c1024 = arith.constant 1024 : index
    %173 = vector.load %arg16[%c0_259, %c1024] : memref<16x1152xf32, #tpu.memory_space<vmem>>, vector<4x128xf32>
    tpu.vector_store %arg16[%c0_259, %c1024], %172 {strides = array<i32>} : memref<16x1152xf32, #tpu.memory_space<vmem>>, vector<4x128xf32>,
    %c3_260 = arith.constant 3 : index
    %c2_261 = arith.constant 2 : index
    %c1_262 = arith.constant 1 : index
    %c0_263 = arith.constant 0 : index
    %174 = vector.load %arg15[%c3_260, %c2_261, %c1_262, %c0_263] : memref<4x5x5x128xf32, #tpu.memory_space<vmem>>, vector<1x1x4x128xf32>
    %175 = vector.shape_cast %174 : vector<1x1x4x128xf32> to vector<4x128xf32>
    %c4_264 = arith.constant 4 : index
    %c1024_265 = arith.constant 1024 : index
    %176 = vector.load %arg16[%c4_264, %c1024_265] : memref<16x1152xf32, #tpu.memory_space<vmem>>, vector<4x128xf32>
    tpu.vector_store %arg16[%c4_264, %c1024_265], %175 {strides = array<i32>} : memref<16x1152xf32, #tpu.memory_space<vmem>>, vector<4x128xf32>,
    %c3_266 = arith.constant 3 : index
    %c3_267 = arith.constant 3 : index
    %c1_268 = arith.constant 1 : index
    %c0_269 = arith.constant 0 : index
    %177 = vector.load %arg15[%c3_266, %c3_267, %c1_268, %c0_269] : memref<4x5x5x128xf32, #tpu.memory_space<vmem>>, vector<1x1x4x128xf32>
    %178 = vector.shape_cast %177 : vector<1x1x4x128xf32> to vector<4x128xf32>
    %c8_270 = arith.constant 8 : index
    %c1024_271 = arith.constant 1024 : index
    %179 = vector.load %arg16[%c8_270, %c1024_271] : memref<16x1152xf32, #tpu.memory_space<vmem>>, vector<4x128xf32>
    tpu.vector_store %arg16[%c8_270, %c1024_271], %178 {strides = array<i32>} : memref<16x1152xf32, #tpu.memory_space<vmem>>, vector<4x128xf32>,
    %c3_272 = arith.constant 3 : index
    %c4_273 = arith.constant 4 : index
    %c1_274 = arith.constant 1 : index
    %c0_275 = arith.constant 0 : index
    %180 = vector.load %arg15[%c3_272, %c4_273, %c1_274, %c0_275] : memref<4x5x5x128xf32, #tpu.memory_space<vmem>>, vector<1x1x4x128xf32>
    %181 = vector.shape_cast %180 : vector<1x1x4x128xf32> to vector<4x128xf32>
    %c12_276 = arith.constant 12 : index
    %c1024_277 = arith.constant 1024 : index
    %182 = vector.load %arg16[%c12_276, %c1024_277] : memref<16x1152xf32, #tpu.memory_space<vmem>>, vector<4x128xf32>
    tpu.vector_store %arg16[%c12_276, %c1024_277], %181 {strides = array<i32>} : memref<16x1152xf32, #tpu.memory_space<vmem>>, vector<4x128xf32>,
    %c0_278 = arith.constant 0 : index
    %c0_279 = arith.constant 0 : index
    %183 = vector.load %arg16[%c0_278, %c0_279] : memref<16x1152xf32, #tpu.memory_space<vmem>>, vector<16x1152xf32>
    %184 = arith.truncf %183 : vector<16x1152xf32> to vector<16x1152xbf16>
    %c0_280 = arith.constant 0 : index
    %c0_281 = arith.constant 0 : index
    %185 = vector.load %arg4[%c0_280, %c0_281] : memref<1152x128xbf16, #tpu.memory_space<vmem>>, vector<1152x128xbf16>
    %cst_282 = arith.constant dense<0.000000e+00> : vector<16x128xf32>
    %186 = tpu.matmul %184, %185, %cst_282 {dimension_numbers = #tpu.dot_dimension_numbers<[1], [0], [0], [1], [0, 0, 1, 1], [], []>} : vector<16x1152xbf16>, vector<1152x128xbf16>, vector<16x128xf32> -> vector<16x128xf32>
    %c0_283 = arith.constant 0 : index
    %c0_284 = arith.constant 0 : index
    %187 = vector.load %arg5[%c0_283, %c0_284] : memref<1x128xf32, #tpu.memory_space<vmem>>, vector<1x128xf32>
    %188 = vector.broadcast %187 : vector<1x128xf32> to vector<16x128xf32>
    %189 = arith.addf %186, %188 : vector<16x128xf32>
    %cst_285 = arith.constant 0.000000e+00 : f32
    %190 = vector.broadcast %cst_285 : f32 to vector<16x128xf32>
    %191 = arith.maximumf %189, %190 : vector<16x128xf32>
    %cst_286 = arith.constant 0.000000e+00 : f32
    %192 = vector.broadcast %cst_286 : f32 to vector<4x3x3x128xf32>
    %c0_287 = arith.constant 0 : index
    %c0_288 = arith.constant 0 : index
    %c0_289 = arith.constant 0 : index
    %c0_290 = arith.constant 0 : index
    %193 = vector.load %arg17[%c0_287, %c0_288, %c0_289, %c0_290] : memref<4x3x3x128xf32, #tpu.memory_space<vmem>>, vector<4x3x3x128xf32>
    tpu.vector_store %arg17[%c0_287, %c0_288, %c0_289, %c0_290], %192 {strides = array<i32>} : memref<4x3x3x128xf32, #tpu.memory_space<vmem>>, vector<4x3x3x128xf32>,
    %194 = vector.extract_strided_slice %191 {offsets = [0, 0], sizes = [1, 128], strides = [1, 1]} : vector<16x128xf32> to vector<1x128xf32>
    %195 = vector.shape_cast %194 : vector<1x128xf32> to vector<128xf32>
    %c0_291 = arith.constant 0 : index
    %c1_292 = arith.constant 1 : index
    %c1_293 = arith.constant 1 : index
    %c0_294 = arith.constant 0 : index
    %196 = vector.load %arg17[%c0_291, %c1_292, %c1_293, %c0_294] : memref<4x3x3x128xf32, #tpu.memory_space<vmem>>, vector<1x1x1x128xf32>
    %197 = vector.shape_cast %196 : vector<1x1x1x128xf32> to vector<128xf32>
    %198 = vector.shape_cast %195 : vector<128xf32> to vector<1x1x1x128xf32>
    tpu.vector_store %arg17[%c0_291, %c1_292, %c1_293, %c0_294], %198 {strides = array<i32>} : memref<4x3x3x128xf32, #tpu.memory_space<vmem>>, vector<1x1x1x128xf32>,
    %199 = vector.extract_strided_slice %191 {offsets = [1, 0], sizes = [1, 128], strides = [1, 1]} : vector<16x128xf32> to vector<1x128xf32>
    %200 = vector.shape_cast %199 : vector<1x128xf32> to vector<128xf32>
    %c1_295 = arith.constant 1 : index
    %c1_296 = arith.constant 1 : index
    %c1_297 = arith.constant 1 : index
    %c0_298 = arith.constant 0 : index
    %201 = vector.load %arg17[%c1_295, %c1_296, %c1_297, %c0_298] : memref<4x3x3x128xf32, #tpu.memory_space<vmem>>, vector<1x1x1x128xf32>
    %202 = vector.shape_cast %201 : vector<1x1x1x128xf32> to vector<128xf32>
    %203 = vector.shape_cast %200 : vector<128xf32> to vector<1x1x1x128xf32>
    tpu.vector_store %arg17[%c1_295, %c1_296, %c1_297, %c0_298], %203 {strides = array<i32>} : memref<4x3x3x128xf32, #tpu.memory_space<vmem>>, vector<1x1x1x128xf32>,
    %204 = vector.extract_strided_slice %191 {offsets = [2, 0], sizes = [1, 128], strides = [1, 1]} : vector<16x128xf32> to vector<1x128xf32>
    %205 = vector.shape_cast %204 : vector<1x128xf32> to vector<128xf32>
    %c0_299 = arith.constant 0 : index
    %c1_300 = arith.constant 1 : index
    %c2_301 = arith.constant 2 : index
    %c0_302 = arith.constant 0 : index
    %206 = vector.load %arg17[%c0_299, %c1_300, %c2_301, %c0_302] : memref<4x3x3x128xf32, #tpu.memory_space<vmem>>, vector<1x1x1x128xf32>
    %207 = vector.shape_cast %206 : vector<1x1x1x128xf32> to vector<128xf32>
    %208 = vector.shape_cast %205 : vector<128xf32> to vector<1x1x1x128xf32>
    tpu.vector_store %arg17[%c0_299, %c1_300, %c2_301, %c0_302], %208 {strides = array<i32>} : memref<4x3x3x128xf32, #tpu.memory_space<vmem>>, vector<1x1x1x128xf32>,
    %209 = vector.extract_strided_slice %191 {offsets = [3, 0], sizes = [1, 128], strides = [1, 1]} : vector<16x128xf32> to vector<1x128xf32>
    %210 = vector.shape_cast %209 : vector<1x128xf32> to vector<128xf32>
    %c1_303 = arith.constant 1 : index
    %c1_304 = arith.constant 1 : index
    %c2_305 = arith.constant 2 : index
    %c0_306 = arith.constant 0 : index
    %211 = vector.load %arg17[%c1_303, %c1_304, %c2_305, %c0_306] : memref<4x3x3x128xf32, #tpu.memory_space<vmem>>, vector<1x1x1x128xf32>
    %212 = vector.shape_cast %211 : vector<1x1x1x128xf32> to vector<128xf32>
    %213 = vector.shape_cast %210 : vector<128xf32> to vector<1x1x1x128xf32>
    tpu.vector_store %arg17[%c1_303, %c1_304, %c2_305, %c0_306], %213 {strides = array<i32>} : memref<4x3x3x128xf32, #tpu.memory_space<vmem>>, vector<1x1x1x128xf32>,
    %214 = vector.extract_strided_slice %191 {offsets = [4, 0], sizes = [1, 128], strides = [1, 1]} : vector<16x128xf32> to vector<1x128xf32>
    %215 = vector.shape_cast %214 : vector<1x128xf32> to vector<128xf32>
    %c2_307 = arith.constant 2 : index
    %c1_308 = arith.constant 1 : index
    %c1_309 = arith.constant 1 : index
    %c0_310 = arith.constant 0 : index
    %216 = vector.load %arg17[%c2_307, %c1_308, %c1_309, %c0_310] : memref<4x3x3x128xf32, #tpu.memory_space<vmem>>, vector<1x1x1x128xf32>
    %217 = vector.shape_cast %216 : vector<1x1x1x128xf32> to vector<128xf32>
    %218 = vector.shape_cast %215 : vector<128xf32> to vector<1x1x1x128xf32>
    tpu.vector_store %arg17[%c2_307, %c1_308, %c1_309, %c0_310], %218 {strides = array<i32>} : memref<4x3x3x128xf32, #tpu.memory_space<vmem>>, vector<1x1x1x128xf32>,
    %219 = vector.extract_strided_slice %191 {offsets = [5, 0], sizes = [1, 128], strides = [1, 1]} : vector<16x128xf32> to vector<1x128xf32>
    %220 = vector.shape_cast %219 : vector<1x128xf32> to vector<128xf32>
    %c3_311 = arith.constant 3 : index
    %c1_312 = arith.constant 1 : index
    %c1_313 = arith.constant 1 : index
    %c0_314 = arith.constant 0 : index
    %221 = vector.load %arg17[%c3_311, %c1_312, %c1_313, %c0_314] : memref<4x3x3x128xf32, #tpu.memory_space<vmem>>, vector<1x1x1x128xf32>
    %222 = vector.shape_cast %221 : vector<1x1x1x128xf32> to vector<128xf32>
    %223 = vector.shape_cast %220 : vector<128xf32> to vector<1x1x1x128xf32>
    tpu.vector_store %arg17[%c3_311, %c1_312, %c1_313, %c0_314], %223 {strides = array<i32>} : memref<4x3x3x128xf32, #tpu.memory_space<vmem>>, vector<1x1x1x128xf32>,
    %224 = vector.extract_strided_slice %191 {offsets = [6, 0], sizes = [1, 128], strides = [1, 1]} : vector<16x128xf32> to vector<1x128xf32>
    %225 = vector.shape_cast %224 : vector<1x128xf32> to vector<128xf32>
    %c2_315 = arith.constant 2 : index
    %c1_316 = arith.constant 1 : index
    %c2_317 = arith.constant 2 : index
    %c0_318 = arith.constant 0 : index
    %226 = vector.load %arg17[%c2_315, %c1_316, %c2_317, %c0_318] : memref<4x3x3x128xf32, #tpu.memory_space<vmem>>, vector<1x1x1x128xf32>
    %227 = vector.shape_cast %226 : vector<1x1x1x128xf32> to vector<128xf32>
    %228 = vector.shape_cast %225 : vector<128xf32> to vector<1x1x1x128xf32>
    tpu.vector_store %arg17[%c2_315, %c1_316, %c2_317, %c0_318], %228 {strides = array<i32>} : memref<4x3x3x128xf32, #tpu.memory_space<vmem>>, vector<1x1x1x128xf32>,
    %229 = vector.extract_strided_slice %191 {offsets = [7, 0], sizes = [1, 128], strides = [1, 1]} : vector<16x128xf32> to vector<1x128xf32>
    %230 = vector.shape_cast %229 : vector<1x128xf32> to vector<128xf32>
    %c3_319 = arith.constant 3 : index
    %c1_320 = arith.constant 1 : index
    %c2_321 = arith.constant 2 : index
    %c0_322 = arith.constant 0 : index
    %231 = vector.load %arg17[%c3_319, %c1_320, %c2_321, %c0_322] : memref<4x3x3x128xf32, #tpu.memory_space<vmem>>, vector<1x1x1x128xf32>
    %232 = vector.shape_cast %231 : vector<1x1x1x128xf32> to vector<128xf32>
    %233 = vector.shape_cast %230 : vector<128xf32> to vector<1x1x1x128xf32>
    tpu.vector_store %arg17[%c3_319, %c1_320, %c2_321, %c0_322], %233 {strides = array<i32>} : memref<4x3x3x128xf32, #tpu.memory_space<vmem>>, vector<1x1x1x128xf32>,
    %234 = vector.extract_strided_slice %191 {offsets = [8, 0], sizes = [1, 128], strides = [1, 1]} : vector<16x128xf32> to vector<1x128xf32>
    %235 = vector.shape_cast %234 : vector<1x128xf32> to vector<128xf32>
    %c0_323 = arith.constant 0 : index
    %c2_324 = arith.constant 2 : index
    %c1_325 = arith.constant 1 : index
    %c0_326 = arith.constant 0 : index
    %236 = vector.load %arg17[%c0_323, %c2_324, %c1_325, %c0_326] : memref<4x3x3x128xf32, #tpu.memory_space<vmem>>, vector<1x1x1x128xf32>
    %237 = vector.shape_cast %236 : vector<1x1x1x128xf32> to vector<128xf32>
    %238 = vector.shape_cast %235 : vector<128xf32> to vector<1x1x1x128xf32>
    tpu.vector_store %arg17[%c0_323, %c2_324, %c1_325, %c0_326], %238 {strides = array<i32>} : memref<4x3x3x128xf32, #tpu.memory_space<vmem>>, vector<1x1x1x128xf32>,
    %239 = vector.extract_strided_slice %191 {offsets = [9, 0], sizes = [1, 128], strides = [1, 1]} : vector<16x128xf32> to vector<1x128xf32>
    %240 = vector.shape_cast %239 : vector<1x128xf32> to vector<128xf32>
    %c1_327 = arith.constant 1 : index
    %c2_328 = arith.constant 2 : index
    %c1_329 = arith.constant 1 : index
    %c0_330 = arith.constant 0 : index
    %241 = vector.load %arg17[%c1_327, %c2_328, %c1_329, %c0_330] : memref<4x3x3x128xf32, #tpu.memory_space<vmem>>, vector<1x1x1x128xf32>
    %242 = vector.shape_cast %241 : vector<1x1x1x128xf32> to vector<128xf32>
    %243 = vector.shape_cast %240 : vector<128xf32> to vector<1x1x1x128xf32>
    tpu.vector_store %arg17[%c1_327, %c2_328, %c1_329, %c0_330], %243 {strides = array<i32>} : memref<4x3x3x128xf32, #tpu.memory_space<vmem>>, vector<1x1x1x128xf32>,
    %244 = vector.extract_strided_slice %191 {offsets = [10, 0], sizes = [1, 128], strides = [1, 1]} : vector<16x128xf32> to vector<1x128xf32>
    %245 = vector.shape_cast %244 : vector<1x128xf32> to vector<128xf32>
    %c0_331 = arith.constant 0 : index
    %c2_332 = arith.constant 2 : index
    %c2_333 = arith.constant 2 : index
    %c0_334 = arith.constant 0 : index
    %246 = vector.load %arg17[%c0_331, %c2_332, %c2_333, %c0_334] : memref<4x3x3x128xf32, #tpu.memory_space<vmem>>, vector<1x1x1x128xf32>
    %247 = vector.shape_cast %246 : vector<1x1x1x128xf32> to vector<128xf32>
    %248 = vector.shape_cast %245 : vector<128xf32> to vector<1x1x1x128xf32>
    tpu.vector_store %arg17[%c0_331, %c2_332, %c2_333, %c0_334], %248 {strides = array<i32>} : memref<4x3x3x128xf32, #tpu.memory_space<vmem>>, vector<1x1x1x128xf32>,
    %249 = vector.extract_strided_slice %191 {offsets = [11, 0], sizes = [1, 128], strides = [1, 1]} : vector<16x128xf32> to vector<1x128xf32>
    %250 = vector.shape_cast %249 : vector<1x128xf32> to vector<128xf32>
    %c1_335 = arith.constant 1 : index
    %c2_336 = arith.constant 2 : index
    %c2_337 = arith.constant 2 : index
    %c0_338 = arith.constant 0 : index
    %251 = vector.load %arg17[%c1_335, %c2_336, %c2_337, %c0_338] : memref<4x3x3x128xf32, #tpu.memory_space<vmem>>, vector<1x1x1x128xf32>
    %252 = vector.shape_cast %251 : vector<1x1x1x128xf32> to vector<128xf32>
    %253 = vector.shape_cast %250 : vector<128xf32> to vector<1x1x1x128xf32>
    tpu.vector_store %arg17[%c1_335, %c2_336, %c2_337, %c0_338], %253 {strides = array<i32>} : memref<4x3x3x128xf32, #tpu.memory_space<vmem>>, vector<1x1x1x128xf32>,
    %254 = vector.extract_strided_slice %191 {offsets = [12, 0], sizes = [1, 128], strides = [1, 1]} : vector<16x128xf32> to vector<1x128xf32>
    %255 = vector.shape_cast %254 : vector<1x128xf32> to vector<128xf32>
    %c2_339 = arith.constant 2 : index
    %c2_340 = arith.constant 2 : index
    %c1_341 = arith.constant 1 : index
    %c0_342 = arith.constant 0 : index
    %256 = vector.load %arg17[%c2_339, %c2_340, %c1_341, %c0_342] : memref<4x3x3x128xf32, #tpu.memory_space<vmem>>, vector<1x1x1x128xf32>
    %257 = vector.shape_cast %256 : vector<1x1x1x128xf32> to vector<128xf32>
    %258 = vector.shape_cast %255 : vector<128xf32> to vector<1x1x1x128xf32>
    tpu.vector_store %arg17[%c2_339, %c2_340, %c1_341, %c0_342], %258 {strides = array<i32>} : memref<4x3x3x128xf32, #tpu.memory_space<vmem>>, vector<1x1x1x128xf32>,
    %259 = vector.extract_strided_slice %191 {offsets = [13, 0], sizes = [1, 128], strides = [1, 1]} : vector<16x128xf32> to vector<1x128xf32>
    %260 = vector.shape_cast %259 : vector<1x128xf32> to vector<128xf32>
    %c3_343 = arith.constant 3 : index
    %c2_344 = arith.constant 2 : index
    %c1_345 = arith.constant 1 : index
    %c0_346 = arith.constant 0 : index
    %261 = vector.load %arg17[%c3_343, %c2_344, %c1_345, %c0_346] : memref<4x3x3x128xf32, #tpu.memory_space<vmem>>, vector<1x1x1x128xf32>
    %262 = vector.shape_cast %261 : vector<1x1x1x128xf32> to vector<128xf32>
    %263 = vector.shape_cast %260 : vector<128xf32> to vector<1x1x1x128xf32>
    tpu.vector_store %arg17[%c3_343, %c2_344, %c1_345, %c0_346], %263 {strides = array<i32>} : memref<4x3x3x128xf32, #tpu.memory_space<vmem>>, vector<1x1x1x128xf32>,
    %264 = vector.extract_strided_slice %191 {offsets = [14, 0], sizes = [1, 128], strides = [1, 1]} : vector<16x128xf32> to vector<1x128xf32>
    %265 = vector.shape_cast %264 : vector<1x128xf32> to vector<128xf32>
    %c2_347 = arith.constant 2 : index
    %c2_348 = arith.constant 2 : index
    %c2_349 = arith.constant 2 : index
    %c0_350 = arith.constant 0 : index
    %266 = vector.load %arg17[%c2_347, %c2_348, %c2_349, %c0_350] : memref<4x3x3x128xf32, #tpu.memory_space<vmem>>, vector<1x1x1x128xf32>
    %267 = vector.shape_cast %266 : vector<1x1x1x128xf32> to vector<128xf32>
    %268 = vector.shape_cast %265 : vector<128xf32> to vector<1x1x1x128xf32>
    tpu.vector_store %arg17[%c2_347, %c2_348, %c2_349, %c0_350], %268 {strides = array<i32>} : memref<4x3x3x128xf32, #tpu.memory_space<vmem>>, vector<1x1x1x128xf32>,
    %269 = vector.extract_strided_slice %191 {offsets = [15, 0], sizes = [1, 128], strides = [1, 1]} : vector<16x128xf32> to vector<1x128xf32>
    %270 = vector.shape_cast %269 : vector<1x128xf32> to vector<128xf32>
    %c3_351 = arith.constant 3 : index
    %c2_352 = arith.constant 2 : index
    %c2_353 = arith.constant 2 : index
    %c0_354 = arith.constant 0 : index
    %271 = vector.load %arg17[%c3_351, %c2_352, %c2_353, %c0_354] : memref<4x3x3x128xf32, #tpu.memory_space<vmem>>, vector<1x1x1x128xf32>
    %272 = vector.shape_cast %271 : vector<1x1x1x128xf32> to vector<128xf32>
    %273 = vector.shape_cast %270 : vector<128xf32> to vector<1x1x1x128xf32>
    tpu.vector_store %arg17[%c3_351, %c2_352, %c2_353, %c0_354], %273 {strides = array<i32>} : memref<4x3x3x128xf32, #tpu.memory_space<vmem>>, vector<1x1x1x128xf32>,
    %c3_355 = arith.constant 3 : index
    %c0_356 = arith.constant 0 : index
    %c0_357 = arith.constant 0 : index
    %c0_358 = arith.constant 0 : index
    %274 = vector.load %arg17[%c3_355, %c0_356, %c0_357, %c0_358] : memref<4x3x3x128xf32, #tpu.memory_space<vmem>>, vector<1x1x2x128xf32>
    %275 = vector.shape_cast %274 : vector<1x1x2x128xf32> to vector<2x128xf32>
    %c0_359 = arith.constant 0 : index
    %c0_360 = arith.constant 0 : index
    %276 = vector.load %arg18[%c0_359, %c0_360] : memref<4x1152xf32, #tpu.memory_space<vmem>>, vector<2x128xf32>
    tpu.vector_store %arg18[%c0_359, %c0_360], %275 {strides = array<i32>} : memref<4x1152xf32, #tpu.memory_space<vmem>>, vector<2x128xf32>,
    %c3_361 = arith.constant 3 : index
    %c1_362 = arith.constant 1 : index
    %c0_363 = arith.constant 0 : index
    %c0_364 = arith.constant 0 : index
    %277 = vector.load %arg17[%c3_361, %c1_362, %c0_363, %c0_364] : memref<4x3x3x128xf32, #tpu.memory_space<vmem>>, vector<1x1x2x128xf32>
    %278 = vector.shape_cast %277 : vector<1x1x2x128xf32> to vector<2x128xf32>
    %c2_365 = arith.constant 2 : index
    %c0_366 = arith.constant 0 : index
    %279 = vector.load %arg18[%c2_365, %c0_366] : memref<4x1152xf32, #tpu.memory_space<vmem>>, vector<2x128xf32>
    tpu.vector_store %arg18[%c2_365, %c0_366], %278 {strides = array<i32>} : memref<4x1152xf32, #tpu.memory_space<vmem>>, vector<2x128xf32>,
    %c2_367 = arith.constant 2 : index
    %c0_368 = arith.constant 0 : index
    %c1_369 = arith.constant 1 : index
    %c0_370 = arith.constant 0 : index
    %280 = vector.load %arg17[%c2_367, %c0_368, %c1_369, %c0_370] : memref<4x3x3x128xf32, #tpu.memory_space<vmem>>, vector<1x1x2x128xf32>
    %281 = vector.shape_cast %280 : vector<1x1x2x128xf32> to vector<2x128xf32>
    %c0_371 = arith.constant 0 : index
    %c128_372 = arith.constant 128 : index
    %282 = vector.load %arg18[%c0_371, %c128_372] : memref<4x1152xf32, #tpu.memory_space<vmem>>, vector<2x128xf32>
    tpu.vector_store %arg18[%c0_371, %c128_372], %281 {strides = array<i32>} : memref<4x1152xf32, #tpu.memory_space<vmem>>, vector<2x128xf32>,
    %c2_373 = arith.constant 2 : index
    %c1_374 = arith.constant 1 : index
    %c1_375 = arith.constant 1 : index
    %c0_376 = arith.constant 0 : index
    %283 = vector.load %arg17[%c2_373, %c1_374, %c1_375, %c0_376] : memref<4x3x3x128xf32, #tpu.memory_space<vmem>>, vector<1x1x2x128xf32>
    %284 = vector.shape_cast %283 : vector<1x1x2x128xf32> to vector<2x128xf32>
    %c2_377 = arith.constant 2 : index
    %c128_378 = arith.constant 128 : index
    %285 = vector.load %arg18[%c2_377, %c128_378] : memref<4x1152xf32, #tpu.memory_space<vmem>>, vector<2x128xf32>
    tpu.vector_store %arg18[%c2_377, %c128_378], %284 {strides = array<i32>} : memref<4x1152xf32, #tpu.memory_space<vmem>>, vector<2x128xf32>,
    %c3_379 = arith.constant 3 : index
    %c0_380 = arith.constant 0 : index
    %c1_381 = arith.constant 1 : index
    %c0_382 = arith.constant 0 : index
    %286 = vector.load %arg17[%c3_379, %c0_380, %c1_381, %c0_382] : memref<4x3x3x128xf32, #tpu.memory_space<vmem>>, vector<1x1x2x128xf32>
    %287 = vector.shape_cast %286 : vector<1x1x2x128xf32> to vector<2x128xf32>
    %c0_383 = arith.constant 0 : index
    %c256_384 = arith.constant 256 : index
    %288 = vector.load %arg18[%c0_383, %c256_384] : memref<4x1152xf32, #tpu.memory_space<vmem>>, vector<2x128xf32>
    tpu.vector_store %arg18[%c0_383, %c256_384], %287 {strides = array<i32>} : memref<4x1152xf32, #tpu.memory_space<vmem>>, vector<2x128xf32>,
    %c3_385 = arith.constant 3 : index
    %c1_386 = arith.constant 1 : index
    %c1_387 = arith.constant 1 : index
    %c0_388 = arith.constant 0 : index
    %289 = vector.load %arg17[%c3_385, %c1_386, %c1_387, %c0_388] : memref<4x3x3x128xf32, #tpu.memory_space<vmem>>, vector<1x1x2x128xf32>
    %290 = vector.shape_cast %289 : vector<1x1x2x128xf32> to vector<2x128xf32>
    %c2_389 = arith.constant 2 : index
    %c256_390 = arith.constant 256 : index
    %291 = vector.load %arg18[%c2_389, %c256_390] : memref<4x1152xf32, #tpu.memory_space<vmem>>, vector<2x128xf32>
    tpu.vector_store %arg18[%c2_389, %c256_390], %290 {strides = array<i32>} : memref<4x1152xf32, #tpu.memory_space<vmem>>, vector<2x128xf32>,
    %c1_391 = arith.constant 1 : index
    %c1_392 = arith.constant 1 : index
    %c0_393 = arith.constant 0 : index
    %c0_394 = arith.constant 0 : index
    %292 = vector.load %arg17[%c1_391, %c1_392, %c0_393, %c0_394] : memref<4x3x3x128xf32, #tpu.memory_space<vmem>>, vector<1x1x2x128xf32>
    %293 = vector.shape_cast %292 : vector<1x1x2x128xf32> to vector<2x128xf32>
    %c0_395 = arith.constant 0 : index
    %c384_396 = arith.constant 384 : index
    %294 = vector.load %arg18[%c0_395, %c384_396] : memref<4x1152xf32, #tpu.memory_space<vmem>>, vector<2x128xf32>
    tpu.vector_store %arg18[%c0_395, %c384_396], %293 {strides = array<i32>} : memref<4x1152xf32, #tpu.memory_space<vmem>>, vector<2x128xf32>,
    %c1_397 = arith.constant 1 : index
    %c2_398 = arith.constant 2 : index
    %c0_399 = arith.constant 0 : index
    %c0_400 = arith.constant 0 : index
    %295 = vector.load %arg17[%c1_397, %c2_398, %c0_399, %c0_400] : memref<4x3x3x128xf32, #tpu.memory_space<vmem>>, vector<1x1x2x128xf32>
    %296 = vector.shape_cast %295 : vector<1x1x2x128xf32> to vector<2x128xf32>
    %c2_401 = arith.constant 2 : index
    %c384_402 = arith.constant 384 : index
    %297 = vector.load %arg18[%c2_401, %c384_402] : memref<4x1152xf32, #tpu.memory_space<vmem>>, vector<2x128xf32>
    tpu.vector_store %arg18[%c2_401, %c384_402], %296 {strides = array<i32>} : memref<4x1152xf32, #tpu.memory_space<vmem>>, vector<2x128xf32>,
    %c0_403 = arith.constant 0 : index
    %c1_404 = arith.constant 1 : index
    %c1_405 = arith.constant 1 : index
    %c0_406 = arith.constant 0 : index
    %298 = vector.load %arg17[%c0_403, %c1_404, %c1_405, %c0_406] : memref<4x3x3x128xf32, #tpu.memory_space<vmem>>, vector<1x1x2x128xf32>
    %299 = vector.shape_cast %298 : vector<1x1x2x128xf32> to vector<2x128xf32>
    %c0_407 = arith.constant 0 : index
    %c512_408 = arith.constant 512 : index
    %300 = vector.load %arg18[%c0_407, %c512_408] : memref<4x1152xf32, #tpu.memory_space<vmem>>, vector<2x128xf32>
    tpu.vector_store %arg18[%c0_407, %c512_408], %299 {strides = array<i32>} : memref<4x1152xf32, #tpu.memory_space<vmem>>, vector<2x128xf32>,
    %c0_409 = arith.constant 0 : index
    %c2_410 = arith.constant 2 : index
    %c1_411 = arith.constant 1 : index
    %c0_412 = arith.constant 0 : index
    %301 = vector.load %arg17[%c0_409, %c2_410, %c1_411, %c0_412] : memref<4x3x3x128xf32, #tpu.memory_space<vmem>>, vector<1x1x2x128xf32>
    %302 = vector.shape_cast %301 : vector<1x1x2x128xf32> to vector<2x128xf32>
    %c2_413 = arith.constant 2 : index
    %c512_414 = arith.constant 512 : index
    %303 = vector.load %arg18[%c2_413, %c512_414] : memref<4x1152xf32, #tpu.memory_space<vmem>>, vector<2x128xf32>
    tpu.vector_store %arg18[%c2_413, %c512_414], %302 {strides = array<i32>} : memref<4x1152xf32, #tpu.memory_space<vmem>>, vector<2x128xf32>,
    %c1_415 = arith.constant 1 : index
    %c1_416 = arith.constant 1 : index
    %c1_417 = arith.constant 1 : index
    %c0_418 = arith.constant 0 : index
    %304 = vector.load %arg17[%c1_415, %c1_416, %c1_417, %c0_418] : memref<4x3x3x128xf32, #tpu.memory_space<vmem>>, vector<1x1x2x128xf32>
    %305 = vector.shape_cast %304 : vector<1x1x2x128xf32> to vector<2x128xf32>
    %c0_419 = arith.constant 0 : index
    %c640_420 = arith.constant 640 : index
    %306 = vector.load %arg18[%c0_419, %c640_420] : memref<4x1152xf32, #tpu.memory_space<vmem>>, vector<2x128xf32>
    tpu.vector_store %arg18[%c0_419, %c640_420], %305 {strides = array<i32>} : memref<4x1152xf32, #tpu.memory_space<vmem>>, vector<2x128xf32>,
    %c1_421 = arith.constant 1 : index
    %c2_422 = arith.constant 2 : index
    %c1_423 = arith.constant 1 : index
    %c0_424 = arith.constant 0 : index
    %307 = vector.load %arg17[%c1_421, %c2_422, %c1_423, %c0_424] : memref<4x3x3x128xf32, #tpu.memory_space<vmem>>, vector<1x1x2x128xf32>
    %308 = vector.shape_cast %307 : vector<1x1x2x128xf32> to vector<2x128xf32>
    %c2_425 = arith.constant 2 : index
    %c640_426 = arith.constant 640 : index
    %309 = vector.load %arg18[%c2_425, %c640_426] : memref<4x1152xf32, #tpu.memory_space<vmem>>, vector<2x128xf32>
    tpu.vector_store %arg18[%c2_425, %c640_426], %308 {strides = array<i32>} : memref<4x1152xf32, #tpu.memory_space<vmem>>, vector<2x128xf32>,
    %c3_427 = arith.constant 3 : index
    %c1_428 = arith.constant 1 : index
    %c0_429 = arith.constant 0 : index
    %c0_430 = arith.constant 0 : index
    %310 = vector.load %arg17[%c3_427, %c1_428, %c0_429, %c0_430] : memref<4x3x3x128xf32, #tpu.memory_space<vmem>>, vector<1x1x2x128xf32>
    %311 = vector.shape_cast %310 : vector<1x1x2x128xf32> to vector<2x128xf32>
    %c0_431 = arith.constant 0 : index
    %c768_432 = arith.constant 768 : index
    %312 = vector.load %arg18[%c0_431, %c768_432] : memref<4x1152xf32, #tpu.memory_space<vmem>>, vector<2x128xf32>
    tpu.vector_store %arg18[%c0_431, %c768_432], %311 {strides = array<i32>} : memref<4x1152xf32, #tpu.memory_space<vmem>>, vector<2x128xf32>,
    %c3_433 = arith.constant 3 : index
    %c2_434 = arith.constant 2 : index
    %c0_435 = arith.constant 0 : index
    %c0_436 = arith.constant 0 : index
    %313 = vector.load %arg17[%c3_433, %c2_434, %c0_435, %c0_436] : memref<4x3x3x128xf32, #tpu.memory_space<vmem>>, vector<1x1x2x128xf32>
    %314 = vector.shape_cast %313 : vector<1x1x2x128xf32> to vector<2x128xf32>
    %c2_437 = arith.constant 2 : index
    %c768_438 = arith.constant 768 : index
    %315 = vector.load %arg18[%c2_437, %c768_438] : memref<4x1152xf32, #tpu.memory_space<vmem>>, vector<2x128xf32>
    tpu.vector_store %arg18[%c2_437, %c768_438], %314 {strides = array<i32>} : memref<4x1152xf32, #tpu.memory_space<vmem>>, vector<2x128xf32>,
    %c2_439 = arith.constant 2 : index
    %c1_440 = arith.constant 1 : index
    %c1_441 = arith.constant 1 : index
    %c0_442 = arith.constant 0 : index
    %316 = vector.load %arg17[%c2_439, %c1_440, %c1_441, %c0_442] : memref<4x3x3x128xf32, #tpu.memory_space<vmem>>, vector<1x1x2x128xf32>
    %317 = vector.shape_cast %316 : vector<1x1x2x128xf32> to vector<2x128xf32>
    %c0_443 = arith.constant 0 : index
    %c896_444 = arith.constant 896 : index
    %318 = vector.load %arg18[%c0_443, %c896_444] : memref<4x1152xf32, #tpu.memory_space<vmem>>, vector<2x128xf32>
    tpu.vector_store %arg18[%c0_443, %c896_444], %317 {strides = array<i32>} : memref<4x1152xf32, #tpu.memory_space<vmem>>, vector<2x128xf32>,
    %c2_445 = arith.constant 2 : index
    %c2_446 = arith.constant 2 : index
    %c1_447 = arith.constant 1 : index
    %c0_448 = arith.constant 0 : index
    %319 = vector.load %arg17[%c2_445, %c2_446, %c1_447, %c0_448] : memref<4x3x3x128xf32, #tpu.memory_space<vmem>>, vector<1x1x2x128xf32>
    %320 = vector.shape_cast %319 : vector<1x1x2x128xf32> to vector<2x128xf32>
    %c2_449 = arith.constant 2 : index
    %c896_450 = arith.constant 896 : index
    %321 = vector.load %arg18[%c2_449, %c896_450] : memref<4x1152xf32, #tpu.memory_space<vmem>>, vector<2x128xf32>
    tpu.vector_store %arg18[%c2_449, %c896_450], %320 {strides = array<i32>} : memref<4x1152xf32, #tpu.memory_space<vmem>>, vector<2x128xf32>,
    %c3_451 = arith.constant 3 : index
    %c1_452 = arith.constant 1 : index
    %c1_453 = arith.constant 1 : index
    %c0_454 = arith.constant 0 : index
    %322 = vector.load %arg17[%c3_451, %c1_452, %c1_453, %c0_454] : memref<4x3x3x128xf32, #tpu.memory_space<vmem>>, vector<1x1x2x128xf32>
    %323 = vector.shape_cast %322 : vector<1x1x2x128xf32> to vector<2x128xf32>
    %c0_455 = arith.constant 0 : index
    %c1024_456 = arith.constant 1024 : index
    %324 = vector.load %arg18[%c0_455, %c1024_456] : memref<4x1152xf32, #tpu.memory_space<vmem>>, vector<2x128xf32>
    tpu.vector_store %arg18[%c0_455, %c1024_456], %323 {strides = array<i32>} : memref<4x1152xf32, #tpu.memory_space<vmem>>, vector<2x128xf32>,
    %c3_457 = arith.constant 3 : index
    %c2_458 = arith.constant 2 : index
    %c1_459 = arith.constant 1 : index
    %c0_460 = arith.constant 0 : index
    %325 = vector.load %arg17[%c3_457, %c2_458, %c1_459, %c0_460] : memref<4x3x3x128xf32, #tpu.memory_space<vmem>>, vector<1x1x2x128xf32>
    %326 = vector.shape_cast %325 : vector<1x1x2x128xf32> to vector<2x128xf32>
    %c2_461 = arith.constant 2 : index
    %c1024_462 = arith.constant 1024 : index
    %327 = vector.load %arg18[%c2_461, %c1024_462] : memref<4x1152xf32, #tpu.memory_space<vmem>>, vector<2x128xf32>
    tpu.vector_store %arg18[%c2_461, %c1024_462], %326 {strides = array<i32>} : memref<4x1152xf32, #tpu.memory_space<vmem>>, vector<2x128xf32>,
    %c0_463 = arith.constant 0 : index
    %c0_464 = arith.constant 0 : index
    %328 = vector.load %arg18[%c0_463, %c0_464] : memref<4x1152xf32, #tpu.memory_space<vmem>>, vector<4x1152xf32>
    %329 = arith.truncf %328 : vector<4x1152xf32> to vector<4x1152xbf16>
    %c0_465 = arith.constant 0 : index
    %c0_466 = arith.constant 0 : index
    %330 = vector.load %arg6[%c0_465, %c0_466] : memref<1152x256xbf16, #tpu.memory_space<vmem>>, vector<1152x256xbf16>
    %cst_467 = arith.constant dense<0.000000e+00> : vector<4x256xf32>
    %331 = tpu.matmul %329, %330, %cst_467 {dimension_numbers = #tpu.dot_dimension_numbers<[1], [0], [0], [1], [0, 0, 1, 1], [], []>} : vector<4x1152xbf16>, vector<1152x256xbf16>, vector<4x256xf32> -> vector<4x256xf32>
    %c0_468 = arith.constant 0 : index
    %c0_469 = arith.constant 0 : index
    %332 = vector.load %arg7[%c0_468, %c0_469] : memref<1x256xf32, #tpu.memory_space<vmem>>, vector<1x256xf32>
    %333 = vector.broadcast %332 : vector<1x256xf32> to vector<4x256xf32>
    %334 = arith.addf %331, %333 : vector<4x256xf32>
    %cst_470 = arith.constant 0.000000e+00 : f32
    %335 = vector.broadcast %cst_470 : f32 to vector<4x256xf32>
    %336 = arith.maximumf %334, %335 : vector<4x256xf32>
    %337 = vector.extract_strided_slice %336 {offsets = [0, 0], sizes = [1, 256], strides = [1, 1]} : vector<4x256xf32> to vector<1x256xf32>
    %338 = vector.extract_strided_slice %336 {offsets = [1, 0], sizes = [1, 256], strides = [1, 1]} : vector<4x256xf32> to vector<1x256xf32>
    %339 = vector.extract_strided_slice %336 {offsets = [2, 0], sizes = [1, 256], strides = [1, 1]} : vector<4x256xf32> to vector<1x256xf32>
    %340 = vector.extract_strided_slice %336 {offsets = [3, 0], sizes = [1, 256], strides = [1, 1]} : vector<4x256xf32> to vector<1x256xf32>
    %341 = tpu.concatenate %337, %338, %339, %340 in 1 : vector<1x256xf32>, vector<1x256xf32>, vector<1x256xf32>, vector<1x256xf32> -> vector<1x1024xf32>
    %342 = arith.truncf %341 : vector<1x1024xf32> to vector<1x1024xbf16>
    %c0_471 = arith.constant 0 : index
    %c0_472 = arith.constant 0 : index
    %343 = vector.load %arg8[%c0_471, %c0_472] : memref<1024x256xbf16, #tpu.memory_space<vmem>>, vector<1024x256xbf16>
    %cst_473 = arith.constant dense<0.000000e+00> : vector<1x256xf32>
    %344 = tpu.matmul %342, %343, %cst_473 {dimension_numbers = #tpu.dot_dimension_numbers<[1], [0], [0], [1], [0, 0, 1, 1], [], []>} : vector<1x1024xbf16>, vector<1024x256xbf16>, vector<1x256xf32> -> vector<1x256xf32>
    %c0_474 = arith.constant 0 : index
    %c0_475 = arith.constant 0 : index
    %345 = vector.load %arg9[%c0_474, %c0_475] : memref<1x256xf32, #tpu.memory_space<vmem>>, vector<1x256xf32>
    %346 = arith.addf %344, %345 : vector<1x256xf32>
    %cst_476 = arith.constant 0.000000e+00 : f32
    %347 = vector.broadcast %cst_476 : f32 to vector<1x256xf32>
    %348 = arith.maximumf %346, %347 : vector<1x256xf32>
    %349 = arith.truncf %348 : vector<1x256xf32> to vector<1x256xbf16>
    %c0_477 = arith.constant 0 : index
    %c0_478 = arith.constant 0 : index
    %350 = vector.load %arg10[%c0_477, %c0_478] : memref<256x256xbf16, #tpu.memory_space<vmem>>, vector<256x256xbf16>
    %cst_479 = arith.constant dense<0.000000e+00> : vector<1x256xf32>
    %351 = tpu.matmul %349, %350, %cst_479 {dimension_numbers = #tpu.dot_dimension_numbers<[1], [0], [0], [1], [0, 0, 1, 1], [], []>} : vector<1x256xbf16>, vector<256x256xbf16>, vector<1x256xf32> -> vector<1x256xf32>
    %c0_480 = arith.constant 0 : index
    %c0_481 = arith.constant 0 : index
    %352 = vector.load %arg11[%c0_480, %c0_481] : memref<1x256xf32, #tpu.memory_space<vmem>>, vector<1x256xf32>
    %353 = arith.addf %351, %352 : vector<1x256xf32>
    %cst_482 = arith.constant 0.000000e+00 : f32
    %354 = vector.broadcast %cst_482 : f32 to vector<1x256xf32>
    %355 = arith.maximumf %353, %354 : vector<1x256xf32>
    %356 = arith.truncf %355 : vector<1x256xf32> to vector<1x256xbf16>
    %c0_483 = arith.constant 0 : index
    %c0_484 = arith.constant 0 : index
    %357 = vector.load %arg12[%c0_483, %c0_484] : memref<256x128xbf16, #tpu.memory_space<vmem>>, vector<256x128xbf16>
    %cst_485 = arith.constant dense<0.000000e+00> : vector<1x128xf32>
    %358 = tpu.matmul %356, %357, %cst_485 {dimension_numbers = #tpu.dot_dimension_numbers<[1], [0], [0], [1], [0, 0, 1, 1], [], []>} : vector<1x256xbf16>, vector<256x128xbf16>, vector<1x128xf32> -> vector<1x128xf32>
    %c0_486 = arith.constant 0 : index
    %c0_487 = arith.constant 0 : index
    %359 = vector.load %arg13[%c0_486, %c0_487] : memref<1x128xf32, #tpu.memory_space<vmem>>, vector<1x128xf32>
    %360 = arith.addf %358, %359 : vector<1x128xf32>
    %c0_488 = arith.constant 0 : index
    %c0_489 = arith.constant 0 : index
    %c0_490 = arith.constant 0 : index
    %361 = vector.load %arg14[%c0_488, %c0_489, %c0_490] : memref<1x1x128xf32, #tpu.memory_space<vmem>>, vector<1x1x128xf32>
    %362 = vector.shape_cast %361 : vector<1x1x128xf32> to vector<1x128xf32>
    %363 = vector.shape_cast %360 : vector<1x128xf32> to vector<1x1x128xf32>
    tpu.vector_store %arg14[%c0_488, %c0_489, %c0_490], %363 {strides = array<i32>} : memref<1x1x128xf32, #tpu.memory_space<vmem>>, vector<1x1x128xf32>,
    return
  }
  func.func @transform_0(%arg0: i32) -> (i32, i32, i32) {
    %c0_i32 = arith.constant 0 : i32
    %c0_i32_0 = arith.constant 0 : i32
    %c0_i32_1 = arith.constant 0 : i32
    return %arg0, %c0_i32, %c0_i32_0 : i32, i32, i32
  }
  func.func @transform_1(%arg0: i32) -> (i32, i32) {
    %c0_i32 = arith.constant 0 : i32
    %c0_i32_0 = arith.constant 0 : i32
    %c0_i32_1 = arith.constant 0 : i32
    return %c0_i32, %c0_i32_0 : i32, i32
  }
  func.func @transform_2(%arg0: i32) -> (i32, i32) {
    %c0_i32 = arith.constant 0 : i32
    %c0_i32_0 = arith.constant 0 : i32
    %c0_i32_1 = arith.constant 0 : i32
    return %c0_i32, %c0_i32_0 : i32, i32
  }
  func.func @transform_3(%arg0: i32) -> (i32, i32) {
    %c0_i32 = arith.constant 0 : i32
    %c0_i32_0 = arith.constant 0 : i32
    %c0_i32_1 = arith.constant 0 : i32
    return %c0_i32, %c0_i32_0 : i32, i32
  }
  func.func @transform_4(%arg0: i32) -> (i32, i32) {
    %c0_i32 = arith.constant 0 : i32
    %c0_i32_0 = arith.constant 0 : i32
    %c0_i32_1 = arith.constant 0 : i32
    return %c0_i32, %c0_i32_0 : i32, i32
  }
  func.func @transform_5(%arg0: i32) -> (i32, i32) {
    %c0_i32 = arith.constant 0 : i32
    %c0_i32_0 = arith.constant 0 : i32
    %c0_i32_1 = arith.constant 0 : i32
    return %c0_i32, %c0_i32_0 : i32, i32
  }
  func.func @transform_6(%arg0: i32) -> (i32, i32) {
    %c0_i32 = arith.constant 0 : i32
    %c0_i32_0 = arith.constant 0 : i32
    %c0_i32_1 = arith.constant 0 : i32
    return %c0_i32, %c0_i32_0 : i32, i32
  }
  func.func @transform_7(%arg0: i32) -> (i32, i32) {
    %c0_i32 = arith.constant 0 : i32
    %c0_i32_0 = arith.constant 0 : i32
    %c0_i32_1 = arith.constant 0 : i32
    return %c0_i32, %c0_i32_0 : i32, i32
  }
  func.func @transform_8(%arg0: i32) -> (i32, i32) {
    %c0_i32 = arith.constant 0 : i32
    %c0_i32_0 = arith.constant 0 : i32
    %c0_i32_1 = arith.constant 0 : i32
    return %c0_i32, %c0_i32_0 : i32, i32
  }
  func.func @transform_9(%arg0: i32) -> (i32, i32) {
    %c0_i32 = arith.constant 0 : i32
    %c0_i32_0 = arith.constant 0 : i32
    %c0_i32_1 = arith.constant 0 : i32
    return %c0_i32, %c0_i32_0 : i32, i32
  }
  func.func @transform_10(%arg0: i32) -> (i32, i32) {
    %c0_i32 = arith.constant 0 : i32
    %c0_i32_0 = arith.constant 0 : i32
    %c0_i32_1 = arith.constant 0 : i32
    return %c0_i32, %c0_i32_0 : i32, i32
  }
  func.func @transform_11(%arg0: i32) -> (i32, i32) {
    %c0_i32 = arith.constant 0 : i32
    %c0_i32_0 = arith.constant 0 : i32
    %c0_i32_1 = arith.constant 0 : i32
    return %c0_i32, %c0_i32_0 : i32, i32
  }
  func.func @transform_12(%arg0: i32) -> (i32, i32) {
    %c0_i32 = arith.constant 0 : i32
    %c0_i32_0 = arith.constant 0 : i32
    %c0_i32_1 = arith.constant 0 : i32
    return %c0_i32, %c0_i32_0 : i32, i32
  }
  func.func @transform_13(%arg0: i32) -> (i32, i32, i32) {
    %c0_i32 = arith.constant 0 : i32
    %c0_i32_0 = arith.constant 0 : i32
    %c0_i32_1 = arith.constant 0 : i32
    return %arg0, %c0_i32, %c0_i32_0 : i32, i32, i32
  }
}

</mosaic_0001>

<bundles_post_ra>
// kernel: private_encoder_forward.1
= control target key start
LH: loop header
LB: loop body
LE: loop exit
PB: predicated region body
PF: predicated region fallthrough
CT: control target
= control target key end

     0   :  { %18 = vsyncpa [#allocation7], 0  ;;  %s7195_s0 = inlined_call_operand.vmem [shape: bf16[2,64,256], index: 0, kind: input, shape index: {}]   ;;  %s7196_s1 = inlined_call_operand.vmem [shape: bf16[256,128], index: 1, kind: input, shape index: {}]   ;;  %s7197_s2 = inlined_call_operand.vmem [shape: f32[1,128], index: 2, kind: input, shape index: {}]   ;;  %s7198_s3 = inlined_call_operand.vmem [shape: bf16[1152,128], index: 3, kind: input, shape index: {}]   ;;  %s7199_s4 = inlined_call_operand.vmem [shape: f32[1,128], index: 4, kind: input, shape index: {}]   ;;  %s7200_s5 = inlined_call_operand.vmem [shape: bf16[1152,256], index: 5, kind: input, shape index: {}]   ;;  %s7201_s6 = inlined_call_operand.vmem [shape: f32[1,256], index: 6, kind: input, shape index: {}]   ;;  %s7202_s7 = inlined_call_operand.vmem [shape: bf16[1024,256], index: 7, kind: input, shape index: {}]   ;;  %s7203_s8 = inlined_call_operand.vmem [shape: f32[1,256], index: 8, kind: input, shape index: {}]   ;;  %s7204_s9 = inlined_call_operand.vmem [shape: bf16[256,256], index: 9, kind: input, shape index: {}]   ;;  %s7205_s10 = inlined_call_operand.vmem [shape: f32[1,256], index: 10, kind: input, shape index: {}]   ;;  %s7206_s11 = inlined_call_operand.vmem [shape: bf16[256,128], index: 11, kind: input, shape index: {}]   ;;  %s7207_s12 = inlined_call_operand.vmem [shape: f32[1,128], index: 12, kind: input, shape index: {}]   ;;  %s7208_s13 = inlined_call_operand.hbm [shape: f32[2,1,128], index: 13, kind: output, shape index: {}]  }
   0x1   :  { %20 = vsyncpa [#allocation7 + $0x1], 0  ;;  %s5754_s25 = smov 0   ;;  %s5756_s26 = smov 0  }
   0x2   :  { %s5758_s27 = smov 0   ;;  %s5760_s28 = smov 0  }
   0x3 LB: > { %7212 = sst [smem:[#allocation9_spill]] %s5674_s27  ;;  %s5775_s29 = sadd.s32 4294967295, %s5678_s28   ;;  %s5678_s28 = sphi %s5760_s28, %s7217_s28   ;;  %s5674_s27 = sphi %s5758_s27, %s7219_s27   ;;  %s5670_s26 = sphi %s5756_s26, %s7221_s26   ;;  %s5666_s25 = sphi %s5754_s25, %s7220_s25  }
   0x4   : > { %s4359_s30 = sadd.s32 4294967294, %s5678_s28   ;;  %s5779_s14 = sadd.s32 1, %s5678_s28  }
   0x5   : > { %7213 = sst [smem:[#allocation10_spill]] %s5779_s14  ;;  %s311_s15 = sadd.s32 1, %s5674_s27 }
   0x6   : > { %s308_s16 = ssub.s32 %s5678_s28, %s5779_s14  ;;  %p321_p0 = scmp.ne.s32.totalorder %s5674_s27, %s5670_s26 }
   0x7   : > { %p309_p1 = scmp.eq.s32.totalorder %s308_s16, 0  ;;  %p322_p2 = scmp.eq.s32.totalorder %s5775_s29, 1 }
   0x8   : > { %p327_p3 = scmp.ne.s32.totalorder %s5670_s26, %s5666_s25  ;;  %p328_p4 = scmp.eq.s32.totalorder %s4359_s30, 1 }
   0x9   : > { %s5790_s17 = scalar_select %p309_p1, %s5674_s27, %s311_s15  }
   0xa   : > { %p5792_p5 = por %p322_p2, %p321_p0  ;;  %p5796_p6 = por %p328_p4, %p327_p3 }
   0xb   : > { %7214 = sst [smem:[#allocation11_spill]] %s5790_s17  ;;  %p4362_p7 = scmp.ge.s32.totalorder %s5678_s28, 1 }
   0xc   : > { %p390_p8 = scmp.lt.s32.totalorder %s5678_s28, 3 }
   0xe   : > { %p391_p9 = pnand %p4362_p7, %p390_p8 }
   0xf   : > { %v5040_v0 = vld [vmem:[%s7196_s1 + $0x40] sm:$0xff] (!%p391_p9)   ;;  %v5042_v2 = vld [vmem:[%s7196_s1 + $0x48] sm:$0xff] (!%p391_p9)   ;;  %p433_p10 = scmp.lt.s32.totalorder (!%p391_p9), %s5775_s29, 1  ;;  %v5044_v4 = vld [vmem:[%s7196_s1 + $0x50] sm:$0xff] (!%p391_p9)   ;;  %v5680_v24 = vmov (!%p391_p9), 0.0   ;;  %vm5681_vm0 = vmmov (!%p391_p9), 0  }
  0x10   : > { %394 = sbr.rel (%p391_p9) target bundleno = 1933 (0x78d), region = 72  ;;  %v5041_v1 = vld [vmem:[%s7196_s1] sm:$0xff] (!%p391_p9)   ;;  %4787 = vmatprep.subr.bf16.mxu0 (!%p391_p9), %v5040_v0  ;;  %v5043_v3 = vld [vmem:[%s7196_s1 + $0x8] sm:$0xff] (!%p391_p9)   ;;  %v5045_v5 = vld [vmem:[%s7196_s1 + $0x10] sm:$0xff] (!%p391_p9)   ;;  %696 = vst [vmem:[#allocation2 + $0x8] sm:$0x1f] (!%p391_p9), %v5680_v24 }
  0x11   : > { %4788 = vmatpush3.bf16.msra.mxu0 (!%p391_p9), %v5041_v1  ;;  %v5046_v6 = vld [vmem:[%s7196_s1 + $0x58] sm:$0xff] (!%p391_p9)   ;;  %v5048_v8 = vld [vmem:[%s7196_s1 + $0x60] sm:$0xff] (!%p391_p9)   ;;  %v5050_v10 = vld [vmem:[%s7196_s1 + $0x68] sm:$0xff] (!%p391_p9)   ;;  %697 = vst [vmem:[#allocation2 + $0x10] sm:$0x1f] (!%p391_p9), %v5680_v24  ;;  %s431_s20 = sand.u32 (!%p391_p9), 1, %s5670_s26  }
  0x12   : > { %4789 = vmatprep.subr.bf16.mxu0 (!%p391_p9), %v5042_v2  ;;  %v5047_v7 = vld [vmem:[%s7196_s1 + $0x18] sm:$0xff] (!%p391_p9)   ;;  %v5049_v9 = vld [vmem:[%s7196_s1 + $0x20] sm:$0xff] (!%p391_p9)   ;;  %v5051_v12 = vld [vmem:[%s7196_s1 + $0x28] sm:$0xff] (!%p391_p9)   ;;  %698 = vst [vmem:[#allocation2 + $0x18] sm:$0x1f] (!%p391_p9), %v5680_v24  ;;  %s4783_s21 = sshll.u32 (!%p391_p9), %s5775_s29, 4 }
  0x13   : > { %v5052_v13 = vld [vmem:[%s7196_s1 + $0x70] sm:$0xff] (!%p391_p9)   ;;  %v5054_v15 = vld [vmem:[%s7196_s1 + $0x78] sm:$0xff] (!%p391_p9)   ;;  %699 = vst [vmem:[#allocation2 + $0x20] sm:$0x1f] (!%p391_p9), %v5680_v24  ;;  %701 = vst [vmem:[#allocation2 + $0x30] sm:$0x1f] (!%p391_p9), %v5680_v24 }
  0x14   : > { %v5053_v14 = vld [vmem:[%s7196_s1 + $0x30] sm:$0xff] (!%p391_p9)   ;;  %v5055_v16 = vld [vmem:[%s7196_s1 + $0x38] sm:$0xff] (!%p391_p9)   ;;  %702 = vst [vmem:[#allocation2 + $0x38] sm:$0x1f] (!%p391_p9), %v5680_v24  ;;  %703 = vst [vmem:[#allocation2 + $0x40] sm:$0x1f] (!%p391_p9), %v5680_v24 }
  0x15   : > { %4790 = vmatpush3.bf16.msra.mxu0 (!%p391_p9), %v5043_v3  ;;  %704 = vst [vmem:[#allocation2 + $0x48] sm:$0x1f] (!%p391_p9), %v5680_v24  ;;  %705 = vst [vmem:[#allocation2 + $0x50] sm:$0x1f] (!%p391_p9), %v5680_v24  ;;  %v5068_v25 = vld [vmem:[%s7198_s3 + $0x40] sm:$0xff] (!%p391_p9)   ;;  %v5072_v29 = vld [vmem:[%s7198_s3 + $0x48] sm:$0xff] (!%p391_p9)  }
  0x16   : > { %4791 = vmatprep.subr.bf16.mxu0 (!%p391_p9), %v5044_v4  ;;  %706 = vst [vmem:[#allocation2 + $0x58] sm:$0x1f] (!%p391_p9), %v5680_v24  ;;  %707 = vst [vmem:[#allocation2 + $0x60] sm:$0x1f] (!%p391_p9), %v5680_v24  ;;  %v5069_v26 = vld [vmem:[%s7198_s3 + $0xc0] sm:$0xff] (!%p391_p9)   ;;  %4827 = vmatprep.subr.bf16.mxu1 (!%p391_p9), %v5068_v25  ;;  %v5073_v30 = vld [vmem:[%s7198_s3 + $0xc8] sm:$0xff] (!%p391_p9)  }
  0x17   : > { %s434_s23 = scalar_select %p433_p10, %s5775_s29, 1  ;;  %708 = vst [vmem:[#allocation2 + $0x68] sm:$0x1f] %v5680_v24  ;;  %709 = vst [vmem:[#allocation2 + $0x70] sm:$0x1f] %v5680_v24  ;;  %v5070_v27 = vld [vmem:[%s7198_s3] sm:$0xff]  }
  0x18   : > { %710 = vst [vmem:[#allocation2 + $0x78] sm:$0x1f] %v5680_v24  ;;  %711 = vst [vmem:[#allocation2 + $0x80] sm:$0x1f] %v5680_v24  ;;  %v5071_v28 = vld [vmem:[%s7198_s3 + $0x80] sm:$0xff]   ;;  %4828 = vmatpush3.bf16.msra.mxu1 %v5070_v27  ;;  %v5074_v31 = vld [vmem:[%s7198_s3 + $0x8] sm:$0xff]  }
  0x19   : > { %4792 = vmatpush3.bf16.msra.mxu0 %v5045_v5  ;;  %s4786_s27 = sshll.u32 %s434_s23, 6  ;;  %712 = vst [vmem:[#allocation2 + $0x88] sm:$0x1f] %v5680_v24  ;;  %713 = vst [vmem:[#allocation2 + $0x90] sm:$0x1f] %v5680_v24  ;;  %v5075_v32 = vld [vmem:[%s7198_s3 + $0x88] sm:$0xff]   ;;  %4829 = vmatprep.subr.bf16.mxu1 %v5072_v29  ;;  %s7153_s23 = scalar_lea.hbm %s7208_s13, %s4783_s21 }
  0x1a   : > { %4793 = vmatprep.subr.bf16.mxu0 %v5046_v6  ;;  %s5834_s22 = scalar_lea.vmem %s7195_s0, %s4786_s27  ;;  %714 = vst [vmem:[#allocation2 + $0x98] sm:$0x1f] %v5680_v24  ;;  %1693 = vst [vmem:[#allocation4 + $0x4] sm:$0x7] %v5680_v24  ;;  %v5076_v33 = vld [vmem:[%s7198_s3 + $0x50] sm:$0xff]   ;;  %v5080_v37 = vld [vmem:[%s7198_s3 + $0x58] sm:$0xff]  }
  0x1b   : > { %v5058_v11 = vld [vmem:[%s5834_s22 + $0x4] ss:$8 sps:$4 sm:$0xff]   ;;  %v5056_v17 = vld [vmem:[%s5834_s22] ss:$8 sps:$4 sm:$0xff]   ;;  %v5059_v18 = vld [vmem:[%s5834_s22 + $0x14] ss:$8 sps:$4 sm:$0xff]  }
  0x1c   : > { %654 = vmatprep.mubr.bf16.mxu0 %v5058_v11  ;;  %v5061_v19 = vld [vmem:[%s5834_s22 + $0x10] ss:$8 sps:$4 sm:$0xff]   ;;  %v5062_v20 = vld [vmem:[%s5834_s22 + $0x24] ss:$8 sps:$4 sm:$0xff]   ;;  %v5064_v21 = vld [vmem:[%s5834_s22 + $0x20] ss:$8 sps:$4 sm:$0xff]   ;;  %4830 = vmatpush3.bf16.msra.mxu1 %v5074_v31 }
  0x1d   : > { %4794 = vmatpush3.bf16.msra.mxu0 %v5047_v7  ;;  %v5065_v22 = vld [vmem:[%s5834_s22 + $0x34] ss:$8 sps:$4 sm:$0xff]   ;;  %v5067_v23 = vld [vmem:[%s5834_s22 + $0x30] ss:$8 sps:$4 sm:$0xff]   ;;  %1694 = vst [vmem:[#allocation4 + $0x8] sm:$0x7] %v5680_v24  ;;  %4831 = vmatprep.subr.bf16.mxu1 %v5076_v33 }
  0x1e   : > { %4795 = vmatprep.subr.bf16.mxu0 %v5048_v8  ;;  %1696 = vst [vmem:[#allocation4 + $0x10] sm:$0x7] %v5680_v24  ;;  %1697 = vst [vmem:[#allocation4 + $0x14] sm:$0x7] %v5680_v24  ;;  %v5077_v34 = vld [vmem:[%s7198_s3 + $0xd0] sm:$0xff]   ;;  %v5081_v38 = vld [vmem:[%s7198_s3 + $0xd8] sm:$0xff]  }
  0x1f   : > { %1698 = vst [vmem:[#allocation4 + $0x18] sm:$0x7] %v5680_v24  ;;  %1699 = vst [vmem:[#allocation4 + $0x1c] sm:$0x7] %v5680_v24  ;;  %v5078_v35 = vld [vmem:[%s7198_s3 + $0x10] sm:$0xff]   ;;  %v5082_v39 = vld [vmem:[%s7198_s3 + $0x18] sm:$0xff]  }
  0x20   : > { %1700 = vst [vmem:[#allocation4 + $0x20] sm:$0x7] %v5680_v24  ;;  %1701 = vst [vmem:[#allocation4 + $0x24] sm:$0x7] %v5680_v24  ;;  %v5079_v36 = vld [vmem:[%s7198_s3 + $0x90] sm:$0xff]   ;;  %4832 = vmatpush3.bf16.msra.mxu1 %v5078_v35  ;;  %v5083_v40 = vld [vmem:[%s7198_s3 + $0x98] sm:$0xff]  }
  0x21   : > { %4796 = vmatpush3.bf16.msra.mxu0 %v5049_v9  ;;  %1702 = vst [vmem:[#allocation4 + $0x28] sm:$0x7] %v5680_v24  ;;  %1703 = vst [vmem:[#allocation4 + $0x2c] sm:$0x7] %v5680_v24  ;;  %4833 = vmatprep.subr.bf16.mxu1 %v5080_v37  ;;  %v763_v41 = vld [vmem:[#allocation2 + $0x51] sm:$0xf] }
  0x22   : > { %4797 = vmatprep.subr.bf16.mxu0 %v5050_v10  ;;  %764 = vst [vmem:[#allocation3 + $0x8] sm:$0xf] %v763_v41  ;;  %v5084_v42 = vld [vmem:[%s7198_s3 + $0x60] sm:$0xff]   ;;  %v5088_v46 = vld [vmem:[%s7198_s3 + $0x68] sm:$0xff]   ;;  %v748_v50 = vld [vmem:[#allocation2 + $0x78] sm:$0xf] }
  0x23   : > { %v5085_v43 = vld [vmem:[%s7198_s3 + $0xe0] sm:$0xff]   ;;  %v5089_v47 = vld [vmem:[%s7198_s3 + $0xe8] sm:$0xff]   ;;  %v777_v51 = vld [vmem:[#allocation2 + $0x79] sm:$0xf]  ;;  %749 = vst [vmem:[#allocation3] sm:$0xf] %v748_v50 }
  0x24   : > { %4834 = vmatpush3.bf16.msra.mxu1 %v5082_v39  ;;  %v5086_v44 = vld [vmem:[%s7198_s3 + $0x20] sm:$0xff]   ;;  %v5090_v48 = vld [vmem:[%s7198_s3 + $0x28] sm:$0xff]   ;;  %778 = vst [vmem:[#allocation3 + $0x10] sm:$0xf] %v777_v51  ;;  %v5092_v52 = vld [vmem:[%s7198_s3 + $0x70] sm:$0xff]   ;;  %s432_s17 = scalar_lea.vmem [#allocation6], %s431_s20 }
  0x25   : > { %4798 = vmatpush3.bf16.msra.mxu0 %v5051_v12  ;;  %v5087_v45 = vld [vmem:[%s7198_s3 + $0xa0] sm:$0xff]   ;;  %4835 = vmatprep.subr.bf16.mxu1 %v5084_v42  ;;  %v5091_v49 = vld [vmem:[%s7198_s3 + $0xa8] sm:$0xff]   ;;  %v5093_v53 = vld [vmem:[%s7198_s3 + $0xf0] sm:$0xff]   ;;  %s4304_s24 = sshll.u32 %s432_s17, 4  ;;  %s4292_s22 = scalar_lea.sflag [#allocation7], %s431_s20  ;;  %s7155_s24 = int_to_ptr.vmem [resolvable:$true] %s4304_s24 }
  0x26   : > { %4799 = vmatprep.subr.bf16.mxu0 %v5052_v13  ;;  %v5094_v54 = vld [vmem:[%s7198_s3 + $0x30] sm:$0xff]   ;;  %v5096_v56 = vld [vmem:[%s7198_s3 + $0x78] sm:$0xff]   ;;  %v5100_v60 = vld [vmem:[%s7198_s3 + $0x140] sm:$0xff]   ;;  %s5616_s16 = scalar_lea.vmem %s7155_s24, 16  ;;  %s5683_s29 = smov [#allocation6]  }
  0x27   : > { %v5095_v55 = vld [vmem:[%s7198_s3 + $0xb0] sm:$0xff]   ;;  %v5097_v57 = vld [vmem:[%s7198_s3 + $0xf8] sm:$0xff]   ;;  %v5101_v61 = vld [vmem:[%s7198_s3 + $0x1c0] sm:$0xff]   ;;  %p5617_p11 = scmp.ne.s32.totalorder %s7155_s24, %s5616_s16  ;;  %s5620_s27 = sshll.u32 %s5683_s29, 4  ;;  %s5621_s27 = int_to_ptr.vmem [resolvable:$false] %s5620_s27 }
  0x28   : > { %4836 = vmatpush3.bf16.msra.mxu1 %v5086_v44  ;;  %v5098_v58 = vld [vmem:[%s7198_s3 + $0x38] sm:$0xff]   ;;  %v5998_v63 = vld [vmem:[%s7197_s2] ss:$0 sm:$0xff]  ;;  %s5622_s14 = scalar_lea.vmem %s5621_s27, 32  ;;  %p5623_p0 = scmp.lt.s32.totalorder %s7155_s24, %s5621_s27 }
  0x29   : > { %4800 = vmatpush3.bf16.msra.mxu0 %v5053_v14  ;;  %4837 = vmatprep.subr.bf16.mxu1 %v5088_v46  ;;  %v5099_v59 = vld [vmem:[%s7198_s3 + $0xb8] sm:$0xff]   ;;  %p5618_p12 = pnand %p5617_p11, %p5792_p5  ;;  %p5624_p1 = scmp.lt.s32.totalorder %s5622_s14, %s5616_s16 }
  0x2a   : > { %4801 = vmatprep.subr.bf16.mxu0 %v5054_v15 }
  0x2b   : > { %p5619_p13 = pneg %p5618_p12  ;;  %p5625_p2 = por %p5624_p1, %p5623_p0 }
  0x2c   : > { %4838 = vmatpush3.bf16.msra.mxu1 %v5090_v48 }
  0x2d   : > { %4802 = vmatpush3.bf16.msra.mxu0 %v5055_v16  ;;  %4839 = vmatprep.subr.bf16.mxu1 %v5092_v52  ;;  %p5626_p3 = pnand %p5625_p2, %p5619_p13 }
  0x2e   : > { %4849 = vmatprep.subr.bf16.mxu0 %v5069_v26 }
  0x30   : > { %655 = vmatmul.mubr.bf16.vlgmr.msra.gmra.mrb[0].mxu0 %v5056_v17  ;;  %4840 = vmatpush3.bf16.msra.mxu1 %v5094_v54 }
  0x31   : > { %662 = vmatprep.mubr.bf16.mxu0 %v5059_v18  ;;  %4850 = vmatpush3.bf16.msra.mxu0 %v5071_v28 }
  0x32   : > { %4851 = vmatprep.subr.bf16.mxu0 %v5073_v30  ;;  %4841 = vmatprep.subr.bf16.mxu1 %v5096_v56 }
  0x34   : > { %4842 = vmatpush3.bf16.msra.mxu1 %v5098_v58 }
  0x35   : > { %4852 = vmatpush3.bf16.msra.mxu0 %v5075_v32  ;;  %4871 = vmatprep.subr.bf16.mxu1 %v5100_v60 }
  0x36   : > { %4853 = vmatprep.subr.bf16.mxu0 %v5077_v34 }
  0x38   : > { %663 = vmatmul.mubr.bf16.gmra.mrb[4].mxu0 %v5061_v19 }
  0x39   : > { %670 = vmatprep.mubr.bf16.mxu0 %v5062_v20  ;;  %4854 = vmatpush3.bf16.msra.mxu0 %v5079_v36 }
  0x3a   : > { %4855 = vmatprep.subr.bf16.mxu0 %v5081_v38 }
  0x3d   : > { %4856 = vmatpush3.bf16.msra.mxu0 %v5083_v40 }
  0x3e   : > { %4857 = vmatprep.subr.bf16.mxu0 %v5085_v43 }
  0x40   : > { %671 = vmatmul.mubr.bf16.gmra.mrb[8].mxu0 %v5064_v21 }
  0x41   : > { %678 = vmatprep.mubr.bf16.mxu0 %v5065_v22  ;;  %4858 = vmatpush3.bf16.msra.mxu0 %v5087_v45 }
  0x42   : > { %4859 = vmatprep.subr.bf16.mxu0 %v5089_v47 }
  0x45   : > { %4860 = vmatpush3.bf16.msra.mxu0 %v5091_v49 }
  0x46   : > { %4861 = vmatprep.subr.bf16.mxu0 %v5093_v53 }
  0x48   : > { %679 = vmatmul.mubr.bf16.gmra.mrb[12].mxu0 %v5067_v23 }
  0x49   : > { %4862 = vmatpush3.bf16.msra.mxu0 %v5095_v55 }
  0x4a   : > { %4863 = vmatprep.subr.bf16.mxu0 %v5097_v57 }
  0x4d   : > { %4864 = vmatpush3.bf16.msra.mxu0 %v5099_v59 }
  0x4e   : > { %4893 = vmatprep.subr.bf16.mxu0 %v5101_v61 }
 0x103   : > { %v4803_v62 = vpop.f32.mrb[0].mxu0 }
 0x104   : > { %v4804_v0 = vpop.f32.mrb[1].mxu0 }
 0x105   : > { %v4805_v1 = vadd.f32 %v4804_v0, %v4803_v62  ;;  %v4806_v2 = vpop.f32.mrb[2].mxu0 }
 0x106   : > { %v4807_v3 = vpop.f32.mrb[3].mxu0 }
 0x107   : > { %v657_v4 = vadd.f32 %v4805_v1, %v5998_v63  ;;  %v4808_v5 = vadd.f32 %v4807_v3, %v4806_v2 }
 0x109   : > { %v687_v6 = vmax.f32 %v657_v4, 0.0  ;;  %v660_v7 = vadd.f32 %v4808_v5, %v5998_v63 }
 0x10b   : > { %716 = vst [vmem:[#allocation2 + $0x9] ss:$8 sps:$4 sm:$0xff] %v687_v6   ;;  %v688_v8 = vmax.f32 %v660_v7, 0.0  ;;  %v4809_v9 = vpop.f32.mrb[4].mxu0 }
 0x10c   : > { %v4810_v10 = vpop.f32.mrb[5].mxu0 }
 0x10d   : > { %720 = vst [vmem:[#allocation2 + $0x19] ss:$8 sps:$4 sm:$0xff] %v688_v8   ;;  %v4811_v11 = vadd.f32 %v4810_v10, %v4809_v9  ;;  %v4812_v12 = vpop.f32.mrb[6].mxu0 }
 0x10e   : > { %v4813_v13 = vpop.f32.mrb[7].mxu0 }
 0x10f   : > { %v665_v14 = vadd.f32 %v4811_v11, %v5998_v63  ;;  %v4814_v15 = vadd.f32 %v4813_v13, %v4812_v12 }
 0x111   : > { %v689_v16 = vmax.f32 %v665_v14, 0.0  ;;  %v668_v17 = vadd.f32 %v4814_v15, %v5998_v63 }
 0x112   : > { %v805_v18 = vld [vmem:[#allocation2 + $0x9] sm:$0xf]  ;;  %v807_v19 = vld [vmem:[#allocation2 + $0x11] sm:$0xf] }
 0x113   : > { %806 = vst [vmem:[#allocation3 + $0x20] sm:$0xf] %v805_v18  ;;  %v809_v20 = vrot.slane %v807_v19, 4  ;;  %724 = vst [vmem:[#allocation2 + $0x31] ss:$8 sps:$4 sm:$0xff] %v689_v16   ;;  %v690_v21 = vmax.f32 %v668_v17, 0.0 }
 0x114   : > { %v4815_v22 = vpop.f32.mrb[8].mxu0  ;;  %v812_v23 = vld [vmem:[#allocation2 + $0x19] sm:$0xf]  ;;  %v814_v25 = vld [vmem:[#allocation2 + $0x21] sm:$0xf] }
 0x115   : > { %v4816_v26 = vpop.f32.mrb[9].mxu0  ;;  %811 = vst [vmem:[#allocation3 + $0x20] sm:$0xf0] %v809_v20  ;;  %813 = vst [vmem:[#allocation3 + $0x68] sm:$0xf] %v812_v23  ;;  %v816_v27 = vrot.slane %v814_v25, 4 }
 0x116   : > { %728 = vst [vmem:[#allocation2 + $0x41] ss:$8 sps:$4 sm:$0xff] %v690_v21   ;;  %v4817_v28 = vadd.f32 %v4816_v26, %v4815_v22  ;;  %v4818_v29 = vpop.f32.mrb[10].mxu0 }
 0x117   : > { %v4819_v30 = vpop.f32.mrb[11].mxu0  ;;  %818 = vst [vmem:[#allocation3 + $0x68] sm:$0xf0] %v816_v27 }
 0x118   : > { %v673_v31 = vadd.f32 %v4817_v28, %v5998_v63  ;;  %v4820_v32 = vadd.f32 %v4819_v30, %v4818_v29 }
 0x11a   : > { %v691_v33 = vmax.f32 %v673_v31, 0.0  ;;  %v676_v34 = vadd.f32 %v4820_v32, %v5998_v63  ;;  %v791_v35 = vld [vmem:[#allocation2 + $0x30] sm:$0xf]  ;;  %v793_v36 = vld [vmem:[#allocation2 + $0x38] sm:$0xf] }
 0x11b   : > { %v819_v37 = vld [vmem:[#allocation2 + $0x31] sm:$0xf]  ;;  %v795_v38 = vrot.slane %v793_v36, 4  ;;  %v821_v39 = vld [vmem:[#allocation2 + $0x39] sm:$0xf]  ;;  %v4821_v41 = vpop.f32.mrb[12].mxu0 }
 0x11c   : > { %792 = vst [vmem:[#allocation3 + $0x18] sm:$0xf] %v791_v35  ;;  %820 = vst [vmem:[#allocation3 + $0x28] sm:$0xf] %v819_v37  ;;  %v692_v40 = vmax.f32 %v676_v34, 0.0  ;;  %v823_v42 = vrot.slane %v821_v39, 4 }
 0x11d   : > { %732 = vst [vmem:[#allocation2 + $0x59] ss:$8 sps:$4 sm:$0xff] %v691_v33   ;;  %v798_v43 = vld [vmem:[#allocation2 + $0x40] sm:$0xf]  ;;  %v800_v44 = vld [vmem:[#allocation2 + $0x48] sm:$0xf] }
 0x11e   : > { %v4822_v45 = vpop.f32.mrb[13].mxu0  ;;  %797 = vst [vmem:[#allocation3 + $0x18] sm:$0xf0] %v795_v38  ;;  %v802_v46 = vrot.slane %v800_v44, 4  ;;  %v826_v47 = vld [vmem:[#allocation2 + $0x41] sm:$0xf] }
 0x11f   : > { %v828_v48 = vld [vmem:[#allocation2 + $0x49] sm:$0xf]  ;;  %799 = vst [vmem:[#allocation3 + $0x60] sm:$0xf] %v798_v43  ;;  %736 = vst [vmem:[#allocation2 + $0x69] ss:$8 sps:$4 sm:$0xff] %v692_v40   ;;  %v4823_v49 = vadd.f32 %v4822_v45, %v4821_v41 }
 0x120   : > { %v4824_v50 = vpop.f32.mrb[14].mxu0  ;;  %825 = vst [vmem:[#allocation3 + $0x28] sm:$0xf0] %v823_v42  ;;  %v830_v51 = vrot.slane %v828_v48, 4  ;;  %827 = vst [vmem:[#allocation3 + $0x70] sm:$0xf] %v826_v47 }
 0x121   : > { %v4825_v52 = vpop.f32.mrb[15].mxu0  ;;  %804 = vst [vmem:[#allocation3 + $0x60] sm:$0xf0] %v802_v46  ;;  %v681_v53 = vadd.f32 %v4823_v49, %v5998_v63  ;;  %v5102_v34 = vld [vmem:[%s7198_s3 + $0x100] sm:$0xff]   ;;  %v5104_v44 = vld [vmem:[%s7198_s3 + $0x148] sm:$0xff]  }
 0x122   : > { %v4826_v54 = vadd.f32 %v4825_v52, %v4824_v50  ;;  %832 = vst [vmem:[#allocation3 + $0x70] sm:$0xf0] %v830_v51  ;;  %v5103_v35 = vld [vmem:[%s7198_s3 + $0x180] sm:$0xff]   ;;  %v5105_v47 = vld [vmem:[%s7198_s3 + $0x1c8] sm:$0xff]   ;;  %v5108_v52 = vld [vmem:[%s7198_s3 + $0x150] sm:$0xff]  }
 0x123   : > { %v693_v55 = vmax.f32 %v681_v53, 0.0  ;;  %v5106_v50 = vld [vmem:[%s7198_s3 + $0x108] sm:$0xff]   ;;  %v5109_v53 = vld [vmem:[%s7198_s3 + $0x1d0] sm:$0xff]  }
 0x124   : > { %v684_v56 = vadd.f32 %v4826_v54, %v5998_v63  ;;  %v847_v57 = vld [vmem:[#allocation2 + $0x59] sm:$0xf]  ;;  %v849_v58 = vld [vmem:[#allocation2 + $0x61] sm:$0xf]  ;;  %v5107_v51 = vld [vmem:[%s7198_s3 + $0x188] sm:$0xff]  }
 0x125   : > { %v765_v59 = vld [vmem:[#allocation2 + $0x59] sm:$0xf]  ;;  %v851_v60 = vrot.slane %v849_v58, 4  ;;  %848 = vst [vmem:[#allocation3 + $0x38] sm:$0xf] %v847_v57  ;;  %v5110_v54 = vld [vmem:[%s7198_s3 + $0x110] sm:$0xff]  }
 0x126   : > { %740 = vst [vmem:[#allocation2 + $0x81] ss:$8 sps:$4 sm:$0xff] %v693_v55   ;;  %v694_v61 = vmax.f32 %v684_v56, 0.0  ;;  %v767_v62 = vrot.slane %v765_v59, 4  ;;  %v770_v0 = vld [vmem:[#allocation2 + $0x61] sm:$0xf] }
 0x127   : > { %v854_v1 = vld [vmem:[#allocation2 + $0x69] sm:$0xf]  ;;  %v856_v2 = vld [vmem:[#allocation2 + $0x71] sm:$0xf]  ;;  %771 = vst [vmem:[#allocation3 + $0x50] sm:$0xf] %v770_v0 }
 0x128   : > { %853 = vst [vmem:[#allocation3 + $0x38] sm:$0xf0] %v851_v60  ;;  %v858_v3 = vrot.slane %v856_v2, 4  ;;  %855 = vst [vmem:[#allocation3 + $0x80] sm:$0xf] %v854_v1  ;;  %v878_v5 = vld [vmem:[#allocation3 + $0x18] sm:$0xff] }
 0x129   : > { %744 = vst [vmem:[#allocation2 + $0x91] ss:$8 sps:$4 sm:$0xff] %v694_v61   ;;  %769 = vst [vmem:[#allocation3 + $0x8] sm:$0xf0] %v767_v62  ;;  %v772_v4 = vld [vmem:[#allocation2 + $0x69] sm:$0xf] }
 0x12a   : > { %v887_v63 = vld [vmem:[#allocation3 + $0x60] sm:$0xff]  ;;  %v774_v6 = vrot.slane %v772_v4, 4  ;;  %860 = vst [vmem:[#allocation3 + $0x80] sm:$0xf0] %v858_v3  ;;  %v889_v37 = vld [vmem:[#allocation3 + $0x70] sm:$0xff]  ;;  %v880_v45 = vld [vmem:[#allocation3 + $0x28] sm:$0xff] }
 0x12b   : > { %v896_v7 = vpack.c.bf16 %v887_v63, %v878_v5  ;;  %v898_v48 = vpack.c.bf16 %v889_v37, %v880_v45  ;;  %v5111_v55 = vld [vmem:[%s7198_s3 + $0x190] sm:$0xff]   ;;  %v5112_v56 = vld [vmem:[%s7198_s3 + $0x158] sm:$0xff]   ;;  %v5116_v60 = vld [vmem:[%s7198_s3 + $0x160] sm:$0xff]  }
 0x12c   : > { %776 = vst [vmem:[#allocation3 + $0x50] sm:$0xf0] %v774_v6  ;;  %v5113_v57 = vld [vmem:[%s7198_s3 + $0x1d8] sm:$0xff]   ;;  %v5117_v61 = vld [vmem:[%s7198_s3 + $0x1e0] sm:$0xff]   ;;  %v5120_v1 = vld [vmem:[%s7198_s3 + $0x168] sm:$0xff]  }
 0x12d   : > { %1558 = vmatprep.mubr.bf16.mxu0 %v896_v7  ;;  %v750_v8 = vld [vmem:[#allocation2 + $0x80] sm:$0xf]  ;;  %v755_v9 = vld [vmem:[#allocation2 + $0x88] sm:$0xf]  ;;  %v5114_v58 = vld [vmem:[%s7198_s3 + $0x118] sm:$0xff]  }
 0x12e   : > { %v779_v10 = vld [vmem:[#allocation2 + $0x81] sm:$0xf]  ;;  %v752_v11 = vrot.slane %v750_v8, 4  ;;  %v784_v13 = vld [vmem:[#allocation2 + $0x89] sm:$0xf]  ;;  %v5115_v59 = vld [vmem:[%s7198_s3 + $0x198] sm:$0xff]  }
 0x12f   : > { %v781_v12 = vrot.slane %v779_v10, 4  ;;  %v833_v14 = vld [vmem:[#allocation2 + $0x80] sm:$0xf]  ;;  %756 = vst [vmem:[#allocation3 + $0x48] sm:$0xf] %v755_v9  ;;  %v882_v46 = vld [vmem:[#allocation3 + $0x38] sm:$0xff] }
 0x130   : > { %785 = vst [vmem:[#allocation3 + $0x58] sm:$0xf] %v784_v13  ;;  %834 = vst [vmem:[#allocation3 + $0x30] sm:$0xf] %v833_v14  ;;  %v835_v15 = vld [vmem:[#allocation2 + $0x88] sm:$0xf] }
 0x131   : > { %v861_v16 = vld [vmem:[#allocation2 + $0x81] sm:$0xf]  ;;  %v863_v17 = vld [vmem:[#allocation2 + $0x89] sm:$0xf]  ;;  %783 = vst [vmem:[#allocation3 + $0x10] sm:$0xf0] %v781_v12 }
 0x132   : > { %v837_v18 = vrot.slane %v835_v15, 4  ;;  %862 = vst [vmem:[#allocation3 + $0x40] sm:$0xf] %v861_v16  ;;  %v865_v19 = vrot.slane %v863_v17, 4  ;;  %754 = vst [vmem:[#allocation3] sm:$0xf0] %v752_v11 }
 0x133   : > { %v757_v20 = vld [vmem:[#allocation2 + $0x90] sm:$0xf]  ;;  %v842_v26 = vld [vmem:[#allocation2 + $0x98] sm:$0xf]  ;;  %v876_v31 = vld [vmem:[#allocation3 + $0x8] sm:$0xff] }
 0x134   : > { %v786_v21 = vld [vmem:[#allocation2 + $0x91] sm:$0xf]  ;;  %v759_v22 = vrot.slane %v757_v20, 4  ;;  %839 = vst [vmem:[#allocation3 + $0x30] sm:$0xf0] %v837_v18  ;;  %v844_v27 = vrot.slane %v842_v26, 4 }
 0x135   : > { %v788_v23 = vrot.slane %v786_v21, 4  ;;  %v840_v25 = vld [vmem:[#allocation2 + $0x90] sm:$0xf]  ;;  %867 = vst [vmem:[#allocation3 + $0x40] sm:$0xf0] %v865_v19  ;;  %v891_v38 = vld [vmem:[#allocation3 + $0x80] sm:$0xff] }
 0x136   : > { %841 = vst [vmem:[#allocation3 + $0x78] sm:$0xf] %v840_v25  ;;  %v868_v28 = vld [vmem:[#allocation2 + $0x91] sm:$0xf]  ;;  %v870_v29 = vld [vmem:[#allocation2 + $0x99] sm:$0xf]  ;;  %v900_v49 = vpack.c.bf16 %v891_v38, %v882_v46 }
 0x137   : > { %790 = vst [vmem:[#allocation3 + $0x58] sm:$0xf0] %v788_v23  ;;  %869 = vst [vmem:[#allocation3 + $0x88] sm:$0xf] %v868_v28  ;;  %v872_v30 = vrot.slane %v870_v29, 4  ;;  %v885_v32 = vld [vmem:[#allocation3 + $0x50] sm:$0xff] }
 0x138   : > { %761 = vst [vmem:[#allocation3 + $0x48] sm:$0xf0] %v759_v22  ;;  %846 = vst [vmem:[#allocation3 + $0x78] sm:$0xf0] %v844_v27  ;;  %v894_v33 = vpack.c.bf16 %v885_v32, %v876_v31  ;;  %v877_v40 = vld [vmem:[#allocation3 + $0x10] sm:$0xff]  ;;  %v5118_v62 = vld [vmem:[%s7198_s3 + $0x120] sm:$0xff]  }
 0x139   : > { %874 = vst [vmem:[#allocation3 + $0x88] sm:$0xf0] %v872_v30  ;;  %v875_v36 = vld [vmem:[#allocation3] sm:$0xff]  ;;  %v5121_v2 = vld [vmem:[%s7198_s3 + $0x1e8] sm:$0xff]   ;;  %v5124_v5 = vld [vmem:[%s7198_s3 + $0x170] sm:$0xff]  }
 0x13a   : > { %1517 = vmatprep.mubr.bf16.mxu1 %v894_v33  ;;  %v5119_v0 = vld [vmem:[%s7198_s3 + $0x1a0] sm:$0xff]   ;;  %v5122_v3 = vld [vmem:[%s7198_s3 + $0x128] sm:$0xff]   ;;  %v5125_v63 = vld [vmem:[%s7198_s3 + $0x1f0] sm:$0xff]  }
 0x13b   : > { %v5123_v4 = vld [vmem:[%s7198_s3 + $0x1a8] sm:$0xff]   ;;  %v5126_v6 = vld [vmem:[%s7198_s3 + $0x130] sm:$0xff]   ;;  %v5128_v8 = vld [vmem:[%s7198_s3 + $0x178] sm:$0xff]  }
 0x13c   : > { %v5127_v7 = vld [vmem:[%s7198_s3 + $0x1b0] sm:$0xff]   ;;  %v5129_v9 = vld [vmem:[%s7198_s3 + $0x1f8] sm:$0xff]   ;;  %v888_v12 = vld [vmem:[#allocation3 + $0x68] sm:$0xff] }
 0x13d   : > { %v5130_v10 = vld [vmem:[%s7198_s3 + $0x138] sm:$0xff]   ;;  %v879_v14 = vld [vmem:[#allocation3 + $0x20] sm:$0xff]  ;;  %v881_v15 = vld [vmem:[#allocation3 + $0x30] sm:$0xff] }
 0x13e   : > { %v886_v41 = vld [vmem:[#allocation3 + $0x58] sm:$0xff]  ;;  %v5132_v16 = vld [vmem:[%s7198_s3 + $0x200] sm:$0xff]   ;;  %v897_v17 = vpack.c.bf16 %v888_v12, %v879_v14  ;;  %v5133_v19 = vld [vmem:[%s7198_s3 + $0x208] sm:$0xff]  }
 0x13f   : > { %v884_v39 = vld [vmem:[#allocation3 + $0x48] sm:$0xff]  ;;  %v895_v43 = vpack.c.bf16 %v886_v41, %v877_v40  ;;  %v5131_v11 = vld [vmem:[%s7198_s3 + $0x1b8] sm:$0xff]   ;;  %v5134_v20 = vld [vmem:[%s7198_s3 + $0x210] sm:$0xff]  }
 0x140   : > { %v893_v42 = vpack.c.bf16 %v884_v39, %v875_v36  ;;  %v890_v13 = vld [vmem:[#allocation3 + $0x78] sm:$0xff]  ;;  %v5136_v22 = vld [vmem:[%s7198_s3 + $0x220] sm:$0xff]   ;;  %v5137_v23 = vld [vmem:[%s7198_s3 + $0x228] sm:$0xff]  }
 0x141   : > { %1559 = vmatmul.mubr.bf16.vlgmr.msra.gmra.mrb[16].mxu0 %v895_v43  ;;  %v899_v18 = vpack.c.bf16 %v890_v13, %v881_v15  ;;  %v5135_v21 = vld [vmem:[%s7198_s3 + $0x218] sm:$0xff]   ;;  %v5138_v25 = vld [vmem:[%s7198_s3 + $0x230] sm:$0xff]   ;;  %v892_v27 = vld [vmem:[#allocation3 + $0x88] sm:$0xff] }
 0x142   : > { %1518 = vmatmul.mubr.bf16.vlgmr.msra.gmra.mrb[0].mxu1 %v893_v42  ;;  %4894 = vmatpush3.bf16.msra.mxu0 %v5103_v35  ;;  %v5139_v26 = vld [vmem:[%s7198_s3 + $0x238] sm:$0xff]   ;;  %v883_v28 = vld [vmem:[#allocation3 + $0x40] sm:$0xff] }
 0x143   : > { %4872 = vmatpush3.bf16.msra.mxu1 %v5102_v34  ;;  %1599 = vmatprep.mubr.bf16.mxu1 %v898_v48  ;;  %v901_v29 = vpack.c.bf16 %v892_v27, %v883_v28  ;;  %v5140_v30 = vld [vmem:[%s7200_s5] ss:$8 sps:$4 sm:$0xff]   ;;  %v5142_v31 = vld [vmem:[%s7200_s5 + $0x4] ss:$8 sps:$4 sm:$0xff]   ;;  %v5145_v32 = vld [vmem:[%s7200_s5 + $0x14] ss:$8 sps:$4 sm:$0xff]  }
 0x144   : > { %1640 = vmatprep.mubr.bf16.mxu0 %v900_v49  ;;  %4873 = vmatprep.subr.bf16.mxu1 %v5104_v44  ;;  %v5148_v33 = vld [vmem:[%s7200_s5 + $0x24] ss:$8 sps:$4 sm:$0xff]   ;;  %v5146_v34 = vld [vmem:[%s7200_s5 + $0x20] ss:$8 sps:$4 sm:$0xff]   ;;  %v5149_v35 = vld [vmem:[%s7200_s5 + $0x30] ss:$8 sps:$4 sm:$0xff]  }
 0x145   : > { %4895 = vmatprep.subr.bf16.mxu0 %v5105_v47  ;;  %v5151_v36 = vld [vmem:[%s7200_s5 + $0x34] ss:$8 sps:$4 sm:$0xff]   ;;  %v5154_v37 = vld [vmem:[%s7200_s5 + $0x44] ss:$8 sps:$4 sm:$0xff]   ;;  %v5152_v38 = vld [vmem:[%s7200_s5 + $0x40] ss:$8 sps:$4 sm:$0xff]  }
 0x146   : > { %4896 = vmatpush3.bf16.msra.mxu0 %v5107_v51  ;;  %v5157_v39 = vld [vmem:[%s7200_s5 + $0x54] ss:$8 sps:$4 sm:$0xff]   ;;  %v5155_v40 = vld [vmem:[%s7200_s5 + $0x50] ss:$8 sps:$4 sm:$0xff]   ;;  %v5160_v41 = vld [vmem:[%s7200_s5 + $0x64] ss:$8 sps:$4 sm:$0xff]  }
 0x147   : > { %4874 = vmatpush3.bf16.msra.mxu1 %v5106_v50  ;;  %4897 = vmatprep.subr.bf16.mxu0 %v5109_v53  ;;  %v5158_v42 = vld [vmem:[%s7200_s5 + $0x60] ss:$8 sps:$4 sm:$0xff]   ;;  %v5163_v43 = vld [vmem:[%s7200_s5 + $0x74] ss:$8 sps:$4 sm:$0xff]   ;;  %v5161_v44 = vld [vmem:[%s7200_s5 + $0x70] ss:$8 sps:$4 sm:$0xff]  }
 0x148   : > { %4875 = vmatprep.subr.bf16.mxu1 %v5108_v52  ;;  %v5166_v45 = vld [vmem:[%s7200_s5 + $0x84] ss:$8 sps:$4 sm:$0xff]   ;;  %v5164_v46 = vld [vmem:[%s7200_s5 + $0x80] ss:$8 sps:$4 sm:$0xff]   ;;  %v5169_v47 = vld [vmem:[%s7200_s5 + $0x94] ss:$8 sps:$4 sm:$0xff]  }
 0x149   : > { %v5167_v48 = vld [vmem:[%s7200_s5 + $0x90] ss:$8 sps:$4 sm:$0xff]   ;;  %v5172_v49 = vld [vmem:[%s7200_s5 + $0xa4] ss:$8 sps:$4 sm:$0xff]   ;;  %v5170_v50 = vld [vmem:[%s7200_s5 + $0xa0] ss:$8 sps:$4 sm:$0xff]  }
 0x14a   : > { %4898 = vmatpush3.bf16.msra.mxu0 %v5111_v55  ;;  %v5173_v51 = vld [vmem:[%s7200_s5 + $0xb0] ss:$8 sps:$4 sm:$0xff]   ;;  %v5175_v52 = vld [vmem:[%s7200_s5 + $0xb4] ss:$8 sps:$4 sm:$0xff]   ;;  %v5178_v53 = vld [vmem:[%s7200_s5 + $0xc4] ss:$8 sps:$4 sm:$0xff]  }
 0x14b   : > { %4876 = vmatpush3.bf16.msra.mxu1 %v5110_v54  ;;  %4899 = vmatprep.subr.bf16.mxu0 %v5113_v57  ;;  %v5176_v54 = vld [vmem:[%s7200_s5 + $0xc0] ss:$8 sps:$4 sm:$0xff]   ;;  %v1729_v55 = vld [vmem:[#allocation4 + $0x24] sm:$0x3]  ;;  %v5179_v57 = vld [vmem:[%s7200_s5 + $0xd0] ss:$8 sps:$4 sm:$0xff]  }
 0x14c   : > { %4877 = vmatprep.subr.bf16.mxu1 %v5112_v56  ;;  %v5181_v56 = vld [vmem:[%s7200_s5 + $0xd4] ss:$8 sps:$4 sm:$0xff]   ;;  %1730 = vst [vmem:[#allocation5] sm:$0x3] %v1729_v55 }
 0x14e   : > { %4900 = vmatpush3.bf16.msra.mxu0 %v5115_v59  ;;  %v1737_v59 = vld [vmem:[#allocation4 + $0x19] sm:$0x3] }
 0x14f   : > { %4878 = vmatpush3.bf16.msra.mxu1 %v5114_v58  ;;  %4901 = vmatprep.subr.bf16.mxu0 %v5117_v61  ;;  %v5184_v58 = vld [vmem:[%s7200_s5 + $0xe4] ss:$8 sps:$4 sm:$0xff]   ;;  %1738 = vst [vmem:[#allocation5 + $0x4] sm:$0x3] %v1737_v59  ;;  %v1744_v61 = vld [vmem:[#allocation4 + $0x25] sm:$0x3] }
 0x150   : > { %4879 = vmatprep.subr.bf16.mxu1 %v5116_v60  ;;  %v5182_v60 = vld [vmem:[%s7200_s5 + $0xe0] ss:$8 sps:$4 sm:$0xff]   ;;  %1745 = vst [vmem:[#allocation5 + $0x8] sm:$0x3] %v1744_v61 }
 0x152   : > { %4902 = vmatpush3.bf16.msra.mxu0 %v5119_v0  ;;  %v5185_v0 = vld [vmem:[%s7200_s5 + $0xf0] ss:$8 sps:$4 sm:$0xff]  }
 0x153   : > { %4880 = vmatpush3.bf16.msra.mxu1 %v5118_v62  ;;  %4903 = vmatprep.subr.bf16.mxu0 %v5121_v2  ;;  %v5187_v62 = vld [vmem:[%s7200_s5 + $0xf4] ss:$8 sps:$4 sm:$0xff]  }
 0x154   : > { %4881 = vmatprep.subr.bf16.mxu1 %v5120_v1  ;;  %v5191_v1 = vld [vmem:[%s7200_s5 + $0x104] ss:$8 sps:$4 sm:$0xff]  }
 0x156   : > { %4904 = vmatpush3.bf16.msra.mxu0 %v5123_v4  ;;  %v4390_v4 = vld [vmem:[%s7199_s4] ss:$0 sm:$0xff] }
 0x157   : > { %4882 = vmatpush3.bf16.msra.mxu1 %v5122_v3  ;;  %4905 = vmatprep.subr.bf16.mxu0 %v5125_v63 }
 0x158   : > { %4883 = vmatprep.subr.bf16.mxu1 %v5124_v5 }
 0x15a   : > { %4906 = vmatpush3.bf16.msra.mxu0 %v5127_v7 }
 0x15b   : > { %4884 = vmatpush3.bf16.msra.mxu1 %v5126_v6  ;;  %4907 = vmatprep.subr.bf16.mxu0 %v5129_v9 }
 0x15c   : > { %4885 = vmatprep.subr.bf16.mxu1 %v5128_v8 }
 0x15e   : > { %4908 = vmatpush3.bf16.msra.mxu0 %v5131_v11 }
 0x15f   : > { %4886 = vmatpush3.bf16.msra.mxu1 %v5130_v10  ;;  %2695 = vmatprep.subr.bf16.mxu0 %v5142_v31 }
 0x160   : > { %4946 = vmatprep.subr.bf16.mxu1 %v5680_v24 }
 0x161   : > { %1641 = vmatmul.mubr.bf16.vlgmr.msra.gmra.mrb[20].mxu0 %v899_v18 }
 0x162   : > { %1600 = vmatmul.mubr.bf16.vlgmr.msra.gmra.mrb[4].mxu1 %v897_v17  ;;  %2696 = vmatpush1.bf16.msra.mxu0 %v5140_v30 }
 0x163   : > { %4947 = vmatpush3.bf16.msra.mxu1 %v5132_v16  ;;  %4962 = vmatprep.mubr.msk.bf16.mxu1 %vm5681_vm0, %v5680_v24 }
 0x164   : > { %4948 = vmatprep.subr.bf16.mxu1 %v5680_v24  ;;  %2697 = vmatprep.subr.bf16.mxu0 %v5145_v32 }
 0x167   : > { %4949 = vmatpush3.bf16.msra.mxu1 %v5133_v19 }
 0x168   : > { %4950 = vmatprep.subr.bf16.mxu1 %v5680_v24 }
 0x16b   : > { %4951 = vmatpush3.bf16.msra.mxu1 %v5134_v20 }
 0x16c   : > { %4952 = vmatprep.subr.bf16.mxu1 %v5680_v24 }
 0x16f   : > { %4953 = vmatpush3.bf16.msra.mxu1 %v5135_v21 }
 0x170   : > { %4954 = vmatprep.subr.bf16.mxu1 %v5680_v24 }
 0x173   : > { %4955 = vmatpush3.bf16.msra.mxu1 %v5136_v22 }
 0x174   : > { %4956 = vmatprep.subr.bf16.mxu1 %v5680_v24 }
 0x177   : > { %4957 = vmatpush3.bf16.msra.mxu1 %v5137_v23 }
 0x178   : > { %4958 = vmatprep.subr.bf16.mxu1 %v5680_v24 }
 0x17b   : > { %4959 = vmatpush3.bf16.msra.mxu1 %v5138_v25 }
 0x17c   : > { %4960 = vmatprep.subr.bf16.mxu1 %v5680_v24  ;;  %v5143_v24 = vld [vmem:[%s7200_s5 + $0x10] ss:$8 sps:$4 sm:$0xff]  }
 0x17d   : > { %2698 = vmatpush1.bf16.msra.mxu0 %v5143_v24 }
 0x17e   : > { %2699 = vmatprep.subr.bf16.mxu0 %v5148_v33 }
 0x17f   : > { %4961 = vmatpush3.bf16.msra.mxu1 %v5139_v26 }
 0x181   : > { %2700 = vmatpush1.bf16.msra.mxu0 %v5146_v34 }
 0x182   : > { %4963 = vmatmul.mubr.bf16.vlgmr.msra.gmra.mrb[8].mxu1 %v901_v29  ;;  %2701 = vmatprep.subr.bf16.mxu0 %v5151_v36 }
 0x185   : > { %2702 = vmatpush1.bf16.msra.mxu0 %v5149_v35 }
 0x186   : > { %2703 = vmatprep.subr.bf16.mxu0 %v5154_v37 }
 0x189   : > { %2704 = vmatpush1.bf16.msra.mxu0 %v5152_v38 }
 0x18a   : > { %2705 = vmatprep.subr.bf16.mxu0 %v5157_v39 }
 0x18d   : > { %2706 = vmatpush1.bf16.msra.mxu0 %v5155_v40 }
 0x18e   : > { %2707 = vmatprep.subr.bf16.mxu0 %v5160_v41 }
 0x191   : > { %2708 = vmatpush1.bf16.msra.mxu0 %v5158_v42 }
 0x192   : > { %2709 = vmatprep.subr.bf16.mxu0 %v5163_v43 }
 0x195   : > { %2710 = vmatpush1.bf16.msra.mxu0 %v5161_v44 }
 0x196   : > { %2711 = vmatprep.subr.bf16.mxu0 %v5166_v45 }
 0x199   : > { %2712 = vmatpush1.bf16.msra.mxu0 %v5164_v46 }
 0x19a   : > { %2713 = vmatprep.subr.bf16.mxu0 %v5169_v47 }
 0x19d   : > { %2714 = vmatpush1.bf16.msra.mxu0 %v5167_v48 }
 0x19e   : > { %2715 = vmatprep.subr.bf16.mxu0 %v5172_v49 }
 0x1a1   : > { %2716 = vmatpush1.bf16.msra.mxu0 %v5170_v50 }
 0x1a2   : > { %2717 = vmatprep.subr.bf16.mxu0 %v5175_v52 }
 0x1a5   : > { %2718 = vmatpush1.bf16.msra.mxu0 %v5173_v51 }
 0x1a6   : > { %2719 = vmatprep.subr.bf16.mxu0 %v5178_v53 }
 0x1a9   : > { %2720 = vmatpush1.bf16.msra.mxu0 %v5176_v54 }
 0x1aa   : > { %2721 = vmatprep.subr.bf16.mxu0 %v5181_v56 }
 0x1ad   : > { %2722 = vmatpush1.bf16.msra.mxu0 %v5179_v57 }
 0x1ae   : > { %2723 = vmatprep.subr.bf16.mxu0 %v5184_v58 }
 0x1b1   : > { %2724 = vmatpush1.bf16.msra.mxu0 %v5182_v60 }
 0x1b2   : > { %2725 = vmatprep.subr.bf16.mxu0 %v5187_v62 }
 0x1b5   : > { %2726 = vmatpush1.bf16.msra.mxu0 %v5185_v0 }
 0x1b6   : > { %2736 = vmatprep.subr.bf16.mxu0 %v5191_v1 }
 0x214   : > { %v4865_v3 = vpop.f32.mrb[16].mxu0 }
 0x215   : > { %v4843_v2 = vpop.f32.mrb[0].mxu1  ;;  %v4866_v63 = vpop.f32.mrb[17].mxu0 }
 0x216   : > { %v4844_v5 = vpop.f32.mrb[1].mxu1  ;;  %v4867_v7 = vadd.f32 %v4866_v63, %v4865_v3  ;;  %v4868_v9 = vpop.f32.mrb[18].mxu0 }
 0x217   : > { %v4845_v6 = vadd.f32 %v4844_v5, %v4843_v2  ;;  %v4846_v8 = vpop.f32.mrb[2].mxu1  ;;  %v4869_v11 = vpop.f32.mrb[19].mxu0 }
 0x218   : > { %v4847_v10 = vpop.f32.mrb[3].mxu1  ;;  %v4870_v14 = vadd.f32 %v4869_v11, %v4868_v9  ;;  %v5195_v9 = vld [vmem:[%s7200_s5 + $0x114] ss:$8 sps:$4 sm:$0xff]   ;;  %v5193_v11 = vld [vmem:[%s7200_s5 + $0x110] ss:$8 sps:$4 sm:$0xff]  }
 0x219   : > { %v1520_v12 = vadd.f32 %v4845_v6, %v4390_v4  ;;  %v4848_v13 = vadd.f32 %v4847_v10, %v4846_v8  ;;  %v5189_v6 = vld [vmem:[%s7200_s5 + $0x100] ss:$8 sps:$4 sm:$0xff]  }
 0x21b   : > { %v1561_v15 = vadd.f32 %v4867_v7, %v1520_v12  ;;  %v1523_v16 = vadd.f32 %v4848_v13, %v4390_v4  ;;  %v5198_v12 = vld [vmem:[%s7200_s5 + $0x124] ss:$8 sps:$4 sm:$0xff]   ;;  %v5196_v13 = vld [vmem:[%s7200_s5 + $0x120] ss:$8 sps:$4 sm:$0xff]  }
 0x21d   : > { %v1564_v17 = vadd.f32 %v4870_v14, %v1523_v16  ;;  %v5201_v14 = vld [vmem:[%s7200_s5 + $0x134] ss:$8 sps:$4 sm:$0xff]   ;;  %v5204_v16 = vld [vmem:[%s7200_s5 + $0x144] ss:$8 sps:$4 sm:$0xff]  }
 0x234   : > { %v4909_v19 = vpop.f32.mrb[20].mxu0 }
 0x235   : > { %v4887_v18 = vpop.f32.mrb[4].mxu1  ;;  %v4910_v21 = vpop.f32.mrb[21].mxu0 }
 0x236   : > { %v4888_v20 = vpop.f32.mrb[5].mxu1  ;;  %v4911_v23 = vadd.f32 %v4910_v21, %v4909_v19  ;;  %v4912_v26 = vpop.f32.mrb[22].mxu0  ;;  %v5205_v19 = vld [vmem:[%s7200_s5 + $0x150] ss:$8 sps:$4 sm:$0xff]   ;;  %v5208_v21 = vld [vmem:[%s7200_s5 + $0x160] ss:$8 sps:$4 sm:$0xff]  }
 0x237   : > { %v4889_v22 = vadd.f32 %v4888_v20, %v4887_v18  ;;  %v4890_v25 = vpop.f32.mrb[6].mxu1  ;;  %v4913_v28 = vpop.f32.mrb[23].mxu0  ;;  %v5207_v18 = vld [vmem:[%s7200_s5 + $0x154] ss:$8 sps:$4 sm:$0xff]   ;;  %v5210_v20 = vld [vmem:[%s7200_s5 + $0x164] ss:$8 sps:$4 sm:$0xff]  }
 0x238   : > { %v4891_v27 = vpop.f32.mrb[7].mxu1  ;;  %v4914_v31 = vadd.f32 %v4913_v28, %v4912_v26  ;;  %v5214_v26 = vld [vmem:[%s7200_s5 + $0x180] ss:$8 sps:$4 sm:$0xff]   ;;  %v5217_v28 = vld [vmem:[%s7200_s5 + $0x190] ss:$8 sps:$4 sm:$0xff]  }
 0x239   : > { %v1602_v29 = vadd.f32 %v4889_v22, %v1561_v15  ;;  %v4892_v30 = vadd.f32 %v4891_v27, %v4890_v25  ;;  %v5199_v15 = vld [vmem:[%s7200_s5 + $0x130] ss:$8 sps:$4 sm:$0xff]   ;;  %v5213_v22 = vld [vmem:[%s7200_s5 + $0x174] ss:$8 sps:$4 sm:$0xff]   ;;  %v5216_v25 = vld [vmem:[%s7200_s5 + $0x184] ss:$8 sps:$4 sm:$0xff]  }
 0x23a   : > { %v5219_v27 = vld [vmem:[%s7200_s5 + $0x194] ss:$8 sps:$4 sm:$0xff]  }
 0x23b   : > { %v1605_v32 = vadd.f32 %v4892_v30, %v1564_v17  ;;  %v1643_v24 = vadd.f32 %v4911_v23, %v1602_v29  ;;  %v5202_v17 = vld [vmem:[%s7200_s5 + $0x140] ss:$8 sps:$4 sm:$0xff]   ;;  %v5211_v23 = vld [vmem:[%s7200_s5 + $0x170] ss:$8 sps:$4 sm:$0xff]   ;;  %v5222_v29 = vld [vmem:[%s7200_s5 + $0x1a4] ss:$8 sps:$4 sm:$0xff]  }
 0x23c   : > { %v5220_v30 = vld [vmem:[%s7200_s5 + $0x1a0] ss:$8 sps:$4 sm:$0xff]  }
 0x23d   : > { %v1646_v33 = vadd.f32 %v4914_v31, %v1605_v32  ;;  %v5225_v31 = vld [vmem:[%s7200_s5 + $0x1b4] ss:$8 sps:$4 sm:$0xff]   ;;  %v5223_v32 = vld [vmem:[%s7200_s5 + $0x1b0] ss:$8 sps:$4 sm:$0xff]  }
 0x255   : > { %v1683_v34 = vpop.f32.mrb[8].mxu1 }
 0x256   : > { %v1684_v35 = vadd.f32 %v1683_v34, %v1643_v24  ;;  %v4964_v36 = vpop.f32.mrb[9].mxu1  ;;  %v5228_v24 = vld [vmem:[%s7200_s5 + $0x1c4] ss:$8 sps:$4 sm:$0xff]   ;;  %v5231_v34 = vld [vmem:[%s7200_s5 + $0x1d4] ss:$8 sps:$4 sm:$0xff]  }
 0x257   : > { %v1686_v37 = vpop.f32.mrb[10].mxu1  ;;  %v5234_v36 = vld [vmem:[%s7200_s5 + $0x1e4] ss:$8 sps:$4 sm:$0xff]  }
 0x258   : > { %v1690_v38 = vmax.f32 %v1684_v35, 0.0  ;;  %v1687_v39 = vadd.f32 %v1686_v37, %v1646_v33  ;;  %v4965_v40 = vpop.f32.mrb[11].mxu1  ;;  %v5226_v33 = vld [vmem:[%s7200_s5 + $0x1c0] ss:$8 sps:$4 sm:$0xff]   ;;  %v5229_v35 = vld [vmem:[%s7200_s5 + $0x1d0] ss:$8 sps:$4 sm:$0xff]  }
 0x259   : > { %v5232_v37 = vld [vmem:[%s7200_s5 + $0x1e0] ss:$8 sps:$4 sm:$0xff]   ;;  %v5235_v40 = vld [vmem:[%s7200_s5 + $0x1f0] ss:$8 sps:$4 sm:$0xff]  }
 0x25a   : > { %1705 = vst [vmem:[#allocation4 + $0x5] ss:$24 sps:$4 sm:$0x11] %v1690_v38   ;;  %1707 = vst [vmem:[#allocation4 + $0x10] ss:$24 sps:$4 sm:$0x22] %v1690_v38  }
 0x25b   : > { %1708 = vst [vmem:[#allocation4 + $0x4] ss:$24 sps:$4 sm:$0x44] %v1690_v38   ;;  %1709 = vst [vmem:[#allocation4 + $0xf] ss:$24 sps:$4 sm:$0x88] %v1690_v38  }
 0x25c   : > { %v1691_v41 = vmax.f32 %v1687_v39, 0.0  ;;  %v5237_v38 = vld [vmem:[%s7200_s5 + $0x1f4] ss:$8 sps:$4 sm:$0xff]  }
 0x25e   : > { %1717 = vst [vmem:[#allocation4 + $0x9] ss:$24 sps:$4 sm:$0x11] %v1691_v41   ;;  %1719 = vst [vmem:[#allocation4 + $0x14] ss:$24 sps:$4 sm:$0x22] %v1691_v41  }
 0x25f   : > { %1720 = vst [vmem:[#allocation4 + $0x8] ss:$24 sps:$4 sm:$0x44] %v1691_v41   ;;  %1721 = vst [vmem:[#allocation4 + $0x13] ss:$24 sps:$4 sm:$0x88] %v1691_v41  }
 0x260   : > { %v5240_v41 = vld [vmem:[%s7200_s5 + $0x204] ss:$8 sps:$4 sm:$0xff]  }
 0x261   : > { %v1731_v42 = vld [vmem:[#allocation4 + $0x28] sm:$0x3]  ;;  %v1751_v48 = vld [vmem:[#allocation4 + $0x10] sm:$0x3] }
 0x262   : > { %v1739_v43 = vld [vmem:[#allocation4 + $0x1d] sm:$0x3]  ;;  %v1746_v44 = vld [vmem:[#allocation4 + $0x29] sm:$0x3]  ;;  %v1733_v45 = vrot.slane %v1731_v42, 6 }
 0x263   : > { %v1741_v46 = vrot.slane %v1739_v43, 6  ;;  %v1748_v47 = vrot.slane %v1746_v44, 6  ;;  %1752 = vst [vmem:[#allocation5 + $0xc] sm:$0x3] %v1751_v48  ;;  %v1758_v50 = vld [vmem:[#allocation4 + $0x5] sm:$0x3] }
 0x264   : > { %1735 = vst [vmem:[#allocation5] sm:$0xc] %v1733_v45  ;;  %1759 = vst [vmem:[#allocation5 + $0x10] sm:$0x3] %v1758_v50  ;;  %v1765_v54 = vld [vmem:[#allocation4 + $0x11] sm:$0x3] }
 0x265   : > { %v1753_v49 = vld [vmem:[#allocation4 + $0x14] sm:$0x3]  ;;  %1743 = vst [vmem:[#allocation5 + $0x4] sm:$0xc] %v1741_v46  ;;  %1750 = vst [vmem:[#allocation5 + $0x8] sm:$0xc] %v1748_v47 }
 0x266   : > { %v1760_v51 = vld [vmem:[#allocation4 + $0x9] sm:$0x3]  ;;  %v1755_v52 = vrot.slane %v1753_v49, 6  ;;  %v1767_v55 = vld [vmem:[#allocation4 + $0x15] sm:$0x3] }
 0x267   : > { %v1762_v53 = vrot.slane %v1760_v51, 6  ;;  %1766 = vst [vmem:[#allocation5 + $0x14] sm:$0x3] %v1765_v54  ;;  %v1769_v56 = vrot.slane %v1767_v55, 6  ;;  %v1772_v57 = vld [vmem:[#allocation4 + $0x28] sm:$0x3] }
 0x268   : > { %1757 = vst [vmem:[#allocation5 + $0xc] sm:$0xc] %v1755_v52  ;;  %1773 = vst [vmem:[#allocation5 + $0x18] sm:$0x3] %v1772_v57  ;;  %v1774_v58 = vld [vmem:[#allocation4 + $0x2c] sm:$0x3] }
 0x269   : > { %1764 = vst [vmem:[#allocation5 + $0x10] sm:$0xc] %v1762_v53  ;;  %1771 = vst [vmem:[#allocation5 + $0x14] sm:$0xc] %v1769_v56  ;;  %v1779_v59 = vld [vmem:[#allocation4 + $0x1d] sm:$0x3] }
 0x26a   : > { %v1781_v60 = vld [vmem:[#allocation4 + $0x21] sm:$0x3]  ;;  %v1776_v61 = vrot.slane %v1774_v58, 6  ;;  %1780 = vst [vmem:[#allocation5 + $0x1c] sm:$0x3] %v1779_v59 }
 0x26b   : > { %v1783_v62 = vrot.slane %v1781_v60, 6  ;;  %v1786_v0 = vld [vmem:[#allocation4 + $0x29] sm:$0x3]  ;;  %v1788_v1 = vld [vmem:[#allocation4 + $0x2d] sm:$0x3] }
 0x26c   : > { %1787 = vst [vmem:[#allocation5 + $0x20] sm:$0x3] %v1786_v0  ;;  %v1790_v2 = vrot.slane %v1788_v1, 6  ;;  %1778 = vst [vmem:[#allocation5 + $0x18] sm:$0xc] %v1776_v61  ;;  %v1793_v3 = vld [vmem:[#allocation5] sm:$0xff] }
 0x26d   : > { %1785 = vst [vmem:[#allocation5 + $0x1c] sm:$0xc] %v1783_v62  ;;  %v1802_v4 = vcombine.high %v1793_v3, %v1793_v3  ;;  %v1810_v8 = vpack.c.bf16 %v1793_v3, %v1793_v3  ;;  %v5238_v43 = vld [vmem:[%s7200_s5 + $0x200] ss:$8 sps:$4 sm:$0xff]   ;;  %v5244_v45 = vld [vmem:[%s7200_s5 + $0x214] ss:$8 sps:$4 sm:$0xff]  }
 0x26e   : > { %1792 = vst [vmem:[#allocation5 + $0x20] sm:$0xc] %v1790_v2  ;;  %v5242_v47 = vld [vmem:[%s7200_s5 + $0x210] ss:$8 sps:$4 sm:$0xff]   ;;  %v5247_v48 = vld [vmem:[%s7200_s5 + $0x224] ss:$8 sps:$4 sm:$0xff]  }
 0x26f   : > { %v6233_v5 = vld [vmem:[#allocation5 + $0x8] sm:$0xff]  ;;  %v1811_v63 = vpack.c.bf16 %v1802_v4, %v1802_v4  ;;  %v5250_v50 = vld [vmem:[%s7200_s5 + $0x234] ss:$8 sps:$4 sm:$0xff]   ;;  %v5248_v51 = vld [vmem:[%s7200_s5 + $0x230] ss:$8 sps:$4 sm:$0xff]  }
 0x270   : > { %v1803_v7 = vcombine.high %v6233_v5, %v6233_v5  ;;  %v6327_v39 = vld [vmem:[#allocation5 + $0x10] sm:$0xff]  ;;  %v1812_v44 = vpack.c.bf16 %v6233_v5, %v6233_v5  ;;  %v5245_v49 = vld [vmem:[%s7200_s5 + $0x220] ss:$8 sps:$4 sm:$0xff]   ;;  %v5253_v52 = vld [vmem:[%s7200_s5 + $0x244] ss:$8 sps:$4 sm:$0xff]  }
 0x271   : > { %2727 = vmatprep.mubr.bf16.mxu0 %v1811_v63  ;;  %v1804_v42 = vcombine.high %v6327_v39, %v6327_v39  ;;  %v5251_v53 = vld [vmem:[%s7200_s5 + $0x240] ss:$8 sps:$4 sm:$0xff]   ;;  %v5256_v54 = vld [vmem:[%s7200_s5 + $0x254] ss:$8 sps:$4 sm:$0xff]   ;;  %v5254_v55 = vld [vmem:[%s7200_s5 + $0x250] ss:$8 sps:$4 sm:$0xff]  }
 0x272   : > { %v1813_v10 = vpack.c.bf16 %v1803_v7, %v1803_v7  ;;  %2728 = vmatmul.mubr.bf16.vlgmr.msra.gmra.mrb[24].mxu0 %v1810_v8  ;;  %v5259_v56 = vld [vmem:[%s7200_s5 + $0x264] ss:$8 sps:$4 sm:$0xff]   ;;  %v5257_v57 = vld [vmem:[%s7200_s5 + $0x260] ss:$8 sps:$4 sm:$0xff]   ;;  %v5262_v58 = vld [vmem:[%s7200_s5 + $0x274] ss:$8 sps:$4 sm:$0xff]  }
 0x273   : > { %2737 = vmatpush1.bf16.msra.mxu0 %v5189_v6  ;;  %v1815_v46 = vpack.c.bf16 %v1804_v42, %v1804_v42  ;;  %v5260_v59 = vld [vmem:[%s7200_s5 + $0x270] ss:$8 sps:$4 sm:$0xff]   ;;  %v5265_v60 = vld [vmem:[%s7200_s5 + $0x284] ss:$8 sps:$4 sm:$0xff]   ;;  %v5263_v61 = vld [vmem:[%s7200_s5 + $0x280] ss:$8 sps:$4 sm:$0xff]  }
 0x274   : > { %2768 = vmatprep.mubr.bf16.mxu0 %v1813_v10  ;;  %2738 = vmatprep.subr.bf16.mxu0 %v5195_v9  ;;  %v5268_v62 = vld [vmem:[%s7200_s5 + $0x294] ss:$8 sps:$4 sm:$0xff]   ;;  %v5360_v0 = vld [vmem:[%s7202_s7] ss:$8 sps:$4 sm:$0xff]   ;;  %v5362_v1 = vld [vmem:[%s7202_s7 + $0x4] ss:$8 sps:$4 sm:$0xff]  }
 0x275   : > { %v5266_v2 = vld [vmem:[%s7200_s5 + $0x290] ss:$8 sps:$4 sm:$0xff]   ;;  %v5365_v3 = vld [vmem:[%s7202_s7 + $0x14] ss:$8 sps:$4 sm:$0xff]   ;;  %v5271_v4 = vld [vmem:[%s7200_s5 + $0x2a4] ss:$8 sps:$4 sm:$0xff]   ;;  %3704 = vmatprep.subr.bf16.mxu1 %v5362_v1 }
 0x276   : > { %3705 = vmatpush1.bf16.msra.mxu1 %v5360_v0  ;;  %v5363_v5 = vld [vmem:[%s7202_s7 + $0x10] ss:$8 sps:$4 sm:$0xff]   ;;  %v5368_v63 = vld [vmem:[%s7202_s7 + $0x24] ss:$8 sps:$4 sm:$0xff]   ;;  %v5269_v6 = vld [vmem:[%s7200_s5 + $0x2a0] ss:$8 sps:$4 sm:$0xff]  }
 0x277   : > { %2739 = vmatpush1.bf16.msra.mxu0 %v5193_v11  ;;  %3706 = vmatprep.subr.bf16.mxu1 %v5365_v3  ;;  %v5274_v7 = vld [vmem:[%s7200_s5 + $0x2b4] ss:$8 sps:$4 sm:$0xff]   ;;  %v5366_v8 = vld [vmem:[%s7202_s7 + $0x20] ss:$8 sps:$4 sm:$0xff]   ;;  %v5272_v10 = vld [vmem:[%s7200_s5 + $0x2b0] ss:$8 sps:$4 sm:$0xff]  }
 0x278   : > { %2740 = vmatprep.subr.bf16.mxu0 %v5198_v12  ;;  %v5371_v9 = vld [vmem:[%s7202_s7 + $0x34] ss:$8 sps:$4 sm:$0xff]   ;;  %v5277_v11 = vld [vmem:[%s7200_s5 + $0x2c4] ss:$8 sps:$4 sm:$0xff]   ;;  %v5369_v12 = vld [vmem:[%s7202_s7 + $0x30] ss:$8 sps:$4 sm:$0xff]  }
 0x279   : > { %v5294_v42 = vld [vmem:[%s7200_s5 + $0x320] ss:$8 sps:$4 sm:$0xff]   ;;  %v5315_v0 = vld [vmem:[%s7200_s5 + $0x390] ss:$8 sps:$4 sm:$0xff]   ;;  %v5320_v1 = vld [vmem:[%s7200_s5 + $0x3a4] ss:$8 sps:$4 sm:$0xff]  }
 0x27a   : > { %3707 = vmatpush1.bf16.msra.mxu1 %v5363_v5  ;;  %v5323_v3 = vld [vmem:[%s7200_s5 + $0x3b4] ss:$8 sps:$4 sm:$0xff]   ;;  %v5326_v5 = vld [vmem:[%s7200_s5 + $0x3c4] ss:$8 sps:$4 sm:$0xff]  }
 0x27b   : > { %2741 = vmatpush1.bf16.msra.mxu0 %v5196_v13  ;;  %3708 = vmatprep.subr.bf16.mxu1 %v5368_v63  ;;  %v5374_v13 = vld [vmem:[%s7202_s7 + $0x44] ss:$8 sps:$4 sm:$0xff]   ;;  %v5324_v63 = vld [vmem:[%s7200_s5 + $0x3c0] ss:$8 sps:$4 sm:$0xff]  }
 0x27c   : > { %2742 = vmatprep.subr.bf16.mxu0 %v5201_v14  ;;  %v5275_v14 = vld [vmem:[%s7200_s5 + $0x2c0] ss:$8 sps:$4 sm:$0xff]  }
 0x27e   : > { %3709 = vmatpush1.bf16.msra.mxu1 %v5366_v8  ;;  %v5332_v8 = vld [vmem:[%s7200_s5 + $0x3e4] ss:$8 sps:$4 sm:$0xff]  }
 0x27f   : > { %2743 = vmatpush1.bf16.msra.mxu0 %v5199_v15  ;;  %3710 = vmatprep.subr.bf16.mxu1 %v5371_v9  ;;  %v5280_v15 = vld [vmem:[%s7200_s5 + $0x2d4] ss:$8 sps:$4 sm:$0xff]   ;;  %v5330_v9 = vld [vmem:[%s7200_s5 + $0x3e0] ss:$8 sps:$4 sm:$0xff]  }
 0x280   : > { %2744 = vmatprep.subr.bf16.mxu0 %v5204_v16  ;;  %v5372_v16 = vld [vmem:[%s7202_s7 + $0x40] ss:$8 sps:$4 sm:$0xff]  }
 0x282   : > { %3711 = vmatpush1.bf16.msra.mxu1 %v5369_v12  ;;  %v5338_v12 = vld [vmem:[%s7200_s5 + $0x404] ss:$8 sps:$4 sm:$0xff]  }
 0x283   : > { %2745 = vmatpush1.bf16.msra.mxu0 %v5202_v17  ;;  %3712 = vmatprep.subr.bf16.mxu1 %v5374_v13  ;;  %v5377_v17 = vld [vmem:[%s7202_s7 + $0x54] ss:$8 sps:$4 sm:$0xff]   ;;  %v5336_v13 = vld [vmem:[%s7200_s5 + $0x400] ss:$8 sps:$4 sm:$0xff]  }
 0x284   : > { %2746 = vmatprep.subr.bf16.mxu0 %v5207_v18  ;;  %v5278_v18 = vld [vmem:[%s7200_s5 + $0x2d0] ss:$8 sps:$4 sm:$0xff]  }
 0x286   : > { %3713 = vmatpush1.bf16.msra.mxu1 %v5372_v16  ;;  %v5339_v16 = vld [vmem:[%s7200_s5 + $0x410] ss:$8 sps:$4 sm:$0xff]  }
 0x287   : > { %2747 = vmatpush1.bf16.msra.mxu0 %v5205_v19  ;;  %v5283_v19 = vld [vmem:[%s7200_s5 + $0x2e4] ss:$8 sps:$4 sm:$0xff]   ;;  %3714 = vmatprep.subr.bf16.mxu1 %v5377_v17  ;;  %v5682_v17 = vmov 0  }
 0x288   : > { %2748 = vmatprep.subr.bf16.mxu0 %v5210_v20  ;;  %v5375_v20 = vld [vmem:[%s7202_s7 + $0x50] ss:$8 sps:$4 sm:$0xff]  }
 0x28a   : > { %3715 = vmatpush1.bf16.msra.mxu1 %v5375_v20  ;;  %v5347_v20 = vld [vmem:[%s7200_s5 + $0x434] ss:$8 sps:$4 sm:$0xff]  }
 0x28b   : > { %2749 = vmatpush1.bf16.msra.mxu0 %v5208_v21  ;;  %v5380_v21 = vld [vmem:[%s7202_s7 + $0x64] ss:$8 sps:$4 sm:$0xff]  }
 0x28c   : > { %2750 = vmatprep.subr.bf16.mxu0 %v5213_v22  ;;  %v5281_v22 = vld [vmem:[%s7200_s5 + $0x2e0] ss:$8 sps:$4 sm:$0xff]   ;;  %3716 = vmatprep.subr.bf16.mxu1 %v5380_v21  ;;  %v5345_v21 = vld [vmem:[%s7200_s5 + $0x430] ss:$8 sps:$4 sm:$0xff]  }
 0x28f   : > { %2751 = vmatpush1.bf16.msra.mxu0 %v5211_v23  ;;  %v5286_v23 = vld [vmem:[%s7200_s5 + $0x2f4] ss:$8 sps:$4 sm:$0xff]  }
 0x290   : > { %2752 = vmatprep.subr.bf16.mxu0 %v5216_v25  ;;  %v5378_v25 = vld [vmem:[%s7202_s7 + $0x60] ss:$8 sps:$4 sm:$0xff]  }
 0x291   : > { %3717 = vmatpush1.bf16.msra.mxu1 %v5378_v25  ;;  %v5353_v25 = vld [vmem:[%s7200_s5 + $0x454] ss:$8 sps:$4 sm:$0xff]  }
 0x293   : > { %2753 = vmatpush1.bf16.msra.mxu0 %v5214_v26  ;;  %v6471_v26 = vld [vmem:[#allocation5 + $0x18] sm:$0xff] }
 0x294   : > { %2754 = vmatprep.subr.bf16.mxu0 %v5219_v27  ;;  %v5383_v27 = vld [vmem:[%s7202_s7 + $0x74] ss:$8 sps:$4 sm:$0xff]  }
 0x295   : > { %3718 = vmatprep.subr.bf16.mxu1 %v5383_v27  ;;  %v5356_v27 = vld [vmem:[%s7200_s5 + $0x464] ss:$8 sps:$4 sm:$0xff]  }
 0x297   : > { %2755 = vmatpush1.bf16.msra.mxu0 %v5217_v28  ;;  %v5284_v28 = vld [vmem:[%s7200_s5 + $0x2f0] ss:$8 sps:$4 sm:$0xff]  }
 0x298   : > { %2756 = vmatprep.subr.bf16.mxu0 %v5222_v29  ;;  %v5289_v29 = vld [vmem:[%s7200_s5 + $0x304] ss:$8 sps:$4 sm:$0xff]  }
 0x29b   : > { %2757 = vmatpush1.bf16.msra.mxu0 %v5220_v30  ;;  %v1805_v30 = vcombine.high %v6471_v26, %v6471_v26 }
 0x29c   : > { %2758 = vmatprep.subr.bf16.mxu0 %v5225_v31  ;;  %v5381_v31 = vld [vmem:[%s7202_s7 + $0x70] ss:$8 sps:$4 sm:$0xff]  }
 0x29d   : > { %3719 = vmatpush1.bf16.msra.mxu1 %v5381_v31  ;;  %v1797_v31 = vld [vmem:[#allocation5 + $0x20] sm:$0xf] }
 0x29f   : > { %2759 = vmatpush1.bf16.msra.mxu0 %v5223_v32  ;;  %v5386_v32 = vld [vmem:[%s7202_s7 + $0x84] ss:$8 sps:$4 sm:$0xff]  }
 0x2a0   : > { %2760 = vmatprep.subr.bf16.mxu0 %v5228_v24  ;;  %v5287_v24 = vld [vmem:[%s7200_s5 + $0x300] ss:$8 sps:$4 sm:$0xff]   ;;  %3720 = vmatprep.subr.bf16.mxu1 %v5386_v32  ;;  %v1818_v32 = vpack.c.bf16 %v1797_v31, %v1797_v31  ;;  %v5459_v31 = vld [vmem:[%s7202_s7 + $0x210] ss:$8 sps:$4 sm:$0xff]  }
 0x2a3   : > { %2761 = vmatpush1.bf16.msra.mxu0 %v5226_v33  ;;  %v1814_v33 = vpack.c.bf16 %v6327_v39, %v6327_v39  ;;  %v5296_v39 = vld [vmem:[%s7200_s5 + $0x324] ss:$8 sps:$4 sm:$0xff]  }
 0x2a4   : > { %2762 = vmatprep.subr.bf16.mxu0 %v5231_v34  ;;  %v5293_v34 = vld [vmem:[%s7200_s5 + $0x314] ss:$8 sps:$4 sm:$0xff]  }
 0x2a7   : > { %2763 = vmatpush1.bf16.msra.mxu0 %v5229_v35  ;;  %v1817_v35 = vpack.c.bf16 %v1805_v30, %v1805_v30  ;;  %v5357_v30 = vld [vmem:[%s7200_s5 + $0x470] ss:$8 sps:$4 sm:$0xff]  }
 0x2a8   : > { %2764 = vmatprep.subr.bf16.mxu0 %v5234_v36  ;;  %v5384_v36 = vld [vmem:[%s7202_s7 + $0x80] ss:$8 sps:$4 sm:$0xff]  }
 0x2a9   : > { %3721 = vmatpush1.bf16.msra.mxu1 %v5384_v36  ;;  %v5410_v36 = vld [vmem:[%s7202_s7 + $0x104] ss:$8 sps:$4 sm:$0xff]  }
 0x2ab   : > { %2765 = vmatpush1.bf16.msra.mxu0 %v5232_v37  ;;  %v5389_v37 = vld [vmem:[%s7202_s7 + $0x94] ss:$8 sps:$4 sm:$0xff]  }
 0x2ac   : > { %2766 = vmatprep.subr.bf16.mxu0 %v5237_v38  ;;  %v5291_v38 = vld [vmem:[%s7200_s5 + $0x310] ss:$8 sps:$4 sm:$0xff]   ;;  %3722 = vmatprep.subr.bf16.mxu1 %v5389_v37  ;;  %v1965_v37 = vlaneseq }
 0x2af   : > { %2767 = vmatpush1.bf16.msra.mxu0 %v5235_v40  ;;  %v5387_v40 = vld [vmem:[%s7202_s7 + $0x90] ss:$8 sps:$4 sm:$0xff]  }
 0x2b0   : > { %2777 = vmatprep.subr.bf16.mxu0 %v5240_v41  ;;  %v5392_v41 = vld [vmem:[%s7202_s7 + $0xa4] ss:$8 sps:$4 sm:$0xff]   ;;  %3723 = vmatpush1.bf16.msra.mxu1 %v5387_v40  ;;  %v1963_v40 = vld [vmem:[%s7201_s6] sm:$0x3] }
 0x2b1   : > { %3724 = vmatprep.subr.bf16.mxu1 %v5392_v41 }
 0x2b2   : > { %2769 = vmatmul.mubr.bf16.vlgmr.msra.gmra.mrb[24].mxu0 %v1812_v44  ;;  %v5390_v44 = vld [vmem:[%s7202_s7 + $0xa0] ss:$8 sps:$4 sm:$0xff]  }
 0x2b3   : > { %2778 = vmatpush1.bf16.msra.mxu0 %v5238_v43  ;;  %2809 = vmatprep.mubr.bf16.mxu0 %v1815_v46  ;;  %v5299_v43 = vld [vmem:[%s7200_s5 + $0x334] ss:$8 sps:$4 sm:$0xff]   ;;  %v5297_v46 = vld [vmem:[%s7200_s5 + $0x330] ss:$8 sps:$4 sm:$0xff]  }
 0x2b4   : > { %2779 = vmatprep.subr.bf16.mxu0 %v5244_v45  ;;  %v5395_v45 = vld [vmem:[%s7202_s7 + $0xb4] ss:$8 sps:$4 sm:$0xff]   ;;  %3725 = vmatpush1.bf16.msra.mxu1 %v5390_v44 }
 0x2b5   : > { %3726 = vmatprep.subr.bf16.mxu1 %v5395_v45 }
 0x2b7   : > { %2780 = vmatpush1.bf16.msra.mxu0 %v5242_v47  ;;  %v5302_v47 = vld [vmem:[%s7200_s5 + $0x344] ss:$8 sps:$4 sm:$0xff]  }
 0x2b8   : > { %2781 = vmatprep.subr.bf16.mxu0 %v5247_v48  ;;  %v5393_v48 = vld [vmem:[%s7202_s7 + $0xb0] ss:$8 sps:$4 sm:$0xff]  }
 0x2b9   : > { %3727 = vmatpush1.bf16.msra.mxu1 %v5393_v48 }
 0x2bb   : > { %2782 = vmatpush1.bf16.msra.mxu0 %v5245_v49  ;;  %v5398_v49 = vld [vmem:[%s7202_s7 + $0xc4] ss:$8 sps:$4 sm:$0xff]  }
 0x2bc   : > { %2783 = vmatprep.subr.bf16.mxu0 %v5250_v50  ;;  %v5300_v50 = vld [vmem:[%s7200_s5 + $0x340] ss:$8 sps:$4 sm:$0xff]   ;;  %3728 = vmatprep.subr.bf16.mxu1 %v5398_v49 }
 0x2bf   : > { %2784 = vmatpush1.bf16.msra.mxu0 %v5248_v51  ;;  %v5305_v51 = vld [vmem:[%s7200_s5 + $0x354] ss:$8 sps:$4 sm:$0xff]  }
 0x2c0   : > { %2785 = vmatprep.subr.bf16.mxu0 %v5253_v52  ;;  %v5396_v52 = vld [vmem:[%s7202_s7 + $0xc0] ss:$8 sps:$4 sm:$0xff]  }
 0x2c1   : > { %3729 = vmatpush1.bf16.msra.mxu1 %v5396_v52 }
 0x2c3   : > { %2786 = vmatpush1.bf16.msra.mxu0 %v5251_v53  ;;  %v5401_v53 = vld [vmem:[%s7202_s7 + $0xd4] ss:$8 sps:$4 sm:$0xff]  }
 0x2c4   : > { %2787 = vmatprep.subr.bf16.mxu0 %v5256_v54  ;;  %v5303_v54 = vld [vmem:[%s7200_s5 + $0x350] ss:$8 sps:$4 sm:$0xff]   ;;  %3730 = vmatprep.subr.bf16.mxu1 %v5401_v53  ;;  %v5408_v53 = vld [vmem:[%s7202_s7 + $0x100] ss:$8 sps:$4 sm:$0xff]  }
 0x2c7   : > { %2788 = vmatpush1.bf16.msra.mxu0 %v5254_v55  ;;  %v5308_v55 = vld [vmem:[%s7200_s5 + $0x364] ss:$8 sps:$4 sm:$0xff]  }
 0x2c8   : > { %2789 = vmatprep.subr.bf16.mxu0 %v5259_v56  ;;  %v5399_v56 = vld [vmem:[%s7202_s7 + $0xd0] ss:$8 sps:$4 sm:$0xff]  }
 0x2c9   : > { %3731 = vmatpush1.bf16.msra.mxu1 %v5399_v56  ;;  %v5413_v56 = vld [vmem:[%s7202_s7 + $0x114] ss:$8 sps:$4 sm:$0xff]  }
 0x2cb   : > { %2790 = vmatpush1.bf16.msra.mxu0 %v5257_v57  ;;  %v5306_v57 = vld [vmem:[%s7200_s5 + $0x360] ss:$8 sps:$4 sm:$0xff]  }
 0x2cc   : > { %2791 = vmatprep.subr.bf16.mxu0 %v5262_v58  ;;  %v5311_v58 = vld [vmem:[%s7200_s5 + $0x374] ss:$8 sps:$4 sm:$0xff]  }
 0x2cf   : > { %2792 = vmatpush1.bf16.msra.mxu0 %v5260_v59  ;;  %v5309_v59 = vld [vmem:[%s7200_s5 + $0x370] ss:$8 sps:$4 sm:$0xff]  }
 0x2d0   : > { %2793 = vmatprep.subr.bf16.mxu0 %v5265_v60  ;;  %v5314_v60 = vld [vmem:[%s7200_s5 + $0x384] ss:$8 sps:$4 sm:$0xff]  }
 0x2d3   : > { %2794 = vmatpush1.bf16.msra.mxu0 %v5263_v61  ;;  %v5312_v61 = vld [vmem:[%s7200_s5 + $0x380] ss:$8 sps:$4 sm:$0xff]  }
 0x2d4   : > { %2795 = vmatprep.subr.bf16.mxu0 %v5268_v62  ;;  %v5317_v62 = vld [vmem:[%s7200_s5 + $0x394] ss:$8 sps:$4 sm:$0xff]  }
 0x2d7   : > { %2796 = vmatpush1.bf16.msra.mxu0 %v5266_v2  ;;  %v5318_v2 = vld [vmem:[%s7200_s5 + $0x3a0] ss:$8 sps:$4 sm:$0xff]  }
 0x2d8   : > { %2797 = vmatprep.subr.bf16.mxu0 %v5271_v4  ;;  %v5321_v4 = vld [vmem:[%s7200_s5 + $0x3b0] ss:$8 sps:$4 sm:$0xff]  }
 0x2db   : > { %2798 = vmatpush1.bf16.msra.mxu0 %v5269_v6  ;;  %v5329_v6 = vld [vmem:[%s7200_s5 + $0x3d4] ss:$8 sps:$4 sm:$0xff]  }
 0x2dc   : > { %2799 = vmatprep.subr.bf16.mxu0 %v5274_v7  ;;  %v5327_v7 = vld [vmem:[%s7200_s5 + $0x3d0] ss:$8 sps:$4 sm:$0xff]  }
 0x2df   : > { %2800 = vmatpush1.bf16.msra.mxu0 %v5272_v10  ;;  %v5335_v10 = vld [vmem:[%s7200_s5 + $0x3f4] ss:$8 sps:$4 sm:$0xff]  }
 0x2e0   : > { %2801 = vmatprep.subr.bf16.mxu0 %v5277_v11  ;;  %v5333_v11 = vld [vmem:[%s7200_s5 + $0x3f0] ss:$8 sps:$4 sm:$0xff]  }
 0x2e3   : > { %2802 = vmatpush1.bf16.msra.mxu0 %v5275_v14  ;;  %v1816_v14 = vpack.c.bf16 %v6471_v26, %v6471_v26  ;;  %v5351_v26 = vld [vmem:[%s7200_s5 + $0x450] ss:$8 sps:$4 sm:$0xff]  }
 0x2e4   : > { %2803 = vmatprep.subr.bf16.mxu0 %v5280_v15  ;;  %v5341_v15 = vld [vmem:[%s7200_s5 + $0x414] ss:$8 sps:$4 sm:$0xff]  }
 0x2e7   : > { %2804 = vmatpush1.bf16.msra.mxu0 %v5278_v18  ;;  %v5344_v18 = vld [vmem:[%s7200_s5 + $0x424] ss:$8 sps:$4 sm:$0xff]  }
 0x2e8   : > { %2805 = vmatprep.subr.bf16.mxu0 %v5283_v19  ;;  %v5342_v19 = vld [vmem:[%s7200_s5 + $0x420] ss:$8 sps:$4 sm:$0xff]  }
 0x2eb   : > { %2806 = vmatpush1.bf16.msra.mxu0 %v5281_v22  ;;  %v5350_v22 = vld [vmem:[%s7200_s5 + $0x444] ss:$8 sps:$4 sm:$0xff]  }
 0x2ec   : > { %2807 = vmatprep.subr.bf16.mxu0 %v5286_v23  ;;  %v5348_v23 = vld [vmem:[%s7200_s5 + $0x440] ss:$8 sps:$4 sm:$0xff]  }
 0x2ef   : > { %2808 = vmatpush1.bf16.msra.mxu0 %v5284_v28  ;;  %v5354_v28 = vld [vmem:[%s7200_s5 + $0x460] ss:$8 sps:$4 sm:$0xff]  }
 0x2f0   : > { %2818 = vmatprep.subr.bf16.mxu0 %v5289_v29  ;;  %v5359_v29 = vld [vmem:[%s7200_s5 + $0x474] ss:$8 sps:$4 sm:$0xff]  }
 0x2f2   : > { %2810 = vmatmul.mubr.bf16.vlgmr.msra.gmra.mrb[24].mxu0 %v1814_v33  ;;  %v5404_v33 = vld [vmem:[%s7202_s7 + $0xe4] ss:$8 sps:$4 sm:$0xff]  }
 0x2f3   : > { %2819 = vmatpush1.bf16.msra.mxu0 %v5287_v24  ;;  %2850 = vmatprep.mubr.bf16.mxu0 %v1817_v35  ;;  %v5402_v24 = vld [vmem:[%s7202_s7 + $0xe0] ss:$8 sps:$4 sm:$0xff]   ;;  %v5405_v35 = vld [vmem:[%s7202_s7 + $0xf0] ss:$8 sps:$4 sm:$0xff]  }
 0x2f4   : > { %2820 = vmatprep.subr.bf16.mxu0 %v5293_v34  ;;  %v5407_v34 = vld [vmem:[%s7202_s7 + $0xf4] ss:$8 sps:$4 sm:$0xff]   ;;  %3732 = vmatprep.subr.bf16.mxu1 %v5404_v33 }
 0x2f5   : > { %3733 = vmatpush1.bf16.msra.mxu1 %v5402_v24  ;;  %v5462_v24 = vld [vmem:[%s7202_s7 + $0x220] ss:$8 sps:$4 sm:$0xff]   ;;  %v5467_v33 = vld [vmem:[%s7202_s7 + $0x234] ss:$8 sps:$4 sm:$0xff]  }
 0x2f6   : > { %3734 = vmatprep.subr.bf16.mxu1 %v5407_v34  ;;  %v5465_v34 = vld [vmem:[%s7202_s7 + $0x230] ss:$8 sps:$4 sm:$0xff]  }
 0x2f7   : > { %2821 = vmatpush1.bf16.msra.mxu0 %v5291_v38  ;;  %v1966_v38 = vshrl.u32 %v1965_v37, 7  ;;  %v5473_v37 = vld [vmem:[%s7202_s7 + $0x254] ss:$8 sps:$4 sm:$0xff]  }
 0x2f8   : > { %2822 = vmatprep.subr.bf16.mxu0 %v5296_v39 }
 0x2f9   : > { %3735 = vmatpush1.bf16.msra.mxu1 %v5405_v35  ;;  %v6683_v39 = vsub.s32 0, %v1966_v38  ;;  %v6688_v41 = vsub.s32 1, %v1966_v38  ;;  %v5470_v35 = vld [vmem:[%s7202_s7 + $0x244] ss:$8 sps:$4 sm:$0xff]   ;;  %v5471_v38 = vld [vmem:[%s7202_s7 + $0x250] ss:$8 sps:$4 sm:$0xff]  }
 0x2fa   : > { %3745 = vmatprep.subr.bf16.mxu1 %v5410_v36  ;;  %v5468_v36 = vld [vmem:[%s7202_s7 + $0x240] ss:$8 sps:$4 sm:$0xff]  }
 0x2fb   : > { %2823 = vmatpush1.bf16.msra.mxu0 %v5294_v42  ;;  %v1968_v42 = vrot.slane %v1963_v40, %v6683_v39 }
 0x2fc   : > { %2824 = vmatprep.subr.bf16.mxu0 %v5299_v43  ;;  %v1972_v43 = vrot.slane %v1963_v40, %v6688_v41  ;;  %v5476_v40 = vld [vmem:[%s7202_s7 + $0x264] ss:$8 sps:$4 sm:$0xff]  }
 0x2ff   : > { %2825 = vmatpush1.bf16.msra.mxu0 %v5297_v46 }
 0x300   : > { %2826 = vmatprep.subr.bf16.mxu0 %v5302_v47 }
 0x303   : > { %2827 = vmatpush1.bf16.msra.mxu0 %v5300_v50 }
 0x304   : > { %2828 = vmatprep.subr.bf16.mxu0 %v5305_v51 }
 0x307   : > { %2829 = vmatpush1.bf16.msra.mxu0 %v5303_v54 }
 0x308   : > { %2830 = vmatprep.subr.bf16.mxu0 %v5308_v55 }
 0x30b   : > { %2831 = vmatpush1.bf16.msra.mxu0 %v5306_v57 }
 0x30c   : > { %2832 = vmatprep.subr.bf16.mxu0 %v5311_v58  ;;  %v5411_v58 = vld [vmem:[%s7202_s7 + $0x110] ss:$8 sps:$4 sm:$0xff]  }
 0x30f   : > { %2833 = vmatpush1.bf16.msra.mxu0 %v5309_v59  ;;  %v5416_v59 = vld [vmem:[%s7202_s7 + $0x124] ss:$8 sps:$4 sm:$0xff]  }
 0x310   : > { %2834 = vmatprep.subr.bf16.mxu0 %v5314_v60  ;;  %v5414_v60 = vld [vmem:[%s7202_s7 + $0x120] ss:$8 sps:$4 sm:$0xff]  }
 0x313   : > { %2835 = vmatpush1.bf16.msra.mxu0 %v5312_v61  ;;  %v5419_v61 = vld [vmem:[%s7202_s7 + $0x134] ss:$8 sps:$4 sm:$0xff]  }
 0x314   : > { %2836 = vmatprep.subr.bf16.mxu0 %v5317_v62  ;;  %v5417_v62 = vld [vmem:[%s7202_s7 + $0x130] ss:$8 sps:$4 sm:$0xff]  }
 0x317   : > { %2837 = vmatpush1.bf16.msra.mxu0 %v5315_v0  ;;  %v5422_v0 = vld [vmem:[%s7202_s7 + $0x144] ss:$8 sps:$4 sm:$0xff]  }
 0x318   : > { %2838 = vmatprep.subr.bf16.mxu0 %v5320_v1  ;;  %v5420_v1 = vld [vmem:[%s7202_s7 + $0x140] ss:$8 sps:$4 sm:$0xff]  }
 0x31b   : > { %2839 = vmatpush1.bf16.msra.mxu0 %v5318_v2  ;;  %v5425_v2 = vld [vmem:[%s7202_s7 + $0x154] ss:$8 sps:$4 sm:$0xff]  }
 0x31c   : > { %2840 = vmatprep.subr.bf16.mxu0 %v5323_v3  ;;  %v5423_v3 = vld [vmem:[%s7202_s7 + $0x150] ss:$8 sps:$4 sm:$0xff]  }
 0x31f   : > { %2841 = vmatpush1.bf16.msra.mxu0 %v5321_v4  ;;  %v5428_v4 = vld [vmem:[%s7202_s7 + $0x164] ss:$8 sps:$4 sm:$0xff]  }
 0x320   : > { %2842 = vmatprep.subr.bf16.mxu0 %v5326_v5  ;;  %v5426_v5 = vld [vmem:[%s7202_s7 + $0x160] ss:$8 sps:$4 sm:$0xff]  }
 0x323   : > { %2843 = vmatpush1.bf16.msra.mxu0 %v5324_v63  ;;  %v5431_v63 = vld [vmem:[%s7202_s7 + $0x174] ss:$8 sps:$4 sm:$0xff]  }
 0x324   : > { %2844 = vmatprep.subr.bf16.mxu0 %v5329_v6  ;;  %v5429_v6 = vld [vmem:[%s7202_s7 + $0x170] ss:$8 sps:$4 sm:$0xff]  }
 0x327   : > { %2845 = vmatpush1.bf16.msra.mxu0 %v5327_v7  ;;  %v5434_v7 = vld [vmem:[%s7202_s7 + $0x184] ss:$8 sps:$4 sm:$0xff]  }
 0x328   : > { %2846 = vmatprep.subr.bf16.mxu0 %v5332_v8  ;;  %v5432_v8 = vld [vmem:[%s7202_s7 + $0x180] ss:$8 sps:$4 sm:$0xff]  }
 0x32b   : > { %2847 = vmatpush1.bf16.msra.mxu0 %v5330_v9  ;;  %v5437_v9 = vld [vmem:[%s7202_s7 + $0x194] ss:$8 sps:$4 sm:$0xff]  }
 0x32c   : > { %2848 = vmatprep.subr.bf16.mxu0 %v5335_v10  ;;  %v5435_v10 = vld [vmem:[%s7202_s7 + $0x190] ss:$8 sps:$4 sm:$0xff]  }
 0x32f   : > { %2849 = vmatpush1.bf16.msra.mxu0 %v5333_v11  ;;  %v5440_v11 = vld [vmem:[%s7202_s7 + $0x1a4] ss:$8 sps:$4 sm:$0xff]  }
 0x330   : > { %2859 = vmatprep.subr.bf16.mxu0 %v5338_v12  ;;  %v5438_v12 = vld [vmem:[%s7202_s7 + $0x1a0] ss:$8 sps:$4 sm:$0xff]  }
 0x332   : > { %2851 = vmatmul.mubr.bf16.vlgmr.msra.gmra.mrb[24].mxu0 %v1816_v14  ;;  %v5441_v14 = vld [vmem:[%s7202_s7 + $0x1b0] ss:$8 sps:$4 sm:$0xff]  }
 0x333   : > { %2860 = vmatpush1.bf16.msra.mxu0 %v5336_v13  ;;  %2891 = vmatprep.mubr.bf16.mxu0 %v5682_v17  ;;  %v5443_v13 = vld [vmem:[%s7202_s7 + $0x1b4] ss:$8 sps:$4 sm:$0xff]  }
 0x334   : > { %2861 = vmatprep.subr.bf16.mxu0 %v5341_v15  ;;  %v5446_v15 = vld [vmem:[%s7202_s7 + $0x1c4] ss:$8 sps:$4 sm:$0xff]   ;;  %v5449_v17 = vld [vmem:[%s7202_s7 + $0x1d4] ss:$8 sps:$4 sm:$0xff]  }
 0x337   : > { %2862 = vmatpush1.bf16.msra.mxu0 %v5339_v16  ;;  %v5444_v16 = vld [vmem:[%s7202_s7 + $0x1c0] ss:$8 sps:$4 sm:$0xff]  }
 0x338   : > { %2863 = vmatprep.subr.bf16.mxu0 %v5344_v18  ;;  %v5447_v18 = vld [vmem:[%s7202_s7 + $0x1d0] ss:$8 sps:$4 sm:$0xff]  }
 0x33b   : > { %2864 = vmatpush1.bf16.msra.mxu0 %v5342_v19  ;;  %v5452_v19 = vld [vmem:[%s7202_s7 + $0x1e4] ss:$8 sps:$4 sm:$0xff]  }
 0x33c   : > { %2865 = vmatprep.subr.bf16.mxu0 %v5347_v20  ;;  %v5450_v20 = vld [vmem:[%s7202_s7 + $0x1e0] ss:$8 sps:$4 sm:$0xff]  }
 0x33f   : > { %2866 = vmatpush1.bf16.msra.mxu0 %v5345_v21  ;;  %v5455_v21 = vld [vmem:[%s7202_s7 + $0x1f4] ss:$8 sps:$4 sm:$0xff]  }
 0x340   : > { %2867 = vmatprep.subr.bf16.mxu0 %v5350_v22  ;;  %v5453_v22 = vld [vmem:[%s7202_s7 + $0x1f0] ss:$8 sps:$4 sm:$0xff]  }
 0x343   : > { %2868 = vmatpush1.bf16.msra.mxu0 %v5348_v23 }
 0x344   : > { %2869 = vmatprep.subr.bf16.mxu0 %v5353_v25  ;;  %v5458_v25 = vld [vmem:[%s7202_s7 + $0x204] ss:$8 sps:$4 sm:$0xff]  }
 0x347   : > { %2870 = vmatpush1.bf16.msra.mxu0 %v5351_v26 }
 0x348   : > { %2871 = vmatprep.subr.bf16.mxu0 %v5356_v27  ;;  %v5456_v27 = vld [vmem:[%s7202_s7 + $0x200] ss:$8 sps:$4 sm:$0xff]  }
 0x34b   : > { %2872 = vmatpush1.bf16.msra.mxu0 %v5354_v28 }
 0x34c   : > { %2873 = vmatprep.subr.bf16.mxu0 %v5359_v29  ;;  %v5461_v29 = vld [vmem:[%s7202_s7 + $0x214] ss:$8 sps:$4 sm:$0xff]  }
 0x34f   : > { %2874 = vmatpush1.bf16.msra.mxu0 %v5357_v30 }
 0x352   : > { %2892 = vmatmul.mubr.bf16.vlgmr.msra.gmra.mrb[24].mxu0 %v1818_v32  ;;  %v5464_v32 = vld [vmem:[%s7202_s7 + $0x224] ss:$8 sps:$4 sm:$0xff]  }
 0x425   : > { %v2893_v44 = vpop.f32.mrb[24].mxu0 }
 0x426   : > { %v4966_v45 = vadd.f32 %v2893_v44, %v1968_v42  ;;  %v2895_v46 = vpop.f32.mrb[25].mxu0  ;;  %v5474_v42 = vld [vmem:[%s7202_s7 + $0x260] ss:$8 sps:$4 sm:$0xff]   ;;  %v5477_v44 = vld [vmem:[%s7202_s7 + $0x270] ss:$8 sps:$4 sm:$0xff]  }
 0x427   : > { %v4967_v47 = vadd.f32 %v2895_v46, %v1972_v43  ;;  %v2897_v48 = vpop.f32.mrb[26].mxu0  ;;  %v5479_v43 = vld [vmem:[%s7202_s7 + $0x274] ss:$8 sps:$4 sm:$0xff]   ;;  %v5480_v46 = vld [vmem:[%s7202_s7 + $0x280] ss:$8 sps:$4 sm:$0xff]  }
 0x428   : > { %v6692_v49 = vmax.f32 %v4966_v45, 0.0  ;;  %v2898_v50 = vpop.f32.mrb[27].mxu0  ;;  %v5482_v45 = vld [vmem:[%s7202_s7 + $0x284] ss:$8 sps:$4 sm:$0xff]   ;;  %v5483_v48 = vld [vmem:[%s7202_s7 + $0x290] ss:$8 sps:$4 sm:$0xff]  }
 0x429   : > { %v6694_v51 = vmax.f32 %v4967_v47, 0.0  ;;  %v5485_v47 = vld [vmem:[%s7202_s7 + $0x294] ss:$8 sps:$4 sm:$0xff]   ;;  %v5488_v50 = vld [vmem:[%s7202_s7 + $0x2a4] ss:$8 sps:$4 sm:$0xff]  }
 0x42a   : > { %v2916_v55 = vpack.c.bf16 %v6692_v49, %v6692_v49  ;;  %v2904_v23 = vrot.slane %v6692_v49, 1 }
 0x42b   : > { %v2917_v52 = vpack.c.bf16 %v6694_v51, %v6694_v51  ;;  %v2905_v54 = vrot.slane %v6694_v51, 1  ;;  %v2909_v26 = vrot.slane %v6694_v51, 2 }
 0x42c   : > { %v2918_v28 = vpack.c.bf16 %v2904_v23, %v2904_v23  ;;  %v5534_v23 = vld [vmem:[%s7202_s7 + $0x3a0] ss:$8 sps:$4 sm:$0xff]  }
 0x42d   : > { %3736 = vmatprep.mubr.bf16.mxu1 %v2917_v52  ;;  %v2919_v57 = vpack.c.bf16 %v2905_v54, %v2905_v54  ;;  %v2921_v30 = vpack.c.bf16 %v2909_v26, %v2909_v26  ;;  %v5486_v52 = vld [vmem:[%s7202_s7 + $0x2a0] ss:$8 sps:$4 sm:$0xff]   ;;  %v5489_v54 = vld [vmem:[%s7202_s7 + $0x2b0] ss:$8 sps:$4 sm:$0xff]  }
 0x42e   : > { %3737 = vmatmul.mubr.bf16.vlgmr.msra.gmra.mrb[12].mxu1 %v2916_v55  ;;  %v5494_v55 = vld [vmem:[%s7202_s7 + $0x2c4] ss:$8 sps:$4 sm:$0xff]   ;;  %v5537_v26 = vld [vmem:[%s7202_s7 + $0x3b0] ss:$8 sps:$4 sm:$0xff]  }
 0x42f   : > { %3746 = vmatpush1.bf16.msra.mxu1 %v5408_v53  ;;  %3777 = vmatprep.mubr.bf16.mxu1 %v2919_v57  ;;  %v5491_v53 = vld [vmem:[%s7202_s7 + $0x2b4] ss:$8 sps:$4 sm:$0xff]  }
 0x430   : > { %3747 = vmatprep.subr.bf16.mxu1 %v5413_v56  ;;  %v5492_v56 = vld [vmem:[%s7202_s7 + $0x2c0] ss:$8 sps:$4 sm:$0xff]   ;;  %v5497_v57 = vld [vmem:[%s7202_s7 + $0x2d4] ss:$8 sps:$4 sm:$0xff]  }
 0x433   : > { %3748 = vmatpush1.bf16.msra.mxu1 %v5411_v58  ;;  %v5495_v58 = vld [vmem:[%s7202_s7 + $0x2d0] ss:$8 sps:$4 sm:$0xff]  }
 0x434   : > { %3749 = vmatprep.subr.bf16.mxu1 %v5416_v59  ;;  %v5500_v59 = vld [vmem:[%s7202_s7 + $0x2e4] ss:$8 sps:$4 sm:$0xff]  }
 0x437   : > { %3750 = vmatpush1.bf16.msra.mxu1 %v5414_v60  ;;  %v5498_v60 = vld [vmem:[%s7202_s7 + $0x2e0] ss:$8 sps:$4 sm:$0xff]  }
 0x438   : > { %3751 = vmatprep.subr.bf16.mxu1 %v5419_v61  ;;  %v5503_v61 = vld [vmem:[%s7202_s7 + $0x2f4] ss:$8 sps:$4 sm:$0xff]  }
 0x43b   : > { %3752 = vmatpush1.bf16.msra.mxu1 %v5417_v62  ;;  %v5501_v62 = vld [vmem:[%s7202_s7 + $0x2f0] ss:$8 sps:$4 sm:$0xff]  }
 0x43c   : > { %3753 = vmatprep.subr.bf16.mxu1 %v5422_v0  ;;  %v2908_v0 = vrot.slane %v6692_v49, 2 }
 0x43f   : > { %3754 = vmatpush1.bf16.msra.mxu1 %v5420_v1  ;;  %v5506_v1 = vld [vmem:[%s7202_s7 + $0x304] ss:$8 sps:$4 sm:$0xff]  }
 0x440   : > { %3755 = vmatprep.subr.bf16.mxu1 %v5425_v2  ;;  %v2913_v2 = vrot.slane %v6694_v51, 3  ;;  %v5512_v51 = vld [vmem:[%s7202_s7 + $0x324] ss:$8 sps:$4 sm:$0xff]  }
 0x443   : > { %3756 = vmatpush1.bf16.msra.mxu1 %v5423_v3  ;;  %v5504_v3 = vld [vmem:[%s7202_s7 + $0x300] ss:$8 sps:$4 sm:$0xff]  }
 0x444   : > { %3757 = vmatprep.subr.bf16.mxu1 %v5428_v4  ;;  %v2920_v4 = vpack.c.bf16 %v2908_v0, %v2908_v0  ;;  %v5590_v0 = vld [vmem:[%s7204_s9 + $0xc4] ss:$8 sps:$4 sm:$0xff]  }
 0x447   : > { %3758 = vmatpush1.bf16.msra.mxu1 %v5426_v5  ;;  %v5509_v5 = vld [vmem:[%s7202_s7 + $0x314] ss:$8 sps:$4 sm:$0xff]  }
 0x448   : > { %3759 = vmatprep.subr.bf16.mxu1 %v5431_v63  ;;  %v2923_v63 = vpack.c.bf16 %v2913_v2, %v2913_v2  ;;  %v5593_v2 = vld [vmem:[%s7204_s9 + $0xd4] ss:$8 sps:$4 sm:$0xff]  }
 0x44b   : > { %3760 = vmatpush1.bf16.msra.mxu1 %v5429_v6  ;;  %v5507_v6 = vld [vmem:[%s7202_s7 + $0x310] ss:$8 sps:$4 sm:$0xff]  }
 0x44c   : > { %3761 = vmatprep.subr.bf16.mxu1 %v5434_v7  ;;  %v5510_v7 = vld [vmem:[%s7202_s7 + $0x320] ss:$8 sps:$4 sm:$0xff]  }
 0x44f   : > { %3762 = vmatpush1.bf16.msra.mxu1 %v5432_v8  ;;  %v5515_v8 = vld [vmem:[%s7202_s7 + $0x334] ss:$8 sps:$4 sm:$0xff]  }
 0x450   : > { %3763 = vmatprep.subr.bf16.mxu1 %v5437_v9  ;;  %v5513_v9 = vld [vmem:[%s7202_s7 + $0x330] ss:$8 sps:$4 sm:$0xff]  }
 0x453   : > { %3764 = vmatpush1.bf16.msra.mxu1 %v5435_v10  ;;  %v5518_v10 = vld [vmem:[%s7202_s7 + $0x344] ss:$8 sps:$4 sm:$0xff]  }
 0x454   : > { %3765 = vmatprep.subr.bf16.mxu1 %v5440_v11  ;;  %v5516_v11 = vld [vmem:[%s7202_s7 + $0x340] ss:$8 sps:$4 sm:$0xff]  }
 0x457   : > { %3766 = vmatpush1.bf16.msra.mxu1 %v5438_v12  ;;  %v5521_v12 = vld [vmem:[%s7202_s7 + $0x354] ss:$8 sps:$4 sm:$0xff]  }
 0x458   : > { %3767 = vmatprep.subr.bf16.mxu1 %v5443_v13  ;;  %v5519_v13 = vld [vmem:[%s7202_s7 + $0x350] ss:$8 sps:$4 sm:$0xff]  }
 0x45b   : > { %3768 = vmatpush1.bf16.msra.mxu1 %v5441_v14  ;;  %v5524_v14 = vld [vmem:[%s7202_s7 + $0x364] ss:$8 sps:$4 sm:$0xff]  }
 0x45c   : > { %3769 = vmatprep.subr.bf16.mxu1 %v5446_v15  ;;  %v5522_v15 = vld [vmem:[%s7202_s7 + $0x360] ss:$8 sps:$4 sm:$0xff]  }
 0x45f   : > { %3770 = vmatpush1.bf16.msra.mxu1 %v5444_v16  ;;  %v5527_v16 = vld [vmem:[%s7202_s7 + $0x374] ss:$8 sps:$4 sm:$0xff]  }
 0x460   : > { %3771 = vmatprep.subr.bf16.mxu1 %v5449_v17  ;;  %v5525_v17 = vld [vmem:[%s7202_s7 + $0x370] ss:$8 sps:$4 sm:$0xff]  }
 0x463   : > { %3772 = vmatpush1.bf16.msra.mxu1 %v5447_v18  ;;  %v5530_v18 = vld [vmem:[%s7202_s7 + $0x384] ss:$8 sps:$4 sm:$0xff]  }
 0x464   : > { %3773 = vmatprep.subr.bf16.mxu1 %v5452_v19  ;;  %v5528_v19 = vld [vmem:[%s7202_s7 + $0x380] ss:$8 sps:$4 sm:$0xff]  }
 0x467   : > { %3774 = vmatpush1.bf16.msra.mxu1 %v5450_v20  ;;  %v5533_v20 = vld [vmem:[%s7202_s7 + $0x394] ss:$8 sps:$4 sm:$0xff]  }
 0x468   : > { %3775 = vmatprep.subr.bf16.mxu1 %v5455_v21  ;;  %v5531_v21 = vld [vmem:[%s7202_s7 + $0x390] ss:$8 sps:$4 sm:$0xff]  }
 0x46b   : > { %3776 = vmatpush1.bf16.msra.mxu1 %v5453_v22  ;;  %v5536_v22 = vld [vmem:[%s7202_s7 + $0x3a4] ss:$8 sps:$4 sm:$0xff]  }
 0x46c   : > { %3786 = vmatprep.subr.bf16.mxu1 %v5458_v25  ;;  %v5539_v25 = vld [vmem:[%s7202_s7 + $0x3b4] ss:$8 sps:$4 sm:$0xff]  }
 0x46e   : > { %3778 = vmatmul.mubr.bf16.vlgmr.msra.gmra.mrb[12].mxu1 %v2918_v28  ;;  %v5540_v28 = vld [vmem:[%s7202_s7 + $0x3c0] ss:$8 sps:$4 sm:$0xff]  }
 0x46f   : > { %3787 = vmatpush1.bf16.msra.mxu1 %v5456_v27  ;;  %3818 = vmatprep.mubr.bf16.mxu1 %v2921_v30  ;;  %v5542_v27 = vld [vmem:[%s7202_s7 + $0x3c4] ss:$8 sps:$4 sm:$0xff]   ;;  %v5543_v30 = vld [vmem:[%s7202_s7 + $0x3d0] ss:$8 sps:$4 sm:$0xff]  }
 0x470   : > { %3788 = vmatprep.subr.bf16.mxu1 %v5461_v29  ;;  %v5545_v29 = vld [vmem:[%s7202_s7 + $0x3d4] ss:$8 sps:$4 sm:$0xff]  }
 0x473   : > { %3789 = vmatpush1.bf16.msra.mxu1 %v5459_v31  ;;  %v5548_v31 = vld [vmem:[%s7202_s7 + $0x3e4] ss:$8 sps:$4 sm:$0xff]  }
 0x474   : > { %3790 = vmatprep.subr.bf16.mxu1 %v5464_v32  ;;  %v5546_v32 = vld [vmem:[%s7202_s7 + $0x3e0] ss:$8 sps:$4 sm:$0xff]  }
 0x477   : > { %3791 = vmatpush1.bf16.msra.mxu1 %v5462_v24  ;;  %v5551_v24 = vld [vmem:[%s7202_s7 + $0x3f4] ss:$8 sps:$4 sm:$0xff]  }
 0x478   : > { %3792 = vmatprep.subr.bf16.mxu1 %v5467_v33  ;;  %v5549_v33 = vld [vmem:[%s7202_s7 + $0x3f0] ss:$8 sps:$4 sm:$0xff]  }
 0x47b   : > { %3793 = vmatpush1.bf16.msra.mxu1 %v5465_v34  ;;  %v2912_v34 = vrot.slane %v6692_v49, 3  ;;  %v5555_v49 = vld [vmem:[%s7204_s9 + $0x10] ss:$8 sps:$4 sm:$0xff]  }
 0x47c   : > { %3794 = vmatprep.subr.bf16.mxu1 %v5470_v35  ;;  %v5554_v35 = vld [vmem:[%s7204_s9 + $0x4] ss:$8 sps:$4 sm:$0xff]  }
 0x47f   : > { %3795 = vmatpush1.bf16.msra.mxu1 %v5468_v36  ;;  %v5552_v36 = vld [vmem:[%s7204_s9] ss:$8 sps:$4 sm:$0xff]  }
 0x480   : > { %3796 = vmatprep.subr.bf16.mxu1 %v5473_v37  ;;  %v2922_v37 = vpack.c.bf16 %v2912_v34, %v2912_v34  ;;  %v5615_v34 = vld [vmem:[%s7206_s11 + $0x38] sm:$0xff]  }
 0x483   : > { %3797 = vmatpush1.bf16.msra.mxu1 %v5471_v38  ;;  %v5557_v38 = vld [vmem:[%s7204_s9 + $0x14] ss:$8 sps:$4 sm:$0xff]  }
 0x484   : > { %3798 = vmatprep.subr.bf16.mxu1 %v5476_v40  ;;  %v5560_v40 = vld [vmem:[%s7204_s9 + $0x24] ss:$8 sps:$4 sm:$0xff]  }
 0x487   : > { %3799 = vmatpush1.bf16.msra.mxu1 %v5474_v42  ;;  %v5558_v42 = vld [vmem:[%s7204_s9 + $0x20] ss:$8 sps:$4 sm:$0xff]  }
 0x488   : > { %3800 = vmatprep.subr.bf16.mxu1 %v5479_v43  ;;  %v5563_v43 = vld [vmem:[%s7204_s9 + $0x34] ss:$8 sps:$4 sm:$0xff]  }
 0x48b   : > { %3801 = vmatpush1.bf16.msra.mxu1 %v5477_v44  ;;  %v5561_v44 = vld [vmem:[%s7204_s9 + $0x30] ss:$8 sps:$4 sm:$0xff]  }
 0x48c   : > { %3802 = vmatprep.subr.bf16.mxu1 %v5482_v45  ;;  %v5566_v45 = vld [vmem:[%s7204_s9 + $0x44] ss:$8 sps:$4 sm:$0xff]  }
 0x48f   : > { %3803 = vmatpush1.bf16.msra.mxu1 %v5480_v46  ;;  %v5564_v46 = vld [vmem:[%s7204_s9 + $0x40] ss:$8 sps:$4 sm:$0xff]  }
 0x490   : > { %3804 = vmatprep.subr.bf16.mxu1 %v5485_v47  ;;  %v5569_v47 = vld [vmem:[%s7204_s9 + $0x54] ss:$8 sps:$4 sm:$0xff]  }
 0x493   : > { %3805 = vmatpush1.bf16.msra.mxu1 %v5483_v48  ;;  %v5567_v48 = vld [vmem:[%s7204_s9 + $0x50] ss:$8 sps:$4 sm:$0xff]  }
 0x494   : > { %3806 = vmatprep.subr.bf16.mxu1 %v5488_v50  ;;  %v5572_v50 = vld [vmem:[%s7204_s9 + $0x64] ss:$8 sps:$4 sm:$0xff]  }
 0x497   : > { %3807 = vmatpush1.bf16.msra.mxu1 %v5486_v52  ;;  %v5570_v52 = vld [vmem:[%s7204_s9 + $0x60] ss:$8 sps:$4 sm:$0xff]  }
 0x498   : > { %3808 = vmatprep.subr.bf16.mxu1 %v5491_v53  ;;  %v5575_v53 = vld [vmem:[%s7204_s9 + $0x74] ss:$8 sps:$4 sm:$0xff]  }
 0x49b   : > { %3809 = vmatpush1.bf16.msra.mxu1 %v5489_v54  ;;  %v5573_v54 = vld [vmem:[%s7204_s9 + $0x70] ss:$8 sps:$4 sm:$0xff]  }
 0x49c   : > { %3810 = vmatprep.subr.bf16.mxu1 %v5494_v55  ;;  %v5578_v55 = vld [vmem:[%s7204_s9 + $0x84] ss:$8 sps:$4 sm:$0xff]  }
 0x49f   : > { %3811 = vmatpush1.bf16.msra.mxu1 %v5492_v56  ;;  %v5576_v56 = vld [vmem:[%s7204_s9 + $0x80] ss:$8 sps:$4 sm:$0xff]  }
 0x4a0   : > { %3812 = vmatprep.subr.bf16.mxu1 %v5497_v57  ;;  %v5581_v57 = vld [vmem:[%s7204_s9 + $0x94] ss:$8 sps:$4 sm:$0xff]  }
 0x4a3   : > { %3813 = vmatpush1.bf16.msra.mxu1 %v5495_v58  ;;  %v5579_v58 = vld [vmem:[%s7204_s9 + $0x90] ss:$8 sps:$4 sm:$0xff]  }
 0x4a4   : > { %3814 = vmatprep.subr.bf16.mxu1 %v5500_v59  ;;  %v5584_v59 = vld [vmem:[%s7204_s9 + $0xa4] ss:$8 sps:$4 sm:$0xff]  }
 0x4a7   : > { %3815 = vmatpush1.bf16.msra.mxu1 %v5498_v60  ;;  %v5582_v60 = vld [vmem:[%s7204_s9 + $0xa0] ss:$8 sps:$4 sm:$0xff]  }
 0x4a8   : > { %3816 = vmatprep.subr.bf16.mxu1 %v5503_v61  ;;  %v5587_v61 = vld [vmem:[%s7204_s9 + $0xb4] ss:$8 sps:$4 sm:$0xff]  }
 0x4ab   : > { %3817 = vmatpush1.bf16.msra.mxu1 %v5501_v62  ;;  %v5585_v62 = vld [vmem:[%s7204_s9 + $0xb0] ss:$8 sps:$4 sm:$0xff]  }
 0x4ac   : > { %3827 = vmatprep.subr.bf16.mxu1 %v5506_v1  ;;  %v5588_v1 = vld [vmem:[%s7204_s9 + $0xc0] ss:$8 sps:$4 sm:$0xff]  }
 0x4ae   : > { %3819 = vmatmul.mubr.bf16.vlgmr.msra.gmra.mrb[12].mxu1 %v2920_v4  ;;  %v5596_v4 = vld [vmem:[%s7204_s9 + $0xe4] ss:$8 sps:$4 sm:$0xff]  }
 0x4af   : > { %3828 = vmatpush1.bf16.msra.mxu1 %v5504_v3  ;;  %3859 = vmatprep.mubr.bf16.mxu1 %v2923_v63  ;;  %v5591_v3 = vld [vmem:[%s7204_s9 + $0xd0] ss:$8 sps:$4 sm:$0xff]   ;;  %v5599_v63 = vld [vmem:[%s7204_s9 + $0xf4] ss:$8 sps:$4 sm:$0xff]  }
 0x4b0   : > { %3829 = vmatprep.subr.bf16.mxu1 %v5509_v5  ;;  %v5594_v5 = vld [vmem:[%s7204_s9 + $0xe0] ss:$8 sps:$4 sm:$0xff]  }
 0x4b3   : > { %3830 = vmatpush1.bf16.msra.mxu1 %v5507_v6  ;;  %v5597_v6 = vld [vmem:[%s7204_s9 + $0xf0] ss:$8 sps:$4 sm:$0xff]  }
 0x4b4   : > { %3831 = vmatprep.subr.bf16.mxu1 %v5512_v51  ;;  %v5600_v51 = vld [vmem:[%s7206_s11 + $0x40] sm:$0xff]  }
 0x4b5   : > { %4924 = vmatprep.subr.bf16.mxu0 %v5600_v51 }
 0x4b7   : > { %3832 = vmatpush1.bf16.msra.mxu1 %v5510_v7  ;;  %v5601_v7 = vld [vmem:[%s7206_s11] sm:$0xff]  }
 0x4b8   : > { %3833 = vmatprep.subr.bf16.mxu1 %v5515_v8  ;;  %v5602_v8 = vld [vmem:[%s7206_s11 + $0x48] sm:$0xff]   ;;  %4925 = vmatpush3.bf16.msra.mxu0 %v5601_v7 }
 0x4b9   : > { %4926 = vmatprep.subr.bf16.mxu0 %v5602_v8 }
 0x4bb   : > { %3834 = vmatpush1.bf16.msra.mxu1 %v5513_v9  ;;  %v5603_v9 = vld [vmem:[%s7206_s11 + $0x8] sm:$0xff]  }
 0x4bc   : > { %3835 = vmatprep.subr.bf16.mxu1 %v5518_v10  ;;  %v5604_v10 = vld [vmem:[%s7206_s11 + $0x50] sm:$0xff]   ;;  %4927 = vmatpush3.bf16.msra.mxu0 %v5603_v9 }
 0x4bd   : > { %4928 = vmatprep.subr.bf16.mxu0 %v5604_v10 }
 0x4bf   : > { %3836 = vmatpush1.bf16.msra.mxu1 %v5516_v11  ;;  %v5605_v11 = vld [vmem:[%s7206_s11 + $0x10] sm:$0xff]  }
 0x4c0   : > { %3837 = vmatprep.subr.bf16.mxu1 %v5521_v12  ;;  %v5606_v12 = vld [vmem:[%s7206_s11 + $0x58] sm:$0xff]   ;;  %4929 = vmatpush3.bf16.msra.mxu0 %v5605_v11 }
 0x4c1   : > { %4930 = vmatprep.subr.bf16.mxu0 %v5606_v12 }
 0x4c3   : > { %3838 = vmatpush1.bf16.msra.mxu1 %v5519_v13  ;;  %v5607_v13 = vld [vmem:[%s7206_s11 + $0x18] sm:$0xff]  }
 0x4c4   : > { %3839 = vmatprep.subr.bf16.mxu1 %v5524_v14  ;;  %v5608_v14 = vld [vmem:[%s7206_s11 + $0x60] sm:$0xff]   ;;  %4931 = vmatpush3.bf16.msra.mxu0 %v5607_v13 }
 0x4c5   : > { %4932 = vmatprep.subr.bf16.mxu0 %v5608_v14 }
 0x4c7   : > { %3840 = vmatpush1.bf16.msra.mxu1 %v5522_v15  ;;  %v5609_v15 = vld [vmem:[%s7206_s11 + $0x20] sm:$0xff]  }
 0x4c8   : > { %3841 = vmatprep.subr.bf16.mxu1 %v5527_v16  ;;  %v5610_v16 = vld [vmem:[%s7206_s11 + $0x68] sm:$0xff]   ;;  %4933 = vmatpush3.bf16.msra.mxu0 %v5609_v15 }
 0x4c9   : > { %4934 = vmatprep.subr.bf16.mxu0 %v5610_v16 }
 0x4cb   : > { %3842 = vmatpush1.bf16.msra.mxu1 %v5525_v17  ;;  %v5611_v17 = vld [vmem:[%s7206_s11 + $0x28] sm:$0xff]  }
 0x4cc   : > { %3843 = vmatprep.subr.bf16.mxu1 %v5530_v18  ;;  %4935 = vmatpush3.bf16.msra.mxu0 %v5611_v17  ;;  %v3052_v18 = vld [vmem:[%s7203_s8] sm:$0x3] }
 0x4cf   : > { %3844 = vmatpush1.bf16.msra.mxu1 %v5528_v19  ;;  %v3697_v19 = vrot.slane %v3052_v18, %v6683_v39 }
 0x4d0   : > { %3845 = vmatprep.subr.bf16.mxu1 %v5533_v20  ;;  %v3701_v20 = vrot.slane %v3052_v18, %v6688_v41 }
 0x4d3   : > { %3846 = vmatpush1.bf16.msra.mxu1 %v5531_v21 }
 0x4d4   : > { %3847 = vmatprep.subr.bf16.mxu1 %v5536_v22 }
 0x4d7   : > { %3848 = vmatpush1.bf16.msra.mxu1 %v5534_v23 }
 0x4d8   : > { %3849 = vmatprep.subr.bf16.mxu1 %v5539_v25 }
 0x4db   : > { %3850 = vmatpush1.bf16.msra.mxu1 %v5537_v26 }
 0x4dc   : > { %3851 = vmatprep.subr.bf16.mxu1 %v5542_v27 }
 0x4df   : > { %3852 = vmatpush1.bf16.msra.mxu1 %v5540_v28 }
 0x4e0   : > { %3853 = vmatprep.subr.bf16.mxu1 %v5545_v29 }
 0x4e3   : > { %3854 = vmatpush1.bf16.msra.mxu1 %v5543_v30 }
 0x4e4   : > { %3855 = vmatprep.subr.bf16.mxu1 %v5548_v31 }
 0x4e7   : > { %3856 = vmatpush1.bf16.msra.mxu1 %v5546_v32  ;;  %v5612_v32 = vld [vmem:[%s7206_s11 + $0x70] sm:$0xff]  }
 0x4e8   : > { %3857 = vmatprep.subr.bf16.mxu1 %v5551_v24  ;;  %v5613_v24 = vld [vmem:[%s7206_s11 + $0x30] sm:$0xff]   ;;  %4936 = vmatprep.subr.bf16.mxu0 %v5612_v32 }
 0x4e9   : > { %4937 = vmatpush3.bf16.msra.mxu0 %v5613_v24 }
 0x4eb   : > { %3858 = vmatpush1.bf16.msra.mxu1 %v5549_v33  ;;  %v5614_v33 = vld [vmem:[%s7206_s11 + $0x78] sm:$0xff]  }
 0x4ec   : > { %4076 = vmatprep.subr.bf16.mxu1 %v5554_v35  ;;  %4938 = vmatprep.subr.bf16.mxu0 %v5614_v33  ;;  %v3904_v35 = vld [vmem:[%s7205_s10] sm:$0x3] }
 0x4ed   : > { %4939 = vmatpush3.bf16.msra.mxu0 %v5615_v34 }
 0x4ee   : > { %3860 = vmatmul.mubr.bf16.vlgmr.msra.gmra.mrb[12].mxu1 %v2922_v37  ;;  %v4073_v37 = vrot.slane %v3904_v35, %v6688_v41 }
 0x4ef   : > { %4077 = vmatpush1.bf16.msra.mxu1 %v5552_v36  ;;  %v4069_v36 = vrot.slane %v3904_v35, %v6683_v39  ;;  %v4153_v39 = vld [vmem:[%s7207_s12] sm:$0x1] }
 0x4f0   : > { %4078 = vmatprep.subr.bf16.mxu1 %v5557_v38 }
 0x4f3   : > { %4079 = vmatpush1.bf16.msra.mxu1 %v5555_v49 }
 0x4f4   : > { %4080 = vmatprep.subr.bf16.mxu1 %v5560_v40 }
 0x4f7   : > { %4081 = vmatpush1.bf16.msra.mxu1 %v5558_v42 }
 0x4f8   : > { %4082 = vmatprep.subr.bf16.mxu1 %v5563_v43 }
 0x4fb   : > { %4083 = vmatpush1.bf16.msra.mxu1 %v5561_v44 }
 0x4fc   : > { %4084 = vmatprep.subr.bf16.mxu1 %v5566_v45 }
 0x4ff   : > { %4085 = vmatpush1.bf16.msra.mxu1 %v5564_v46 }
 0x500   : > { %4086 = vmatprep.subr.bf16.mxu1 %v5569_v47 }
 0x503   : > { %4087 = vmatpush1.bf16.msra.mxu1 %v5567_v48 }
 0x504   : > { %4088 = vmatprep.subr.bf16.mxu1 %v5572_v50 }
 0x507   : > { %4089 = vmatpush1.bf16.msra.mxu1 %v5570_v52 }
 0x508   : > { %4090 = vmatprep.subr.bf16.mxu1 %v5575_v53 }
 0x50b   : > { %4091 = vmatpush1.bf16.msra.mxu1 %v5573_v54 }
 0x50c   : > { %4092 = vmatprep.subr.bf16.mxu1 %v5578_v55 }
 0x50f   : > { %4093 = vmatpush1.bf16.msra.mxu1 %v5576_v56 }
 0x510   : > { %4094 = vmatprep.subr.bf16.mxu1 %v5581_v57 }
 0x513   : > { %4095 = vmatpush1.bf16.msra.mxu1 %v5579_v58 }
 0x514   : > { %4096 = vmatprep.subr.bf16.mxu1 %v5584_v59 }
 0x517   : > { %4097 = vmatpush1.bf16.msra.mxu1 %v5582_v60 }
 0x518   : > { %4098 = vmatprep.subr.bf16.mxu1 %v5587_v61 }
 0x51b   : > { %4099 = vmatpush1.bf16.msra.mxu1 %v5585_v62 }
 0x51c   : > { %4100 = vmatprep.subr.bf16.mxu1 %v5590_v0 }
 0x51f   : > { %4101 = vmatpush1.bf16.msra.mxu1 %v5588_v1 }
 0x520   : > { %4102 = vmatprep.subr.bf16.mxu1 %v5593_v2 }
 0x523   : > { %4103 = vmatpush1.bf16.msra.mxu1 %v5591_v3 }
 0x524   : > { %4104 = vmatprep.subr.bf16.mxu1 %v5596_v4 }
 0x527   : > { %4105 = vmatpush1.bf16.msra.mxu1 %v5594_v5 }
 0x528   : > { %4106 = vmatprep.subr.bf16.mxu1 %v5599_v63 }
 0x52b   : > { %4107 = vmatpush1.bf16.msra.mxu1 %v5597_v6 }
 0x5c1   : > { %v3861_v21 = vpop.f32.mrb[12].mxu1 }
 0x5c2   : > { %v4968_v22 = vadd.f32 %v3861_v21, %v3697_v19  ;;  %v3863_v23 = vpop.f32.mrb[13].mxu1 }
 0x5c3   : > { %v4969_v25 = vadd.f32 %v3863_v23, %v3701_v20  ;;  %v3865_v26 = vpop.f32.mrb[14].mxu1 }
 0x5c4   : > { %v3868_v27 = vmax.f32 %v4968_v22, 0.0  ;;  %v3866_v28 = vpop.f32.mrb[15].mxu1 }
 0x5c5   : > { %v3869_v29 = vmax.f32 %v4969_v25, 0.0 }
 0x5c6   : > { %v3870_v31 = vpack.c.bf16 %v3868_v27, %v3868_v27 }
 0x5c7   : > { %v3871_v30 = vpack.c.bf16 %v3869_v29, %v3869_v29 }
 0x5c9   : > { %4108 = vmatprep.mubr.bf16.mxu1 %v3871_v30 }
 0x5ca   : > { %4109 = vmatmul.mubr.bf16.vlgmr.msra.gmra.mrb[16].mxu1 %v3870_v31 }
 0x69d   : > { %v4110_v38 = vpop.f32.mrb[16].mxu1 }
 0x69e   : > { %v4111_v49 = vadd.f32 %v4110_v38, %v4069_v36  ;;  %v4112_v40 = vpop.f32.mrb[17].mxu1 }
 0x69f   : > { %v4113_v42 = vadd.f32 %v4112_v40, %v4073_v37  ;;  %v4114_v43 = vpop.f32.mrb[18].mxu1 }
 0x6a0   : > { %v4117_v44 = vmax.f32 %v4111_v49, 0.0  ;;  %v4115_v45 = vpop.f32.mrb[19].mxu1 }
 0x6a1   : > { %v4118_v46 = vmax.f32 %v4113_v42, 0.0 }
 0x6a2   : > { %v4119_v48 = vpack.c.bf16 %v4117_v44, %v4117_v44 }
 0x6a3   : > { %v4120_v47 = vpack.c.bf16 %v4118_v46, %v4118_v46 }
 0x6a5   : > { %4282 = vmatprep.mubr.bf16.mxu0 %v4120_v47 }
 0x6a6   : > { %4283 = vmatmul.mubr.bf16.vlgmr.msra.gmra.mrb[28].mxu0 %v4119_v48 }
 0x779   : > { %v4940_v50 = vpop.f32.mrb[28].mxu0 }
 0x77a   : > { %v4941_v41 = vpop.f32.mrb[29].mxu0 }
 0x77b   : > { %v4942_v52 = vadd.f32 %v4941_v41, %v4940_v50  ;;  %v4943_v53 = vpop.f32.mrb[30].mxu0 }
 0x77c   : > { %v4944_v54 = vpop.f32.mrb[31].mxu0 }
 0x77d   : > { %v4285_v55 = vadd.f32 %v4942_v52, %v4153_v39 }
 0x77f   : > { %4290 = vst [vmem:[%s432_s17] sm:$0x1] %v4285_v55 }
 0x780   : > { %5629 = shalt.err (!%p5626_p3)
}
 0x781   : > { %s5630_s20 = scalar_lea.hbm %s7153_s23, 16  ;;  %s5634_s30 = scalar_lea.hbm %s7208_s13, 32 }
 0x782   : > { %p5631_p4 = scmp.ne.s32.totalorder %s7153_s23, %s5630_s20  ;;  %p5635_p9 = scmp.lt.u32.totalorder %s7153_s23, %s7208_s13 }
 0x783   : > { %p5636_p10 = scmp.lt.u32.totalorder %s5634_s30, %s5630_s20  ;;  %p5638_p12 = scmp.lt.u32.totalorder %s5630_s20, %s7153_s23 }
 0x784   : > { %p5632_p7 = pnand %p5631_p4, %p5792_p5 }
 0x785   : > { %p5637_p11 = por %p5636_p10, %p5635_p9 }
 0x786   : > { %p5633_p8 = pneg %p5632_p7 }
 0x787   : > { %p5639_p13 = por %p5638_p12, %p5637_p11 }
 0x789   : > { %p5640_p0 = pnand %p5639_p13, %p5633_p8 }
 0x78b   : > { %5643 = shalt.err (!%p5640_p0)
}
 0x78c   : > { %4998 = dma.vmem_to_hbm [thread:$0]  (%p5792_p5), %s7155_s24, 16, %s7153_s23, %s4292_s22  }
 0x78d PF: > { %p5004_p1 = scmp.ge.s32.totalorder %s5678_s28, 2  ;;  %s4316_s16 = sand.u32 1, %s5666_s25  }
 0x78e   : > { %s4317_s27 = scalar_lea.sflag [#allocation7], %s4316_s16 }
 0x78f   : > { %p5001_p2 = pnand %p5004_p1, %p5796_p6 }
 0x791   : > { %5661 = dma.done.wait (!%p5001_p2), %s4317_s27, 16  }
 0x792   : > { %5663 = vsyncadd (!%p5001_p2), %s4317_s27, 4294967280  ;;  %s7217_s28 = sld [smem:[#allocation10_spill]]  ;;  %s7218_s14 = sld [smem:[#allocation9_spill]] }
 0x793   : > { %s7219_s27 = sld [smem:[#allocation11_spill]]  ;;  %s7220_s25 = smov %s5670_s26 }
 0x798   : > { %p23_p3 = scmp.ge.s32.totalorder %s7217_s28, 4   ;;  %s7221_s26 = smov %s7218_s14 }
 0x79a   :  { %25 = sbr.rel (!%p23_p3) target bundleno = 3 (0x3), region = 135 }
 0x7a1   :  { %4321 = vsyncpa [#allocation7], 1 }
 0x7a2   :  { %4323 = vsyncpa [#allocation7 + $0x1], 1 }

</bundles_post_ra>
